<compile_context>
chip_gen: v7x
topology: tpu7x:2x2x1
jax: 0.10.0
libtpu: 0.0.40
codegen_flags: <defaults>
</compile_context>

<pallas_src>
import math

import jax
import jax.numpy as jnp
from jax.experimental import pallas as pl
from jax.experimental.pallas import tpu as pltpu

EPS_BN = 1e-5        # torch.nn.BatchNorm1d default
EPS_LN = 1e-5        # torch.nn.LayerNorm default
EPS_LN_BERT = 1e-12  # BERT LayerNorm eps
NEG_SLOPE = 0.2      # PyG GATConv default negative_slope
LANE = 128           # TPU lane width


# ----------------------------------------------------------------------------
# Padding helpers (plain-JAX glue; run once on weights / inputs)
# ----------------------------------------------------------------------------
def _round_up_lane(n):
    return -(-n // LANE) * LANE


def _pad_last(x, target):
    pad = target - x.shape[-1]
    if pad == 0:
        return x
    cfg = [(0, 0)] * (x.ndim - 1) + [(0, pad)]
    return jnp.pad(x, cfg)


def _pad_last2(x, rows, cols):
    pr = rows - x.shape[-2]
    pc = cols - x.shape[-1]
    if pr == 0 and pc == 0:
        return x
    cfg = [(0, 0)] * (x.ndim - 2) + [(0, pr), (0, pc)]
    return jnp.pad(x, cfg)


# ----------------------------------------------------------------------------
# Fused graph-encoder kernel
# ----------------------------------------------------------------------------
def graph_encoder_kernel(adj_ref, adjm_ref, pool_ref, x_ref,
                         gw_ref, gb_ref, gg_ref, gbt_ref,
                         aw_ref, asrc_ref, adst_ref, ab_ref, ag_ref, abt_ref,
                         w1_ref, b1_ref, w2_ref, b2_ref, w3_ref, b3_ref,
                         o_ref):
    """3x(GCN+BN+ReLU+res) + GAT+BN+ReLU+res + mean-pool + MLP, all in VMEM.

    The channel/lane axis is zero-padded to 128; padded lanes stay exactly 0
    through every stage because weights / biases / gamma / beta are zero-padded.
    """
    a = adj_ref[...]        # (N, N) sym-normalized adjacency (with self loops)
    adjm = adjm_ref[...]    # (N, N) 0/1 adjacency-with-self-loops mask
    x = x_ref[...]          # (N, Cp)

    def bn_relu_res(h, gamma, beta, res):
        # BatchNorm1d with per-call batch statistics (training-mode behavior)
        mean = jnp.mean(h, axis=0, keepdims=True)
        var = jnp.mean((h - mean) ** 2, axis=0, keepdims=True)
        hn = (h - mean) * jax.lax.rsqrt(var + EPS_BN) * gamma + beta
        return jnp.maximum(hn, 0.0) + res

    # ---- 3 x (GCNConv + BN + ReLU + residual) ----
    for l in range(gw_ref.shape[0]):
        xw = jnp.dot(x, gw_ref[l], preferred_element_type=jnp.float32)
        h = jnp.dot(a, xw, preferred_element_type=jnp.float32) + gb_ref[l]
        x = bn_relu_res(h, gg_ref[l], gbt_ref[l], x)

    # ---- single-head GATConv + BN + ReLU + residual ----
    wx = jnp.dot(x, aw_ref[...], preferred_element_type=jnp.float32)      # (N, Cp)
    # e[i, j] = a_dst . Wx_i + a_src . Wx_j   (no explicit transpose)
    s_dst = jnp.sum(wx * adst_ref[...], axis=1, keepdims=True)            # (N, 1)
    s_src = jax.lax.dot_general(asrc_ref[...], wx, (((1,), (1,)), ((), ())),
                                preferred_element_type=jnp.float32)       # (1, N)
    e = s_dst + s_src
    e = jnp.where(e > 0, e, NEG_SLOPE * e)                                # LeakyReLU
    e = jnp.where(adjm > 0, e, -1e30)                                     # mask non-edges
    e = e - jnp.max(e, axis=1, keepdims=True)
    p = jnp.exp(e)
    alpha = p * pl.reciprocal(jnp.sum(p, axis=1, keepdims=True), approx=True)
    h = jnp.dot(alpha, wx, preferred_element_type=jnp.float32) + ab_ref[...]
    x = bn_relu_res(h, ag_ref[...], abt_ref[...], x)

    # ---- global_mean_pool + 3-layer MLP head ----
    pooled = jnp.dot(pool_ref[...], x, preferred_element_type=jnp.float32)  # (G, Cp)
    h = jnp.dot(pooled, w1_ref[...], preferred_element_type=jnp.float32) + b1_ref[...]
    h = jnp.maximum(h, 0.0)
    h = jnp.dot(h, w2_ref[...], preferred_element_type=jnp.float32) + b2_ref[...]
    o_ref[...] = jnp.dot(h, w3_ref[...], preferred_element_type=jnp.float32) + b3_ref[...]


def graph_encoder_call(gp, adj_norm, adj_mask, pool_mat, x_pad, nout):
    n_graphs = pool_mat.shape[0]
    noutp = gp["w3"].shape[-1]
    args = (adj_norm, adj_mask, pool_mat, x_pad,
            gp["gcn_w"], gp["gcn_b"], gp["gcn_g"], gp["gcn_bt"],
            gp["gat_w"], gp["gat_asrc"], gp["gat_adst"], gp["gat_b"],
            gp["gat_g"], gp["gat_bt"],
            gp["w1"], gp["b1"], gp["w2"], gp["b2"], gp["w3"], gp["b3"])
    out = pl.pallas_call(
        graph_encoder_kernel,
        out_shape=jax.ShapeDtypeStruct((n_graphs, noutp), jnp.float32),
        in_specs=[pl.BlockSpec(memory_space=pltpu.MemorySpace.VMEM) for _ in args],
        out_specs=pl.BlockSpec(memory_space=pltpu.MemorySpace.VMEM),
    )(*args)
    return out[:, :nout]


# ----------------------------------------------------------------------------
# Fused text-encoder kernel (all BERT layers + CLS head)
# ----------------------------------------------------------------------------
def make_text_encoder_kernel(n_layers, hp, h_real, nout_real):
    inv_sqrt_h = 1.0 / math.sqrt(h_real)

    def layer_norm(h, gamma, beta, lane_mask, n_real, eps):
        # LayerNorm over the real (unpadded) lanes; padded output lanes are 0
        # because gamma/beta are zero-padded.
        mean = jnp.sum(h * lane_mask, axis=-1, keepdims=True) * (1.0 / n_real)
        diff = (h - mean) * lane_mask
        var = jnp.sum(diff * diff, axis=-1, keepdims=True) * (1.0 / n_real)
        return diff * jax.lax.rsqrt(var + eps) * gamma + beta

    def kernel(x_ref, m_ref, lmh_ref,
               wqkv_ref, bqkv_ref, wo_ref, bo_ref, g1_ref, be1_ref,
               wi_ref, bi_ref, wf_ref, bf_ref, g2_ref, be2_ref,
               cw_ref, cb_ref, cg_ref, cbt_ref, lmo_ref, o_ref):
        x = x_ref[0]                 # (S, Hp)
        m = m_ref[0]                 # (1, S) additive key mask
        lane_h = lmh_ref[...]        # (1, Hp)

        for l in range(n_layers):
            # Fused QKV: one (S, Hp) x (Hp, 3Hp) matmul, then static slices.
            qkv = jnp.dot(x, wqkv_ref[l], preferred_element_type=jnp.float32) + bqkv_ref[l]
            q = qkv[:, 0:hp]
            k = qkv[:, hp:2 * hp]
            v = qkv[:, 2 * hp:3 * hp]
            # scores: contract the last axes (no explicit transpose of k)
            s = jax.lax.dot_general(q, k, (((1,), (1,)), ((), ())),
                                    preferred_element_type=jnp.float32)   # (S, S)
            s = s * inv_sqrt_h + m
            s = s - jnp.max(s, axis=-1, keepdims=True)
            p = jnp.exp(s)
            attn = p * pl.reciprocal(jnp.sum(p, axis=-1, keepdims=True), approx=True)
            ctx = jnp.dot(attn, v, preferred_element_type=jnp.float32)
            a_out = jnp.dot(ctx, wo_ref[l], preferred_element_type=jnp.float32) + bo_ref[l]
            h = layer_norm(x + a_out, g1_ref[l], be1_ref[l], lane_h, h_real, EPS_LN_BERT)
            f = jnp.dot(h, wi_ref[l], preferred_element_type=jnp.float32) + bi_ref[l]
            f = jax.nn.gelu(f, approximate=True)
            f = jnp.dot(f, wf_ref[l], preferred_element_type=jnp.float32) + bf_ref[l]
            x = layer_norm(h + f, g2_ref[l], be2_ref[l], lane_h, h_real, EPS_LN_BERT)

        # CLS token -> Linear(H, nout) -> LayerNorm(nout)
        cls = x[0:1, :]                                                    # (1, Hp)
        hc = jnp.dot(cls, cw_ref[...], preferred_element_type=jnp.float32) + cb_ref[...]
        o_ref[0] = layer_norm(hc, cg_ref[...], cbt_ref[...], lmo_ref[...],
                              nout_real, EPS_LN)

    return kernel


def text_encoder_call(tp, h0_pad, addmask, n_layers, h_real, nout_real):
    B, S, hp = h0_pad.shape
    noutp = tp["cls_w"].shape[-1]
    fdim = tp["wi"].shape[-1]
    L = n_layers

    def rep(shape):
        nd = len(shape)
        return pl.BlockSpec(shape, lambda b: (0,) * nd)

    in_specs = [
        pl.BlockSpec((1, S, hp), lambda b: (b, 0, 0)),        # hidden states
        pl.BlockSpec((1, 1, S), lambda b: (b, 0, 0)),         # additive attention mask
        rep((1, hp)),                                          # lane mask (hidden)
        rep((L, hp, 3 * hp)), rep((L, 1, 3 * hp)),             # fused QKV proj
        rep((L, hp, hp)), rep((L, 1, hp)),                     # attn output proj
        rep((L, 1, hp)), rep((L, 1, hp)),                      # LN1 gamma/beta
        rep((L, hp, fdim)), rep((L, 1, fdim)),                 # FFN in
        rep((L, fdim, hp)), rep((L, 1, hp)),                   # FFN out
        rep((L, 1, hp)), rep((L, 1, hp)),                      # LN2 gamma/beta
        rep((hp, noutp)), rep((1, noutp)),                     # CLS linear
        rep((1, noutp)), rep((1, noutp)),                      # CLS LayerNorm gamma/beta
        rep((1, noutp)),                                       # lane mask (nout)
    ]
    out_specs = pl.BlockSpec((1, 1, noutp), lambda b: (b, 0, 0))

    kernel = make_text_encoder_kernel(L, hp, h_real, nout_real)
    out = pl.pallas_call(
        kernel,
        grid=(B,),
        in_specs=in_specs,
        out_specs=out_specs,
        out_shape=jax.ShapeDtypeStruct((B, 1, noutp), jnp.float32),
        compiler_params=pltpu.CompilerParams(
            dimension_semantics=("parallel",)),   # v7x: batch across the 2 TCs
    )(h0_pad, addmask, tp["lane_h"],
      tp["wqkv"], tp["bqkv"], tp["wo"], tp["bo"], tp["g1"], tp["be1"],
      tp["wi"], tp["bi"], tp["wf"], tp["bf"], tp["g2"], tp["be2"],
      tp["cls_w"], tp["cls_b"], tp["cls_g"], tp["cls_bt"], tp["lane_out"])
    return out[:, 0, :nout_real]


# ----------------------------------------------------------------------------
# Full model forward
# ----------------------------------------------------------------------------
def make_model_forward(dims):
    n_layers = dims["n_layers"]
    h_real = dims["hidden"]
    nout = dims["nout"]
    hp = dims["hidden_padded"]

    def forward(kparams, node_x_pad, adj_norm, adj_mask, pool_mat,
                input_ids, attention_mask):
        # ---- graph encoder: one fused Pallas kernel ----
        graph_encoded = graph_encoder_call(kparams["graph"], adj_norm, adj_mask,
                                           pool_mat, node_x_pad, nout)

        # ---- text encoder: embedding gather + embedding LayerNorm in glue ----
        te = kparams["text_embed"]
        S = input_ids.shape[1]
        emb = (te["word_emb"][input_ids]
               + te["pos_emb"][None, :S, :]
               + te["type_emb"][None, :, :])
        mean = jnp.mean(emb, axis=-1, keepdims=True)
        var = jnp.mean((emb - mean) ** 2, axis=-1, keepdims=True)
        h0 = (emb - mean) * jax.lax.rsqrt(var + EPS_LN_BERT) * te["emb_g"] + te["emb_b"]
        h0_pad = _pad_last(h0, hp)                                         # lane-dense
        addmask = ((1.0 - attention_mask.astype(jnp.float32)) * -1e9)[:, None, :]

        text_encoded = text_encoder_call(kparams["text"], h0_pad, addmask,
                                         n_layers, h_real, nout)
        return graph_encoded, text_encoded

    return forward


# ----------------------------------------------------------------------------
# Deterministic parameter construction (unpadded "torch-like" params)
# ----------------------------------------------------------------------------
def _init_params(key, C, NHID, NOUT, H, F, VOCAB, SMAX, NLAYERS):
    keys = iter(jax.random.split(key, 256))
    nk = lambda: next(keys)
    rnd = lambda shape, s=0.1: s * jax.random.normal(nk(), shape, dtype=jnp.float32)
    ones = lambda shape: jnp.ones(shape, jnp.float32)
    zeros = lambda shape: jnp.zeros(shape, jnp.float32)

    def gcn_p():
        return {"w": rnd((C, C)), "b": zeros((1, C)),
                "gamma": ones((1, C)), "beta": zeros((1, C))}

    return {
        "gcn1": gcn_p(), "gcn2": gcn_p(), "gcn3": gcn_p(),
        "gat": {"w": rnd((C, C)), "a_src": rnd((1, C)), "a_dst": rnd((1, C)),
                "b": zeros((1, C)), "gamma": ones((1, C)), "beta": zeros((1, C))},
        "mlp": {"w1": rnd((C, NHID)), "b1": zeros((1, NHID)),
                "w2": rnd((NHID, NHID)), "b2": zeros((1, NHID)),
                "w3": rnd((NHID, NOUT)), "b3": zeros((1, NOUT))},
        "text": {
            "word_emb": rnd((VOCAB, H)),
            "pos_emb": rnd((SMAX, H)),
            "type_emb": rnd((1, H)),
            "emb_g": ones((1, H)), "emb_b": zeros((1, H)),
            "layers": [
                {"wq": rnd((H, H)), "bq": zeros((1, H)),
                 "wk": rnd((H, H)), "bk": zeros((1, H)),
                 "wv": rnd((H, H)), "bv": zeros((1, H)),
                 "wo": rnd((H, H)), "bo": zeros((1, H)),
                 "g1": ones((1, H)), "be1": zeros((1, H)),
                 "wi": rnd((H, F)), "bi": zeros((1, F)),
                 "wf": rnd((F, H)), "bf": zeros((1, H)),
                 "g2": ones((1, H)), "be2": zeros((1, H))}
                for _ in range(NLAYERS)
            ],
            "cls": {"w": rnd((H, NOUT)), "b": zeros((1, NOUT)),
                    "gamma": ones((1, NOUT)), "beta": zeros((1, NOUT))},
        },
    }


def pack_kernel_params(params, hidden, nout):
    """Zero-pad lane axes to 128 and stack per-layer weights for the kernels."""
    C = params["gcn1"]["w"].shape[0]
    nhid = params["mlp"]["w1"].shape[1]
    F = params["text"]["layers"][0]["wi"].shape[1]
    cp = _round_up_lane(C)
    nhp = _round_up_lane(nhid)
    noutp = _round_up_lane(nout)
    hp = _round_up_lane(hidden)
    fp = _round_up_lane(F)

    gcn = [params["gcn1"], params["gcn2"], params["gcn3"]]
    gat = params["gat"]
    mlp = params["mlp"]
    graph = {
        "gcn_w": jnp.stack([_pad_last2(p["w"], cp, cp) for p in gcn]),
        "gcn_b": jnp.stack([_pad_last(p["b"], cp) for p in gcn]),
        "gcn_g": jnp.stack([_pad_last(p["gamma"], cp) for p in gcn]),
        "gcn_bt": jnp.stack([_pad_last(p["beta"], cp) for p in gcn]),
        "gat_w": _pad_last2(gat["w"], cp, cp),
        "gat_asrc": _pad_last(gat["a_src"], cp),
        "gat_adst": _pad_last(gat["a_dst"], cp),
        "gat_b": _pad_last(gat["b"], cp),
        "gat_g": _pad_last(gat["gamma"], cp),
        "gat_bt": _pad_last(gat["beta"], cp),
        "w1": _pad_last2(mlp["w1"], cp, nhp), "b1": _pad_last(mlp["b1"], nhp),
        "w2": _pad_last2(mlp["w2"], nhp, nhp), "b2": _pad_last(mlp["b2"], nhp),
        "w3": _pad_last2(mlp["w3"], nhp, noutp), "b3": _pad_last(mlp["b3"], noutp),
    }

    te = params["text"]
    layers = te["layers"]
    stack = lambda fn: jnp.stack([fn(lp) for lp in layers])
    text = {
        "lane_h": _pad_last(jnp.ones((1, hidden), jnp.float32), hp),
        "lane_out": _pad_last(jnp.ones((1, nout), jnp.float32), noutp),
        "wqkv": stack(lambda lp: jnp.concatenate(
            [_pad_last2(lp["wq"], hp, hp),
             _pad_last2(lp["wk"], hp, hp),
             _pad_last2(lp["wv"], hp, hp)], axis=1)),
        "bqkv": stack(lambda lp: jnp.concatenate(
            [_pad_last(lp["bq"], hp),
             _pad_last(lp["bk"], hp),
             _pad_last(lp["bv"], hp)], axis=1)),
        "wo": stack(lambda lp: _pad_last2(lp["wo"], hp, hp)),
        "bo": stack(lambda lp: _pad_last(lp["bo"], hp)),
        "g1": stack(lambda lp: _pad_last(lp["g1"], hp)),
        "be1": stack(lambda lp: _pad_last(lp["be1"], hp)),
        "wi": stack(lambda lp: _pad_last2(lp["wi"], hp, fp)),
        "bi": stack(lambda lp: _pad_last(lp["bi"], fp)),
        "wf": stack(lambda lp: _pad_last2(lp["wf"], fp, hp)),
        "bf": stack(lambda lp: _pad_last(lp["bf"], hp)),
        "g2": stack(lambda lp: _pad_last(lp["g2"], hp)),
        "be2": stack(lambda lp: _pad_last(lp["be2"], hp)),
        "cls_w": _pad_last2(te["cls"]["w"], hp, noutp),
        "cls_b": _pad_last(te["cls"]["b"], noutp),
        "cls_g": _pad_last(te["cls"]["gamma"], noutp),
        "cls_bt": _pad_last(te["cls"]["beta"], noutp),
    }
    text_embed = {"word_emb": te["word_emb"], "pos_emb": te["pos_emb"],
                  "type_emb": te["type_emb"], "emb_g": te["emb_g"], "emb_b": te["emb_b"]}
    return {"graph": graph, "text": text, "text_embed": text_embed}


# ----------------------------------------------------------------------------
# Plain-JAX reference (unpadded) for the numerical check
# ----------------------------------------------------------------------------
def _reference_forward(params, node_x, adj_norm, adj_mask, pool_mat,
                       input_ids, attention_mask):
    x = node_x
    for name in ("gcn1", "gcn2", "gcn3"):
        p = params[name]
        h = adj_norm @ (x @ p["w"]) + p["b"]
        mean = h.mean(0, keepdims=True)
        var = ((h - mean) ** 2).mean(0, keepdims=True)
        hn = (h - mean) / jnp.sqrt(var + EPS_BN) * p["gamma"] + p["beta"]
        x = jnp.maximum(hn, 0.0) + x
    p = params["gat"]
    wx = x @ p["w"]
    s_src = (wx * p["a_src"]).sum(1, keepdims=True)
    s_dst = (wx * p["a_dst"]).sum(1, keepdims=True)
    e = s_dst + s_src.T
    e = jnp.where(e > 0, e, NEG_SLOPE * e)
    e = jnp.where(adj_mask > 0, e, -1e30)
    e = e - e.max(1, keepdims=True)
    pe = jnp.exp(e)
    alpha = pe / pe.sum(1, keepdims=True)
    h = alpha @ wx + p["b"]
    mean = h.mean(0, keepdims=True)
    var = ((h - mean) ** 2).mean(0, keepdims=True)
    hn = (h - mean) / jnp.sqrt(var + EPS_BN) * p["gamma"] + p["beta"]
    x = jnp.maximum(hn, 0.0) + x
    pooled = pool_mat @ x
    m = params["mlp"]
    h = jnp.maximum(pooled @ m["w1"] + m["b1"], 0.0)
    h = h @ m["w2"] + m["b2"]
    graph_out = h @ m["w3"] + m["b3"]

    te = params["text"]
    S = input_ids.shape[1]
    emb = te["word_emb"][input_ids] + te["pos_emb"][None, :S] + te["type_emb"][None]
    mean = emb.mean(-1, keepdims=True)
    var = ((emb - mean) ** 2).mean(-1, keepdims=True)
    h = (emb - mean) / jnp.sqrt(var + EPS_LN_BERT) * te["emb_g"] + te["emb_b"]
    addmask = ((1.0 - attention_mask) * -1e9)[:, None, :]
    H = h.shape[-1]
    for lp in te["layers"]:
        q = h @ lp["wq"] + lp["bq"]
        k = h @ lp["wk"] + lp["bk"]
        v = h @ lp["wv"] + lp["bv"]
        s = jnp.einsum("bqh,bkh->bqk", q, k) / math.sqrt(H) + addmask
        s = s - s.max(-1, keepdims=True)
        ps = jnp.exp(s)
        attn = ps / ps.sum(-1, keepdims=True)
        ctx = jnp.einsum("bqk,bkh->bqh", attn, v)
        y = h + ctx @ lp["wo"] + lp["bo"]
        mean = y.mean(-1, keepdims=True)
        var = ((y - mean) ** 2).mean(-1, keepdims=True)
        y = (y - mean) / jnp.sqrt(var + EPS_LN_BERT) * lp["g1"] + lp["be1"]
        f = jax.nn.gelu(y @ lp["wi"] + lp["bi"], approximate=True)
        f = f @ lp["wf"] + lp["bf"]
        z = y + f
        mean = z.mean(-1, keepdims=True)
        var = ((z - mean) ** 2).mean(-1, keepdims=True)
        h = (z - mean) / jnp.sqrt(var + EPS_LN_BERT) * lp["g2"] + lp["be2"]
    cls = h[:, 0, :]
    c = te["cls"]
    hc = cls @ c["w"] + c["b"]
    mean = hc.mean(-1, keepdims=True)
    var = ((hc - mean) ** 2).mean(-1, keepdims=True)
    text_out = (hc - mean) / jnp.sqrt(var + EPS_LN) * c["gamma"] + c["beta"]
    return graph_out, text_out


# ----------------------------------------------------------------------------
# main
# ----------------------------------------------------------------------------
if __name__ == "__main__":
    # sizes (small, consistent with the module's forward)
    B, S = 2, 8                # text batch, sequence length
    H, F = 32, 128             # synthetic-BERT hidden / FFN size
    VOCAB, NLAYERS = 64, 2
    G, NODES_PER_G = 2, 8      # graphs in batch, nodes per graph
    N = G * NODES_PER_G
    C = 32                     # num_node_features == graph_hidden_channels (residual)
    NHID, NOUT = 32, 16

    root = jax.random.PRNGKey(0)
    k_param, k_x, k_ids = jax.random.split(root, 3)

    params = _init_params(k_param, C, NHID, NOUT, H, F, VOCAB, S, NLAYERS)
    kparams = pack_kernel_params(params, H, NOUT)

    # ---- graph batch (deterministic ring graphs) -> dense operators (glue) ----
    src, dst = [], []
    for g in range(G):
        base = g * NODES_PER_G
        for i in range(NODES_PER_G):
            j = (i + 1) % NODES_PER_G
            src += [base + i, base + j]
            dst += [base + j, base + i]
    edge_index = jnp.array([src, dst], dtype=jnp.int32)                 # (2, E)

    adj = jnp.zeros((N, N), jnp.float32).at[edge_index[1], edge_index[0]].set(1.0)
    adj_sl = adj + jnp.eye(N, dtype=jnp.float32)                        # add self loops
    deg = jnp.sum(adj_sl, axis=1)
    dinv = 1.0 / jnp.sqrt(deg)
    adj_norm = dinv[:, None] * adj_sl * dinv[None, :]                   # GCN normalization
    adj_mask = adj_sl                                                   # GAT neighborhood mask

    batch_vec = jnp.repeat(jnp.arange(G), NODES_PER_G)                  # PyG `batch`
    pool_mat = (jnp.arange(G)[:, None] == batch_vec[None, :]).astype(jnp.float32)
    pool_mat = pool_mat / jnp.sum(pool_mat, axis=1, keepdims=True)      # mean-pool matrix

    node_x = jax.random.normal(k_x, (N, C), dtype=jnp.float32)
    node_x_pad = _pad_last(node_x, LANE)

    # ---- text inputs ----
    input_ids = jax.random.randint(k_ids, (B, S), 0, VOCAB, dtype=jnp.int32)
    attention_mask = jnp.ones((B, S), dtype=jnp.float32)

    dims = {"n_layers": NLAYERS, "hidden": H, "nout": NOUT, "hidden_padded": LANE}
    fwd = jax.jit(make_model_forward(dims))
    graph_out, text_out = fwd(kparams, node_x_pad, adj_norm, adj_mask, pool_mat,
                              input_ids, attention_mask)
    jax.block_until_ready(graph_out)
    jax.block_until_ready(text_out)

    assert graph_out.shape == (G, NOUT) and text_out.shape == (B, NOUT)

    # numerical check vs. plain-JAX reference (loose: approx reciprocal + MXU rounding)
    with jax.default_matmul_precision("float32"):
        ref_graph, ref_text = _reference_forward(params, node_x, adj_norm, adj_mask,
                                                 pool_mat, input_ids, attention_mask)
    assert jnp.allclose(graph_out, ref_graph, atol=5e-2, rtol=5e-2), (
        "graph mismatch, max abs diff = %g" % float(jnp.max(jnp.abs(graph_out - ref_graph))))
    assert jnp.allclose(text_out, ref_text, atol=5e-2, rtol=5e-2), (
        "text mismatch, max abs diff = %g" % float(jnp.max(jnp.abs(text_out - ref_text))))

    print("KERNEL_OK")
</pallas_src>

<mosaic_0001>
module attributes {stable_mosaic.version = 11 : i64} {
  func.func @graph_encoder_kernel(%arg0: memref<16x16xf32, #tpu.memory_space<vmem>>, %arg1: memref<16x16xf32, #tpu.memory_space<vmem>>, %arg2: memref<2x16xf32, #tpu.memory_space<vmem>>, %arg3: memref<16x128xf32, #tpu.memory_space<vmem>>, %arg4: memref<3x128x128xf32, #tpu.memory_space<vmem>>, %arg5: memref<3x1x128xf32, #tpu.memory_space<vmem>>, %arg6: memref<3x1x128xf32, #tpu.memory_space<vmem>>, %arg7: memref<3x1x128xf32, #tpu.memory_space<vmem>>, %arg8: memref<128x128xf32, #tpu.memory_space<vmem>>, %arg9: memref<1x128xf32, #tpu.memory_space<vmem>>, %arg10: memref<1x128xf32, #tpu.memory_space<vmem>>, %arg11: memref<1x128xf32, #tpu.memory_space<vmem>>, %arg12: memref<1x128xf32, #tpu.memory_space<vmem>>, %arg13: memref<1x128xf32, #tpu.memory_space<vmem>>, %arg14: memref<128x128xf32, #tpu.memory_space<vmem>>, %arg15: memref<1x128xf32, #tpu.memory_space<vmem>>, %arg16: memref<128x128xf32, #tpu.memory_space<vmem>>, %arg17: memref<1x128xf32, #tpu.memory_space<vmem>>, %arg18: memref<128x128xf32, #tpu.memory_space<vmem>>, %arg19: memref<1x128xf32, #tpu.memory_space<vmem>>, %arg20: memref<2x128xf32, #tpu.memory_space<vmem>>) attributes {dimension_semantics = [], scalar_prefetch = 0 : i64, scratch_operands = 0 : i64, tpu.core_type = #tpu.core_type<tc>} {
    %c0 = arith.constant 0 : index
    %c0_0 = arith.constant 0 : index
    %0 = vector.load %arg0[%c0, %c0_0] : memref<16x16xf32, #tpu.memory_space<vmem>>, vector<16x16xf32>
    %c0_1 = arith.constant 0 : index
    %c0_2 = arith.constant 0 : index
    %1 = vector.load %arg1[%c0_1, %c0_2] : memref<16x16xf32, #tpu.memory_space<vmem>>, vector<16x16xf32>
    %c0_3 = arith.constant 0 : index
    %c0_4 = arith.constant 0 : index
    %2 = vector.load %arg3[%c0_3, %c0_4] : memref<16x128xf32, #tpu.memory_space<vmem>>, vector<16x128xf32>
    %c0_5 = arith.constant 0 : index
    %c0_6 = arith.constant 0 : index
    %c0_7 = arith.constant 0 : index
    %3 = vector.load %arg4[%c0_5, %c0_6, %c0_7] : memref<3x128x128xf32, #tpu.memory_space<vmem>>, vector<1x128x128xf32>
    %4 = vector.shape_cast %3 : vector<1x128x128xf32> to vector<128x128xf32>
    %cst = arith.constant dense<0.000000e+00> : vector<16x128xf32>
    %5 = tpu.matmul %2, %4, %cst {dimension_numbers = #tpu.dot_dimension_numbers<[1], [0], [0], [1], [0, 0, 1, 1], [], []>} : vector<16x128xf32>, vector<128x128xf32>, vector<16x128xf32> -> vector<16x128xf32>
    %cst_8 = arith.constant dense<0.000000e+00> : vector<16x128xf32>
    %6 = tpu.matmul %0, %5, %cst_8 {dimension_numbers = #tpu.dot_dimension_numbers<[1], [0], [0], [1], [0, 0, 1, 1], [], []>} : vector<16x16xf32>, vector<16x128xf32>, vector<16x128xf32> -> vector<16x128xf32>
    %c0_9 = arith.constant 0 : index
    %c0_10 = arith.constant 0 : index
    %c0_11 = arith.constant 0 : index
    %7 = vector.load %arg5[%c0_9, %c0_10, %c0_11] : memref<3x1x128xf32, #tpu.memory_space<vmem>>, vector<1x1x128xf32>
    %8 = vector.shape_cast %7 : vector<1x1x128xf32> to vector<1x128xf32>
    %9 = vector.broadcast %8 : vector<1x128xf32> to vector<16x128xf32>
    %10 = arith.addf %6, %9 : vector<16x128xf32>
    %c0_12 = arith.constant 0 : index
    %c0_13 = arith.constant 0 : index
    %c0_14 = arith.constant 0 : index
    %11 = vector.load %arg6[%c0_12, %c0_13, %c0_14] : memref<3x1x128xf32, #tpu.memory_space<vmem>>, vector<1x1x128xf32>
    %12 = vector.shape_cast %11 : vector<1x1x128xf32> to vector<1x128xf32>
    %c0_15 = arith.constant 0 : index
    %c0_16 = arith.constant 0 : index
    %c0_17 = arith.constant 0 : index
    %13 = vector.load %arg7[%c0_15, %c0_16, %c0_17] : memref<3x1x128xf32, #tpu.memory_space<vmem>>, vector<1x1x128xf32>
    %14 = vector.shape_cast %13 : vector<1x1x128xf32> to vector<1x128xf32>
    %cst_18 = arith.constant dense<0.000000e+00> : vector<128xf32>
    %15 = vector.multi_reduction <add>, %10, %cst_18 [0] : vector<16x128xf32> to vector<128xf32>
    %16 = vector.shape_cast %15 : vector<128xf32> to vector<1x128xf32>
    %cst_19 = arith.constant 1.600000e+01 : f32
    %17 = vector.broadcast %cst_19 : f32 to vector<1x128xf32>
    %18 = arith.divf %16, %17 : vector<1x128xf32>
    %19 = vector.broadcast %18 : vector<1x128xf32> to vector<16x128xf32>
    %20 = arith.subf %10, %19 : vector<16x128xf32>
    %21 = arith.mulf %20, %20 : vector<16x128xf32>
    %cst_20 = arith.constant dense<0.000000e+00> : vector<128xf32>
    %22 = vector.multi_reduction <add>, %21, %cst_20 [0] : vector<16x128xf32> to vector<128xf32>
    %23 = vector.shape_cast %22 : vector<128xf32> to vector<1x128xf32>
    %cst_21 = arith.constant 1.600000e+01 : f32
    %24 = vector.broadcast %cst_21 : f32 to vector<1x128xf32>
    %25 = arith.divf %23, %24 : vector<1x128xf32>
    %26 = vector.broadcast %18 : vector<1x128xf32> to vector<16x128xf32>
    %27 = arith.subf %10, %26 : vector<16x128xf32>
    %cst_22 = arith.constant 9.99999974E-6 : f32
    %28 = vector.broadcast %cst_22 : f32 to vector<1x128xf32>
    %29 = arith.addf %25, %28 : vector<1x128xf32>
    %30 = math.rsqrt %29 : vector<1x128xf32>
    %31 = vector.broadcast %30 : vector<1x128xf32> to vector<16x128xf32>
    %32 = arith.mulf %27, %31 : vector<16x128xf32>
    %33 = vector.broadcast %12 : vector<1x128xf32> to vector<16x128xf32>
    %34 = arith.mulf %32, %33 : vector<16x128xf32>
    %35 = vector.broadcast %14 : vector<1x128xf32> to vector<16x128xf32>
    %36 = arith.addf %34, %35 : vector<16x128xf32>
    %cst_23 = arith.constant 0.000000e+00 : f32
    %37 = vector.broadcast %cst_23 : f32 to vector<16x128xf32>
    %38 = arith.maximumf %36, %37 : vector<16x128xf32>
    %39 = arith.addf %38, %2 : vector<16x128xf32>
    %c1 = arith.constant 1 : index
    %c0_24 = arith.constant 0 : index
    %c0_25 = arith.constant 0 : index
    %40 = vector.load %arg4[%c1, %c0_24, %c0_25] : memref<3x128x128xf32, #tpu.memory_space<vmem>>, vector<1x128x128xf32>
    %41 = vector.shape_cast %40 : vector<1x128x128xf32> to vector<128x128xf32>
    %cst_26 = arith.constant dense<0.000000e+00> : vector<16x128xf32>
    %42 = tpu.matmul %39, %41, %cst_26 {dimension_numbers = #tpu.dot_dimension_numbers<[1], [0], [0], [1], [0, 0, 1, 1], [], []>} : vector<16x128xf32>, vector<128x128xf32>, vector<16x128xf32> -> vector<16x128xf32>
    %cst_27 = arith.constant dense<0.000000e+00> : vector<16x128xf32>
    %43 = tpu.matmul %0, %42, %cst_27 {dimension_numbers = #tpu.dot_dimension_numbers<[1], [0], [0], [1], [0, 0, 1, 1], [], []>} : vector<16x16xf32>, vector<16x128xf32>, vector<16x128xf32> -> vector<16x128xf32>
    %c1_28 = arith.constant 1 : index
    %c0_29 = arith.constant 0 : index
    %c0_30 = arith.constant 0 : index
    %44 = vector.load %arg5[%c1_28, %c0_29, %c0_30] : memref<3x1x128xf32, #tpu.memory_space<vmem>>, vector<1x1x128xf32>
    %45 = vector.shape_cast %44 : vector<1x1x128xf32> to vector<1x128xf32>
    %46 = vector.broadcast %45 : vector<1x128xf32> to vector<16x128xf32>
    %47 = arith.addf %43, %46 : vector<16x128xf32>
    %c1_31 = arith.constant 1 : index
    %c0_32 = arith.constant 0 : index
    %c0_33 = arith.constant 0 : index
    %48 = vector.load %arg6[%c1_31, %c0_32, %c0_33] : memref<3x1x128xf32, #tpu.memory_space<vmem>>, vector<1x1x128xf32>
    %49 = vector.shape_cast %48 : vector<1x1x128xf32> to vector<1x128xf32>
    %c1_34 = arith.constant 1 : index
    %c0_35 = arith.constant 0 : index
    %c0_36 = arith.constant 0 : index
    %50 = vector.load %arg7[%c1_34, %c0_35, %c0_36] : memref<3x1x128xf32, #tpu.memory_space<vmem>>, vector<1x1x128xf32>
    %51 = vector.shape_cast %50 : vector<1x1x128xf32> to vector<1x128xf32>
    %cst_37 = arith.constant dense<0.000000e+00> : vector<128xf32>
    %52 = vector.multi_reduction <add>, %47, %cst_37 [0] : vector<16x128xf32> to vector<128xf32>
    %53 = vector.shape_cast %52 : vector<128xf32> to vector<1x128xf32>
    %cst_38 = arith.constant 1.600000e+01 : f32
    %54 = vector.broadcast %cst_38 : f32 to vector<1x128xf32>
    %55 = arith.divf %53, %54 : vector<1x128xf32>
    %56 = vector.broadcast %55 : vector<1x128xf32> to vector<16x128xf32>
    %57 = arith.subf %47, %56 : vector<16x128xf32>
    %58 = arith.mulf %57, %57 : vector<16x128xf32>
    %cst_39 = arith.constant dense<0.000000e+00> : vector<128xf32>
    %59 = vector.multi_reduction <add>, %58, %cst_39 [0] : vector<16x128xf32> to vector<128xf32>
    %60 = vector.shape_cast %59 : vector<128xf32> to vector<1x128xf32>
    %cst_40 = arith.constant 1.600000e+01 : f32
    %61 = vector.broadcast %cst_40 : f32 to vector<1x128xf32>
    %62 = arith.divf %60, %61 : vector<1x128xf32>
    %63 = vector.broadcast %55 : vector<1x128xf32> to vector<16x128xf32>
    %64 = arith.subf %47, %63 : vector<16x128xf32>
    %cst_41 = arith.constant 9.99999974E-6 : f32
    %65 = vector.broadcast %cst_41 : f32 to vector<1x128xf32>
    %66 = arith.addf %62, %65 : vector<1x128xf32>
    %67 = math.rsqrt %66 : vector<1x128xf32>
    %68 = vector.broadcast %67 : vector<1x128xf32> to vector<16x128xf32>
    %69 = arith.mulf %64, %68 : vector<16x128xf32>
    %70 = vector.broadcast %49 : vector<1x128xf32> to vector<16x128xf32>
    %71 = arith.mulf %69, %70 : vector<16x128xf32>
    %72 = vector.broadcast %51 : vector<1x128xf32> to vector<16x128xf32>
    %73 = arith.addf %71, %72 : vector<16x128xf32>
    %cst_42 = arith.constant 0.000000e+00 : f32
    %74 = vector.broadcast %cst_42 : f32 to vector<16x128xf32>
    %75 = arith.maximumf %73, %74 : vector<16x128xf32>
    %76 = arith.addf %75, %39 : vector<16x128xf32>
    %c2 = arith.constant 2 : index
    %c0_43 = arith.constant 0 : index
    %c0_44 = arith.constant 0 : index
    %77 = vector.load %arg4[%c2, %c0_43, %c0_44] : memref<3x128x128xf32, #tpu.memory_space<vmem>>, vector<1x128x128xf32>
    %78 = vector.shape_cast %77 : vector<1x128x128xf32> to vector<128x128xf32>
    %cst_45 = arith.constant dense<0.000000e+00> : vector<16x128xf32>
    %79 = tpu.matmul %76, %78, %cst_45 {dimension_numbers = #tpu.dot_dimension_numbers<[1], [0], [0], [1], [0, 0, 1, 1], [], []>} : vector<16x128xf32>, vector<128x128xf32>, vector<16x128xf32> -> vector<16x128xf32>
    %cst_46 = arith.constant dense<0.000000e+00> : vector<16x128xf32>
    %80 = tpu.matmul %0, %79, %cst_46 {dimension_numbers = #tpu.dot_dimension_numbers<[1], [0], [0], [1], [0, 0, 1, 1], [], []>} : vector<16x16xf32>, vector<16x128xf32>, vector<16x128xf32> -> vector<16x128xf32>
    %c2_47 = arith.constant 2 : index
    %c0_48 = arith.constant 0 : index
    %c0_49 = arith.constant 0 : index
    %81 = vector.load %arg5[%c2_47, %c0_48, %c0_49] : memref<3x1x128xf32, #tpu.memory_space<vmem>>, vector<1x1x128xf32>
    %82 = vector.shape_cast %81 : vector<1x1x128xf32> to vector<1x128xf32>
    %83 = vector.broadcast %82 : vector<1x128xf32> to vector<16x128xf32>
    %84 = arith.addf %80, %83 : vector<16x128xf32>
    %c2_50 = arith.constant 2 : index
    %c0_51 = arith.constant 0 : index
    %c0_52 = arith.constant 0 : index
    %85 = vector.load %arg6[%c2_50, %c0_51, %c0_52] : memref<3x1x128xf32, #tpu.memory_space<vmem>>, vector<1x1x128xf32>
    %86 = vector.shape_cast %85 : vector<1x1x128xf32> to vector<1x128xf32>
    %c2_53 = arith.constant 2 : index
    %c0_54 = arith.constant 0 : index
    %c0_55 = arith.constant 0 : index
    %87 = vector.load %arg7[%c2_53, %c0_54, %c0_55] : memref<3x1x128xf32, #tpu.memory_space<vmem>>, vector<1x1x128xf32>
    %88 = vector.shape_cast %87 : vector<1x1x128xf32> to vector<1x128xf32>
    %cst_56 = arith.constant dense<0.000000e+00> : vector<128xf32>
    %89 = vector.multi_reduction <add>, %84, %cst_56 [0] : vector<16x128xf32> to vector<128xf32>
    %90 = vector.shape_cast %89 : vector<128xf32> to vector<1x128xf32>
    %cst_57 = arith.constant 1.600000e+01 : f32
    %91 = vector.broadcast %cst_57 : f32 to vector<1x128xf32>
    %92 = arith.divf %90, %91 : vector<1x128xf32>
    %93 = vector.broadcast %92 : vector<1x128xf32> to vector<16x128xf32>
    %94 = arith.subf %84, %93 : vector<16x128xf32>
    %95 = arith.mulf %94, %94 : vector<16x128xf32>
    %cst_58 = arith.constant dense<0.000000e+00> : vector<128xf32>
    %96 = vector.multi_reduction <add>, %95, %cst_58 [0] : vector<16x128xf32> to vector<128xf32>
    %97 = vector.shape_cast %96 : vector<128xf32> to vector<1x128xf32>
    %cst_59 = arith.constant 1.600000e+01 : f32
    %98 = vector.broadcast %cst_59 : f32 to vector<1x128xf32>
    %99 = arith.divf %97, %98 : vector<1x128xf32>
    %100 = vector.broadcast %92 : vector<1x128xf32> to vector<16x128xf32>
    %101 = arith.subf %84, %100 : vector<16x128xf32>
    %cst_60 = arith.constant 9.99999974E-6 : f32
    %102 = vector.broadcast %cst_60 : f32 to vector<1x128xf32>
    %103 = arith.addf %99, %102 : vector<1x128xf32>
    %104 = math.rsqrt %103 : vector<1x128xf32>
    %105 = vector.broadcast %104 : vector<1x128xf32> to vector<16x128xf32>
    %106 = arith.mulf %101, %105 : vector<16x128xf32>
    %107 = vector.broadcast %86 : vector<1x128xf32> to vector<16x128xf32>
    %108 = arith.mulf %106, %107 : vector<16x128xf32>
    %109 = vector.broadcast %88 : vector<1x128xf32> to vector<16x128xf32>
    %110 = arith.addf %108, %109 : vector<16x128xf32>
    %cst_61 = arith.constant 0.000000e+00 : f32
    %111 = vector.broadcast %cst_61 : f32 to vector<16x128xf32>
    %112 = arith.maximumf %110, %111 : vector<16x128xf32>
    %113 = arith.addf %112, %76 : vector<16x128xf32>
    %c0_62 = arith.constant 0 : index
    %c0_63 = arith.constant 0 : index
    %114 = vector.load %arg8[%c0_62, %c0_63] : memref<128x128xf32, #tpu.memory_space<vmem>>, vector<128x128xf32>
    %cst_64 = arith.constant dense<0.000000e+00> : vector<16x128xf32>
    %115 = tpu.matmul %113, %114, %cst_64 {dimension_numbers = #tpu.dot_dimension_numbers<[1], [0], [0], [1], [0, 0, 1, 1], [], []>} : vector<16x128xf32>, vector<128x128xf32>, vector<16x128xf32> -> vector<16x128xf32>
    %c0_65 = arith.constant 0 : index
    %c0_66 = arith.constant 0 : index
    %116 = vector.load %arg10[%c0_65, %c0_66] : memref<1x128xf32, #tpu.memory_space<vmem>>, vector<1x128xf32>
    %117 = vector.broadcast %116 : vector<1x128xf32> to vector<16x128xf32>
    %118 = arith.mulf %115, %117 : vector<16x128xf32>
    %cst_67 = arith.constant dense<0.000000e+00> : vector<16xf32>
    %119 = vector.multi_reduction <add>, %118, %cst_67 [1] : vector<16x128xf32> to vector<16xf32>
    %120 = vector.shape_cast %119 : vector<16xf32> to vector<16x1xf32>
    %c0_68 = arith.constant 0 : index
    %c0_69 = arith.constant 0 : index
    %121 = vector.load %arg9[%c0_68, %c0_69] : memref<1x128xf32, #tpu.memory_space<vmem>>, vector<1x128xf32>
    %cst_70 = arith.constant dense<0.000000e+00> : vector<1x16xf32>
    %122 = tpu.matmul %121, %115, %cst_70 {dimension_numbers = #tpu.dot_dimension_numbers<[1], [1], [0], [0], [0, 0, 1, 0], [], []>} : vector<1x128xf32>, vector<16x128xf32>, vector<1x16xf32> -> vector<1x16xf32>
    %123 = vector.broadcast %120 : vector<16x1xf32> to vector<16x16xf32>
    %124 = vector.broadcast %122 : vector<1x16xf32> to vector<16x16xf32>
    %125 = arith.addf %123, %124 : vector<16x16xf32>
    %cst_71 = arith.constant 0.000000e+00 : f32
    %126 = vector.broadcast %cst_71 : f32 to vector<16x16xf32>
    %127 = arith.cmpf ogt, %125, %126 : vector<16x16xf32>
    %cst_72 = arith.constant 2.000000e-01 : f32
    %128 = vector.broadcast %cst_72 : f32 to vector<16x16xf32>
    %129 = arith.mulf %128, %125 : vector<16x16xf32>
    %130 = arith.select %127, %125, %129 : vector<16x16xi1>, vector<16x16xf32>
    %cst_73 = arith.constant 0.000000e+00 : f32
    %131 = vector.broadcast %cst_73 : f32 to vector<16x16xf32>
    %132 = arith.cmpf ogt, %1, %131 : vector<16x16xf32>
    %cst_74 = arith.constant -1.000000e+30 : f32
    %133 = vector.broadcast %cst_74 : f32 to vector<16x16xf32>
    %134 = arith.select %132, %130, %133 : vector<16x16xi1>, vector<16x16xf32>
    %cst_75 = arith.constant dense<0xFF800000> : vector<16xf32>
    %135 = vector.multi_reduction <maximumf>, %134, %cst_75 [1] : vector<16x16xf32> to vector<16xf32>
    %136 = vector.shape_cast %135 : vector<16xf32> to vector<16x1xf32>
    %137 = vector.broadcast %136 : vector<16x1xf32> to vector<16x16xf32>
    %138 = arith.subf %134, %137 : vector<16x16xf32>
    %139 = math.exp %138 : vector<16x16xf32>
    %cst_76 = arith.constant dense<0.000000e+00> : vector<16xf32>
    %140 = vector.multi_reduction <add>, %139, %cst_76 [1] : vector<16x16xf32> to vector<16xf32>
    %141 = vector.shape_cast %140 : vector<16xf32> to vector<16x1xf32>
    %142 = tpu.reciprocal %141 {approx = true} : vector<16x1xf32> -> vector<16x1xf32>
    %143 = vector.broadcast %142 : vector<16x1xf32> to vector<16x16xf32>
    %144 = arith.mulf %139, %143 : vector<16x16xf32>
    %cst_77 = arith.constant dense<0.000000e+00> : vector<16x128xf32>
    %145 = tpu.matmul %144, %115, %cst_77 {dimension_numbers = #tpu.dot_dimension_numbers<[1], [0], [0], [1], [0, 0, 1, 1], [], []>} : vector<16x16xf32>, vector<16x128xf32>, vector<16x128xf32> -> vector<16x128xf32>
    %c0_78 = arith.constant 0 : index
    %c0_79 = arith.constant 0 : index
    %146 = vector.load %arg11[%c0_78, %c0_79] : memref<1x128xf32, #tpu.memory_space<vmem>>, vector<1x128xf32>
    %147 = vector.broadcast %146 : vector<1x128xf32> to vector<16x128xf32>
    %148 = arith.addf %145, %147 : vector<16x128xf32>
    %c0_80 = arith.constant 0 : index
    %c0_81 = arith.constant 0 : index
    %149 = vector.load %arg12[%c0_80, %c0_81] : memref<1x128xf32, #tpu.memory_space<vmem>>, vector<1x128xf32>
    %c0_82 = arith.constant 0 : index
    %c0_83 = arith.constant 0 : index
    %150 = vector.load %arg13[%c0_82, %c0_83] : memref<1x128xf32, #tpu.memory_space<vmem>>, vector<1x128xf32>
    %cst_84 = arith.constant dense<0.000000e+00> : vector<128xf32>
    %151 = vector.multi_reduction <add>, %148, %cst_84 [0] : vector<16x128xf32> to vector<128xf32>
    %152 = vector.shape_cast %151 : vector<128xf32> to vector<1x128xf32>
    %cst_85 = arith.constant 1.600000e+01 : f32
    %153 = vector.broadcast %cst_85 : f32 to vector<1x128xf32>
    %154 = arith.divf %152, %153 : vector<1x128xf32>
    %155 = vector.broadcast %154 : vector<1x128xf32> to vector<16x128xf32>
    %156 = arith.subf %148, %155 : vector<16x128xf32>
    %157 = arith.mulf %156, %156 : vector<16x128xf32>
    %cst_86 = arith.constant dense<0.000000e+00> : vector<128xf32>
    %158 = vector.multi_reduction <add>, %157, %cst_86 [0] : vector<16x128xf32> to vector<128xf32>
    %159 = vector.shape_cast %158 : vector<128xf32> to vector<1x128xf32>
    %cst_87 = arith.constant 1.600000e+01 : f32
    %160 = vector.broadcast %cst_87 : f32 to vector<1x128xf32>
    %161 = arith.divf %159, %160 : vector<1x128xf32>
    %162 = vector.broadcast %154 : vector<1x128xf32> to vector<16x128xf32>
    %163 = arith.subf %148, %162 : vector<16x128xf32>
    %cst_88 = arith.constant 9.99999974E-6 : f32
    %164 = vector.broadcast %cst_88 : f32 to vector<1x128xf32>
    %165 = arith.addf %161, %164 : vector<1x128xf32>
    %166 = math.rsqrt %165 : vector<1x128xf32>
    %167 = vector.broadcast %166 : vector<1x128xf32> to vector<16x128xf32>
    %168 = arith.mulf %163, %167 : vector<16x128xf32>
    %169 = vector.broadcast %149 : vector<1x128xf32> to vector<16x128xf32>
    %170 = arith.mulf %168, %169 : vector<16x128xf32>
    %171 = vector.broadcast %150 : vector<1x128xf32> to vector<16x128xf32>
    %172 = arith.addf %170, %171 : vector<16x128xf32>
    %cst_89 = arith.constant 0.000000e+00 : f32
    %173 = vector.broadcast %cst_89 : f32 to vector<16x128xf32>
    %174 = arith.maximumf %172, %173 : vector<16x128xf32>
    %175 = arith.addf %174, %113 : vector<16x128xf32>
    %c0_90 = arith.constant 0 : index
    %c0_91 = arith.constant 0 : index
    %176 = vector.load %arg2[%c0_90, %c0_91] : memref<2x16xf32, #tpu.memory_space<vmem>>, vector<2x16xf32>
    %cst_92 = arith.constant dense<0.000000e+00> : vector<2x128xf32>
    %177 = tpu.matmul %176, %175, %cst_92 {dimension_numbers = #tpu.dot_dimension_numbers<[1], [0], [0], [1], [0, 0, 1, 1], [], []>} : vector<2x16xf32>, vector<16x128xf32>, vector<2x128xf32> -> vector<2x128xf32>
    %c0_93 = arith.constant 0 : index
    %c0_94 = arith.constant 0 : index
    %178 = vector.load %arg14[%c0_93, %c0_94] : memref<128x128xf32, #tpu.memory_space<vmem>>, vector<128x128xf32>
    %cst_95 = arith.constant dense<0.000000e+00> : vector<2x128xf32>
    %179 = tpu.matmul %177, %178, %cst_95 {dimension_numbers = #tpu.dot_dimension_numbers<[1], [0], [0], [1], [0, 0, 1, 1], [], []>} : vector<2x128xf32>, vector<128x128xf32>, vector<2x128xf32> -> vector<2x128xf32>
    %c0_96 = arith.constant 0 : index
    %c0_97 = arith.constant 0 : index
    %180 = vector.load %arg15[%c0_96, %c0_97] : memref<1x128xf32, #tpu.memory_space<vmem>>, vector<1x128xf32>
    %181 = vector.broadcast %180 : vector<1x128xf32> to vector<2x128xf32>
    %182 = arith.addf %179, %181 : vector<2x128xf32>
    %cst_98 = arith.constant 0.000000e+00 : f32
    %183 = vector.broadcast %cst_98 : f32 to vector<2x128xf32>
    %184 = arith.maximumf %182, %183 : vector<2x128xf32>
    %c0_99 = arith.constant 0 : index
    %c0_100 = arith.constant 0 : index
    %185 = vector.load %arg16[%c0_99, %c0_100] : memref<128x128xf32, #tpu.memory_space<vmem>>, vector<128x128xf32>
    %cst_101 = arith.constant dense<0.000000e+00> : vector<2x128xf32>
    %186 = tpu.matmul %184, %185, %cst_101 {dimension_numbers = #tpu.dot_dimension_numbers<[1], [0], [0], [1], [0, 0, 1, 1], [], []>} : vector<2x128xf32>, vector<128x128xf32>, vector<2x128xf32> -> vector<2x128xf32>
    %c0_102 = arith.constant 0 : index
    %c0_103 = arith.constant 0 : index
    %187 = vector.load %arg17[%c0_102, %c0_103] : memref<1x128xf32, #tpu.memory_space<vmem>>, vector<1x128xf32>
    %188 = vector.broadcast %187 : vector<1x128xf32> to vector<2x128xf32>
    %189 = arith.addf %186, %188 : vector<2x128xf32>
    %c0_104 = arith.constant 0 : index
    %c0_105 = arith.constant 0 : index
    %190 = vector.load %arg18[%c0_104, %c0_105] : memref<128x128xf32, #tpu.memory_space<vmem>>, vector<128x128xf32>
    %cst_106 = arith.constant dense<0.000000e+00> : vector<2x128xf32>
    %191 = tpu.matmul %189, %190, %cst_106 {dimension_numbers = #tpu.dot_dimension_numbers<[1], [0], [0], [1], [0, 0, 1, 1], [], []>} : vector<2x128xf32>, vector<128x128xf32>, vector<2x128xf32> -> vector<2x128xf32>
    %c0_107 = arith.constant 0 : index
    %c0_108 = arith.constant 0 : index
    %192 = vector.load %arg19[%c0_107, %c0_108] : memref<1x128xf32, #tpu.memory_space<vmem>>, vector<1x128xf32>
    %193 = vector.broadcast %192 : vector<1x128xf32> to vector<2x128xf32>
    %194 = arith.addf %191, %193 : vector<2x128xf32>
    %c0_109 = arith.constant 0 : index
    %c0_110 = arith.constant 0 : index
    %195 = vector.load %arg20[%c0_109, %c0_110] : memref<2x128xf32, #tpu.memory_space<vmem>>, vector<2x128xf32>
    tpu.vector_store %arg20[%c0_109, %c0_110], %194 {strides = array<i32>} : memref<2x128xf32, #tpu.memory_space<vmem>>, vector<2x128xf32>,
    return
  }
}

module attributes {stable_mosaic.version = 11 : i64} {
  func.func @kernel(%arg0: i32, %arg1: memref<1x8x128xf32, #tpu.memory_space<vmem>>, %arg2: memref<1x1x8xf32, #tpu.memory_space<vmem>>, %arg3: memref<1x128xf32, #tpu.memory_space<vmem>>, %arg4: memref<2x128x384xf32, #tpu.memory_space<vmem>>, %arg5: memref<2x1x384xf32, #tpu.memory_space<vmem>>, %arg6: memref<2x128x128xf32, #tpu.memory_space<vmem>>, %arg7: memref<2x1x128xf32, #tpu.memory_space<vmem>>, %arg8: memref<2x1x128xf32, #tpu.memory_space<vmem>>, %arg9: memref<2x1x128xf32, #tpu.memory_space<vmem>>, %arg10: memref<2x128x128xf32, #tpu.memory_space<vmem>>, %arg11: memref<2x1x128xf32, #tpu.memory_space<vmem>>, %arg12: memref<2x128x128xf32, #tpu.memory_space<vmem>>, %arg13: memref<2x1x128xf32, #tpu.memory_space<vmem>>, %arg14: memref<2x1x128xf32, #tpu.memory_space<vmem>>, %arg15: memref<2x1x128xf32, #tpu.memory_space<vmem>>, %arg16: memref<128x128xf32, #tpu.memory_space<vmem>>, %arg17: memref<1x128xf32, #tpu.memory_space<vmem>>, %arg18: memref<1x128xf32, #tpu.memory_space<vmem>>, %arg19: memref<1x128xf32, #tpu.memory_space<vmem>>, %arg20: memref<1x128xf32, #tpu.memory_space<vmem>>, %arg21: memref<1x1x128xf32, #tpu.memory_space<vmem>>) attributes {dimension_semantics = [#tpu.dimension_semantics<parallel>], iteration_bounds = array<i64: 2>, scalar_prefetch = 0 : i64, scratch_operands = 0 : i64, tpu.core_type = #tpu.core_type<tc>, window_params = [{transform_indices = @transform_0, window_bounds = array<i64: 1, 8, 128>}, {transform_indices = @transform_1, window_bounds = array<i64: 1, 1, 8>}, {pipeline_mode = #tpu.pipeline_mode<synchronous>, transform_indices = @transform_2, window_bounds = array<i64: 1, 128>}, {pipeline_mode = #tpu.pipeline_mode<synchronous>, transform_indices = @transform_3, window_bounds = array<i64: 2, 128, 384>}, {pipeline_mode = #tpu.pipeline_mode<synchronous>, transform_indices = @transform_4, window_bounds = array<i64: 2, 1, 384>}, {pipeline_mode = #tpu.pipeline_mode<synchronous>, transform_indices = @transform_5, window_bounds = array<i64: 2, 128, 128>}, {pipeline_mode = #tpu.pipeline_mode<synchronous>, transform_indices = @transform_6, window_bounds = array<i64: 2, 1, 128>}, {pipeline_mode = #tpu.pipeline_mode<synchronous>, transform_indices = @transform_7, window_bounds = array<i64: 2, 1, 128>}, {pipeline_mode = #tpu.pipeline_mode<synchronous>, transform_indices = @transform_8, window_bounds = array<i64: 2, 1, 128>}, {pipeline_mode = #tpu.pipeline_mode<synchronous>, transform_indices = @transform_9, window_bounds = array<i64: 2, 128, 128>}, {pipeline_mode = #tpu.pipeline_mode<synchronous>, transform_indices = @transform_10, window_bounds = array<i64: 2, 1, 128>}, {pipeline_mode = #tpu.pipeline_mode<synchronous>, transform_indices = @transform_11, window_bounds = array<i64: 2, 128, 128>}, {pipeline_mode = #tpu.pipeline_mode<synchronous>, transform_indices = @transform_12, window_bounds = array<i64: 2, 1, 128>}, {pipeline_mode = #tpu.pipeline_mode<synchronous>, transform_indices = @transform_13, window_bounds = array<i64: 2, 1, 128>}, {pipeline_mode = #tpu.pipeline_mode<synchronous>, transform_indices = @transform_14, window_bounds = array<i64: 2, 1, 128>}, {pipeline_mode = #tpu.pipeline_mode<synchronous>, transform_indices = @transform_15, window_bounds = array<i64: 128, 128>}, {pipeline_mode = #tpu.pipeline_mode<synchronous>, transform_indices = @transform_16, window_bounds = array<i64: 1, 128>}, {pipeline_mode = #tpu.pipeline_mode<synchronous>, transform_indices = @transform_17, window_bounds = array<i64: 1, 128>}, {pipeline_mode = #tpu.pipeline_mode<synchronous>, transform_indices = @transform_18, window_bounds = array<i64: 1, 128>}, {pipeline_mode = #tpu.pipeline_mode<synchronous>, transform_indices = @transform_19, window_bounds = array<i64: 1, 128>}, {transform_indices = @transform_20, window_bounds = array<i64: 1, 1, 128>}]} {
    %c0 = arith.constant 0 : index
    %c0_0 = arith.constant 0 : index
    %c0_1 = arith.constant 0 : index
    %0 = vector.load %arg1[%c0, %c0_0, %c0_1] : memref<1x8x128xf32, #tpu.memory_space<vmem>>, vector<1x8x128xf32>
    %1 = vector.shape_cast %0 : vector<1x8x128xf32> to vector<8x128xf32>
    %c0_2 = arith.constant 0 : index
    %c0_3 = arith.constant 0 : index
    %c0_4 = arith.constant 0 : index
    %2 = vector.load %arg2[%c0_2, %c0_3, %c0_4] : memref<1x1x8xf32, #tpu.memory_space<vmem>>, vector<1x1x8xf32>
    %3 = vector.shape_cast %2 : vector<1x1x8xf32> to vector<1x8xf32>
    %c0_5 = arith.constant 0 : index
    %c0_6 = arith.constant 0 : index
    %4 = vector.load %arg3[%c0_5, %c0_6] : memref<1x128xf32, #tpu.memory_space<vmem>>, vector<1x128xf32>
    %c0_7 = arith.constant 0 : index
    %c0_8 = arith.constant 0 : index
    %c0_9 = arith.constant 0 : index
    %5 = vector.load %arg4[%c0_7, %c0_8, %c0_9] : memref<2x128x384xf32, #tpu.memory_space<vmem>>, vector<1x128x384xf32>
    %6 = vector.shape_cast %5 : vector<1x128x384xf32> to vector<128x384xf32>
    %cst = arith.constant dense<0.000000e+00> : vector<8x384xf32>
    %7 = tpu.matmul %1, %6, %cst {dimension_numbers = #tpu.dot_dimension_numbers<[1], [0], [0], [1], [0, 0, 1, 1], [], []>} : vector<8x128xf32>, vector<128x384xf32>, vector<8x384xf32> -> vector<8x384xf32>
    %c0_10 = arith.constant 0 : index
    %c0_11 = arith.constant 0 : index
    %c0_12 = arith.constant 0 : index
    %8 = vector.load %arg5[%c0_10, %c0_11, %c0_12] : memref<2x1x384xf32, #tpu.memory_space<vmem>>, vector<1x1x384xf32>
    %9 = vector.shape_cast %8 : vector<1x1x384xf32> to vector<1x384xf32>
    %10 = vector.broadcast %9 : vector<1x384xf32> to vector<8x384xf32>
    %11 = arith.addf %7, %10 : vector<8x384xf32>
    %12 = vector.extract_strided_slice %11 {offsets = [0, 0], sizes = [8, 128], strides = [1, 1]} : vector<8x384xf32> to vector<8x128xf32>
    %13 = vector.extract_strided_slice %11 {offsets = [0, 128], sizes = [8, 128], strides = [1, 1]} : vector<8x384xf32> to vector<8x128xf32>
    %14 = vector.extract_strided_slice %11 {offsets = [0, 256], sizes = [8, 128], strides = [1, 1]} : vector<8x384xf32> to vector<8x128xf32>
    %cst_13 = arith.constant dense<0.000000e+00> : vector<8x8xf32>
    %15 = tpu.matmul %12, %13, %cst_13 {dimension_numbers = #tpu.dot_dimension_numbers<[1], [1], [0], [0], [0, 0, 1, 0], [], []>} : vector<8x128xf32>, vector<8x128xf32>, vector<8x8xf32> -> vector<8x8xf32>
    %cst_14 = arith.constant 0.176776692 : f32
    %16 = vector.broadcast %cst_14 : f32 to vector<8x8xf32>
    %17 = arith.mulf %15, %16 : vector<8x8xf32>
    %18 = vector.broadcast %3 : vector<1x8xf32> to vector<8x8xf32>
    %19 = arith.addf %17, %18 : vector<8x8xf32>
    %cst_15 = arith.constant dense<0xFF800000> : vector<8xf32>
    %20 = vector.multi_reduction <maximumf>, %19, %cst_15 [1] : vector<8x8xf32> to vector<8xf32>
    %21 = vector.shape_cast %20 : vector<8xf32> to vector<8x1xf32>
    %22 = vector.broadcast %21 : vector<8x1xf32> to vector<8x8xf32>
    %23 = arith.subf %19, %22 : vector<8x8xf32>
    %24 = math.exp %23 : vector<8x8xf32>
    %cst_16 = arith.constant dense<0.000000e+00> : vector<8xf32>
    %25 = vector.multi_reduction <add>, %24, %cst_16 [1] : vector<8x8xf32> to vector<8xf32>
    %26 = vector.shape_cast %25 : vector<8xf32> to vector<8x1xf32>
    %27 = tpu.reciprocal %26 {approx = true} : vector<8x1xf32> -> vector<8x1xf32>
    %28 = vector.broadcast %27 : vector<8x1xf32> to vector<8x8xf32>
    %29 = arith.mulf %24, %28 : vector<8x8xf32>
    %cst_17 = arith.constant dense<0.000000e+00> : vector<8x128xf32>
    %30 = tpu.matmul %29, %14, %cst_17 {dimension_numbers = #tpu.dot_dimension_numbers<[1], [0], [0], [1], [0, 0, 1, 1], [], []>} : vector<8x8xf32>, vector<8x128xf32>, vector<8x128xf32> -> vector<8x128xf32>
    %c0_18 = arith.constant 0 : index
    %c0_19 = arith.constant 0 : index
    %c0_20 = arith.constant 0 : index
    %31 = vector.load %arg6[%c0_18, %c0_19, %c0_20] : memref<2x128x128xf32, #tpu.memory_space<vmem>>, vector<1x128x128xf32>
    %32 = vector.shape_cast %31 : vector<1x128x128xf32> to vector<128x128xf32>
    %cst_21 = arith.constant dense<0.000000e+00> : vector<8x128xf32>
    %33 = tpu.matmul %30, %32, %cst_21 {dimension_numbers = #tpu.dot_dimension_numbers<[1], [0], [0], [1], [0, 0, 1, 1], [], []>} : vector<8x128xf32>, vector<128x128xf32>, vector<8x128xf32> -> vector<8x128xf32>
    %c0_22 = arith.constant 0 : index
    %c0_23 = arith.constant 0 : index
    %c0_24 = arith.constant 0 : index
    %34 = vector.load %arg7[%c0_22, %c0_23, %c0_24] : memref<2x1x128xf32, #tpu.memory_space<vmem>>, vector<1x1x128xf32>
    %35 = vector.shape_cast %34 : vector<1x1x128xf32> to vector<1x128xf32>
    %36 = vector.broadcast %35 : vector<1x128xf32> to vector<8x128xf32>
    %37 = arith.addf %33, %36 : vector<8x128xf32>
    %38 = arith.addf %1, %37 : vector<8x128xf32>
    %c0_25 = arith.constant 0 : index
    %c0_26 = arith.constant 0 : index
    %c0_27 = arith.constant 0 : index
    %39 = vector.load %arg8[%c0_25, %c0_26, %c0_27] : memref<2x1x128xf32, #tpu.memory_space<vmem>>, vector<1x1x128xf32>
    %40 = vector.shape_cast %39 : vector<1x1x128xf32> to vector<1x128xf32>
    %c0_28 = arith.constant 0 : index
    %c0_29 = arith.constant 0 : index
    %c0_30 = arith.constant 0 : index
    %41 = vector.load %arg9[%c0_28, %c0_29, %c0_30] : memref<2x1x128xf32, #tpu.memory_space<vmem>>, vector<1x1x128xf32>
    %42 = vector.shape_cast %41 : vector<1x1x128xf32> to vector<1x128xf32>
    %43 = vector.broadcast %4 : vector<1x128xf32> to vector<8x128xf32>
    %44 = arith.mulf %38, %43 : vector<8x128xf32>
    %cst_31 = arith.constant dense<0.000000e+00> : vector<8xf32>
    %45 = vector.multi_reduction <add>, %44, %cst_31 [1] : vector<8x128xf32> to vector<8xf32>
    %46 = vector.shape_cast %45 : vector<8xf32> to vector<8x1xf32>
    %cst_32 = arith.constant 3.125000e-02 : f32
    %47 = vector.broadcast %cst_32 : f32 to vector<8x1xf32>
    %48 = arith.mulf %46, %47 : vector<8x1xf32>
    %49 = vector.broadcast %48 : vector<8x1xf32> to vector<8x128xf32>
    %50 = arith.subf %38, %49 : vector<8x128xf32>
    %51 = vector.broadcast %4 : vector<1x128xf32> to vector<8x128xf32>
    %52 = arith.mulf %50, %51 : vector<8x128xf32>
    %53 = arith.mulf %52, %52 : vector<8x128xf32>
    %cst_33 = arith.constant dense<0.000000e+00> : vector<8xf32>
    %54 = vector.multi_reduction <add>, %53, %cst_33 [1] : vector<8x128xf32> to vector<8xf32>
    %55 = vector.shape_cast %54 : vector<8xf32> to vector<8x1xf32>
    %cst_34 = arith.constant 3.125000e-02 : f32
    %56 = vector.broadcast %cst_34 : f32 to vector<8x1xf32>
    %57 = arith.mulf %55, %56 : vector<8x1xf32>
    %cst_35 = arith.constant 9.99999996E-13 : f32
    %58 = vector.broadcast %cst_35 : f32 to vector<8x1xf32>
    %59 = arith.addf %57, %58 : vector<8x1xf32>
    %60 = math.rsqrt %59 : vector<8x1xf32>
    %61 = vector.broadcast %60 : vector<8x1xf32> to vector<8x128xf32>
    %62 = arith.mulf %52, %61 : vector<8x128xf32>
    %63 = vector.broadcast %40 : vector<1x128xf32> to vector<8x128xf32>
    %64 = arith.mulf %62, %63 : vector<8x128xf32>
    %65 = vector.broadcast %42 : vector<1x128xf32> to vector<8x128xf32>
    %66 = arith.addf %64, %65 : vector<8x128xf32>
    %c0_36 = arith.constant 0 : index
    %c0_37 = arith.constant 0 : index
    %c0_38 = arith.constant 0 : index
    %67 = vector.load %arg10[%c0_36, %c0_37, %c0_38] : memref<2x128x128xf32, #tpu.memory_space<vmem>>, vector<1x128x128xf32>
    %68 = vector.shape_cast %67 : vector<1x128x128xf32> to vector<128x128xf32>
    %cst_39 = arith.constant dense<0.000000e+00> : vector<8x128xf32>
    %69 = tpu.matmul %66, %68, %cst_39 {dimension_numbers = #tpu.dot_dimension_numbers<[1], [0], [0], [1], [0, 0, 1, 1], [], []>} : vector<8x128xf32>, vector<128x128xf32>, vector<8x128xf32> -> vector<8x128xf32>
    %c0_40 = arith.constant 0 : index
    %c0_41 = arith.constant 0 : index
    %c0_42 = arith.constant 0 : index
    %70 = vector.load %arg11[%c0_40, %c0_41, %c0_42] : memref<2x1x128xf32, #tpu.memory_space<vmem>>, vector<1x1x128xf32>
    %71 = vector.shape_cast %70 : vector<1x1x128xf32> to vector<1x128xf32>
    %72 = vector.broadcast %71 : vector<1x128xf32> to vector<8x128xf32>
    %73 = arith.addf %69, %72 : vector<8x128xf32>
    %74 = arith.mulf %73, %73 : vector<8x128xf32>
    %75 = arith.mulf %73, %74 : vector<8x128xf32>
    %cst_43 = arith.constant 4.471500e-02 : f32
    %76 = vector.broadcast %cst_43 : f32 to vector<8x128xf32>
    %77 = arith.mulf %76, %75 : vector<8x128xf32>
    %78 = arith.addf %73, %77 : vector<8x128xf32>
    %cst_44 = arith.constant 0.797884583 : f32
    %79 = vector.broadcast %cst_44 : f32 to vector<8x128xf32>
    %80 = arith.mulf %79, %78 : vector<8x128xf32>
    %81 = math.tanh %80 : vector<8x128xf32>
    %cst_45 = arith.constant 1.000000e+00 : f32
    %82 = vector.broadcast %cst_45 : f32 to vector<8x128xf32>
    %83 = arith.addf %82, %81 : vector<8x128xf32>
    %cst_46 = arith.constant 5.000000e-01 : f32
    %84 = vector.broadcast %cst_46 : f32 to vector<8x128xf32>
    %85 = arith.mulf %84, %83 : vector<8x128xf32>
    %86 = arith.mulf %73, %85 : vector<8x128xf32>
    %c0_47 = arith.constant 0 : index
    %c0_48 = arith.constant 0 : index
    %c0_49 = arith.constant 0 : index
    %87 = vector.load %arg12[%c0_47, %c0_48, %c0_49] : memref<2x128x128xf32, #tpu.memory_space<vmem>>, vector<1x128x128xf32>
    %88 = vector.shape_cast %87 : vector<1x128x128xf32> to vector<128x128xf32>
    %cst_50 = arith.constant dense<0.000000e+00> : vector<8x128xf32>
    %89 = tpu.matmul %86, %88, %cst_50 {dimension_numbers = #tpu.dot_dimension_numbers<[1], [0], [0], [1], [0, 0, 1, 1], [], []>} : vector<8x128xf32>, vector<128x128xf32>, vector<8x128xf32> -> vector<8x128xf32>
    %c0_51 = arith.constant 0 : index
    %c0_52 = arith.constant 0 : index
    %c0_53 = arith.constant 0 : index
    %90 = vector.load %arg13[%c0_51, %c0_52, %c0_53] : memref<2x1x128xf32, #tpu.memory_space<vmem>>, vector<1x1x128xf32>
    %91 = vector.shape_cast %90 : vector<1x1x128xf32> to vector<1x128xf32>
    %92 = vector.broadcast %91 : vector<1x128xf32> to vector<8x128xf32>
    %93 = arith.addf %89, %92 : vector<8x128xf32>
    %94 = arith.addf %66, %93 : vector<8x128xf32>
    %c0_54 = arith.constant 0 : index
    %c0_55 = arith.constant 0 : index
    %c0_56 = arith.constant 0 : index
    %95 = vector.load %arg14[%c0_54, %c0_55, %c0_56] : memref<2x1x128xf32, #tpu.memory_space<vmem>>, vector<1x1x128xf32>
    %96 = vector.shape_cast %95 : vector<1x1x128xf32> to vector<1x128xf32>
    %c0_57 = arith.constant 0 : index
    %c0_58 = arith.constant 0 : index
    %c0_59 = arith.constant 0 : index
    %97 = vector.load %arg15[%c0_57, %c0_58, %c0_59] : memref<2x1x128xf32, #tpu.memory_space<vmem>>, vector<1x1x128xf32>
    %98 = vector.shape_cast %97 : vector<1x1x128xf32> to vector<1x128xf32>
    %99 = vector.broadcast %4 : vector<1x128xf32> to vector<8x128xf32>
    %100 = arith.mulf %94, %99 : vector<8x128xf32>
    %cst_60 = arith.constant dense<0.000000e+00> : vector<8xf32>
    %101 = vector.multi_reduction <add>, %100, %cst_60 [1] : vector<8x128xf32> to vector<8xf32>
    %102 = vector.shape_cast %101 : vector<8xf32> to vector<8x1xf32>
    %cst_61 = arith.constant 3.125000e-02 : f32
    %103 = vector.broadcast %cst_61 : f32 to vector<8x1xf32>
    %104 = arith.mulf %102, %103 : vector<8x1xf32>
    %105 = vector.broadcast %104 : vector<8x1xf32> to vector<8x128xf32>
    %106 = arith.subf %94, %105 : vector<8x128xf32>
    %107 = vector.broadcast %4 : vector<1x128xf32> to vector<8x128xf32>
    %108 = arith.mulf %106, %107 : vector<8x128xf32>
    %109 = arith.mulf %108, %108 : vector<8x128xf32>
    %cst_62 = arith.constant dense<0.000000e+00> : vector<8xf32>
    %110 = vector.multi_reduction <add>, %109, %cst_62 [1] : vector<8x128xf32> to vector<8xf32>
    %111 = vector.shape_cast %110 : vector<8xf32> to vector<8x1xf32>
    %cst_63 = arith.constant 3.125000e-02 : f32
    %112 = vector.broadcast %cst_63 : f32 to vector<8x1xf32>
    %113 = arith.mulf %111, %112 : vector<8x1xf32>
    %cst_64 = arith.constant 9.99999996E-13 : f32
    %114 = vector.broadcast %cst_64 : f32 to vector<8x1xf32>
    %115 = arith.addf %113, %114 : vector<8x1xf32>
    %116 = math.rsqrt %115 : vector<8x1xf32>
    %117 = vector.broadcast %116 : vector<8x1xf32> to vector<8x128xf32>
    %118 = arith.mulf %108, %117 : vector<8x128xf32>
    %119 = vector.broadcast %96 : vector<1x128xf32> to vector<8x128xf32>
    %120 = arith.mulf %118, %119 : vector<8x128xf32>
    %121 = vector.broadcast %98 : vector<1x128xf32> to vector<8x128xf32>
    %122 = arith.addf %120, %121 : vector<8x128xf32>
    %c1 = arith.constant 1 : index
    %c0_65 = arith.constant 0 : index
    %c0_66 = arith.constant 0 : index
    %123 = vector.load %arg4[%c1, %c0_65, %c0_66] : memref<2x128x384xf32, #tpu.memory_space<vmem>>, vector<1x128x384xf32>
    %124 = vector.shape_cast %123 : vector<1x128x384xf32> to vector<128x384xf32>
    %cst_67 = arith.constant dense<0.000000e+00> : vector<8x384xf32>
    %125 = tpu.matmul %122, %124, %cst_67 {dimension_numbers = #tpu.dot_dimension_numbers<[1], [0], [0], [1], [0, 0, 1, 1], [], []>} : vector<8x128xf32>, vector<128x384xf32>, vector<8x384xf32> -> vector<8x384xf32>
    %c1_68 = arith.constant 1 : index
    %c0_69 = arith.constant 0 : index
    %c0_70 = arith.constant 0 : index
    %126 = vector.load %arg5[%c1_68, %c0_69, %c0_70] : memref<2x1x384xf32, #tpu.memory_space<vmem>>, vector<1x1x384xf32>
    %127 = vector.shape_cast %126 : vector<1x1x384xf32> to vector<1x384xf32>
    %128 = vector.broadcast %127 : vector<1x384xf32> to vector<8x384xf32>
    %129 = arith.addf %125, %128 : vector<8x384xf32>
    %130 = vector.extract_strided_slice %129 {offsets = [0, 0], sizes = [8, 128], strides = [1, 1]} : vector<8x384xf32> to vector<8x128xf32>
    %131 = vector.extract_strided_slice %129 {offsets = [0, 128], sizes = [8, 128], strides = [1, 1]} : vector<8x384xf32> to vector<8x128xf32>
    %132 = vector.extract_strided_slice %129 {offsets = [0, 256], sizes = [8, 128], strides = [1, 1]} : vector<8x384xf32> to vector<8x128xf32>
    %cst_71 = arith.constant dense<0.000000e+00> : vector<8x8xf32>
    %133 = tpu.matmul %130, %131, %cst_71 {dimension_numbers = #tpu.dot_dimension_numbers<[1], [1], [0], [0], [0, 0, 1, 0], [], []>} : vector<8x128xf32>, vector<8x128xf32>, vector<8x8xf32> -> vector<8x8xf32>
    %cst_72 = arith.constant 0.176776692 : f32
    %134 = vector.broadcast %cst_72 : f32 to vector<8x8xf32>
    %135 = arith.mulf %133, %134 : vector<8x8xf32>
    %136 = vector.broadcast %3 : vector<1x8xf32> to vector<8x8xf32>
    %137 = arith.addf %135, %136 : vector<8x8xf32>
    %cst_73 = arith.constant dense<0xFF800000> : vector<8xf32>
    %138 = vector.multi_reduction <maximumf>, %137, %cst_73 [1] : vector<8x8xf32> to vector<8xf32>
    %139 = vector.shape_cast %138 : vector<8xf32> to vector<8x1xf32>
    %140 = vector.broadcast %139 : vector<8x1xf32> to vector<8x8xf32>
    %141 = arith.subf %137, %140 : vector<8x8xf32>
    %142 = math.exp %141 : vector<8x8xf32>
    %cst_74 = arith.constant dense<0.000000e+00> : vector<8xf32>
    %143 = vector.multi_reduction <add>, %142, %cst_74 [1] : vector<8x8xf32> to vector<8xf32>
    %144 = vector.shape_cast %143 : vector<8xf32> to vector<8x1xf32>
    %145 = tpu.reciprocal %144 {approx = true} : vector<8x1xf32> -> vector<8x1xf32>
    %146 = vector.broadcast %145 : vector<8x1xf32> to vector<8x8xf32>
    %147 = arith.mulf %142, %146 : vector<8x8xf32>
    %cst_75 = arith.constant dense<0.000000e+00> : vector<8x128xf32>
    %148 = tpu.matmul %147, %132, %cst_75 {dimension_numbers = #tpu.dot_dimension_numbers<[1], [0], [0], [1], [0, 0, 1, 1], [], []>} : vector<8x8xf32>, vector<8x128xf32>, vector<8x128xf32> -> vector<8x128xf32>
    %c1_76 = arith.constant 1 : index
    %c0_77 = arith.constant 0 : index
    %c0_78 = arith.constant 0 : index
    %149 = vector.load %arg6[%c1_76, %c0_77, %c0_78] : memref<2x128x128xf32, #tpu.memory_space<vmem>>, vector<1x128x128xf32>
    %150 = vector.shape_cast %149 : vector<1x128x128xf32> to vector<128x128xf32>
    %cst_79 = arith.constant dense<0.000000e+00> : vector<8x128xf32>
    %151 = tpu.matmul %148, %150, %cst_79 {dimension_numbers = #tpu.dot_dimension_numbers<[1], [0], [0], [1], [0, 0, 1, 1], [], []>} : vector<8x128xf32>, vector<128x128xf32>, vector<8x128xf32> -> vector<8x128xf32>
    %c1_80 = arith.constant 1 : index
    %c0_81 = arith.constant 0 : index
    %c0_82 = arith.constant 0 : index
    %152 = vector.load %arg7[%c1_80, %c0_81, %c0_82] : memref<2x1x128xf32, #tpu.memory_space<vmem>>, vector<1x1x128xf32>
    %153 = vector.shape_cast %152 : vector<1x1x128xf32> to vector<1x128xf32>
    %154 = vector.broadcast %153 : vector<1x128xf32> to vector<8x128xf32>
    %155 = arith.addf %151, %154 : vector<8x128xf32>
    %156 = arith.addf %122, %155 : vector<8x128xf32>
    %c1_83 = arith.constant 1 : index
    %c0_84 = arith.constant 0 : index
    %c0_85 = arith.constant 0 : index
    %157 = vector.load %arg8[%c1_83, %c0_84, %c0_85] : memref<2x1x128xf32, #tpu.memory_space<vmem>>, vector<1x1x128xf32>
    %158 = vector.shape_cast %157 : vector<1x1x128xf32> to vector<1x128xf32>
    %c1_86 = arith.constant 1 : index
    %c0_87 = arith.constant 0 : index
    %c0_88 = arith.constant 0 : index
    %159 = vector.load %arg9[%c1_86, %c0_87, %c0_88] : memref<2x1x128xf32, #tpu.memory_space<vmem>>, vector<1x1x128xf32>
    %160 = vector.shape_cast %159 : vector<1x1x128xf32> to vector<1x128xf32>
    %161 = vector.broadcast %4 : vector<1x128xf32> to vector<8x128xf32>
    %162 = arith.mulf %156, %161 : vector<8x128xf32>
    %cst_89 = arith.constant dense<0.000000e+00> : vector<8xf32>
    %163 = vector.multi_reduction <add>, %162, %cst_89 [1] : vector<8x128xf32> to vector<8xf32>
    %164 = vector.shape_cast %163 : vector<8xf32> to vector<8x1xf32>
    %cst_90 = arith.constant 3.125000e-02 : f32
    %165 = vector.broadcast %cst_90 : f32 to vector<8x1xf32>
    %166 = arith.mulf %164, %165 : vector<8x1xf32>
    %167 = vector.broadcast %166 : vector<8x1xf32> to vector<8x128xf32>
    %168 = arith.subf %156, %167 : vector<8x128xf32>
    %169 = vector.broadcast %4 : vector<1x128xf32> to vector<8x128xf32>
    %170 = arith.mulf %168, %169 : vector<8x128xf32>
    %171 = arith.mulf %170, %170 : vector<8x128xf32>
    %cst_91 = arith.constant dense<0.000000e+00> : vector<8xf32>
    %172 = vector.multi_reduction <add>, %171, %cst_91 [1] : vector<8x128xf32> to vector<8xf32>
    %173 = vector.shape_cast %172 : vector<8xf32> to vector<8x1xf32>
    %cst_92 = arith.constant 3.125000e-02 : f32
    %174 = vector.broadcast %cst_92 : f32 to vector<8x1xf32>
    %175 = arith.mulf %173, %174 : vector<8x1xf32>
    %cst_93 = arith.constant 9.99999996E-13 : f32
    %176 = vector.broadcast %cst_93 : f32 to vector<8x1xf32>
    %177 = arith.addf %175, %176 : vector<8x1xf32>
    %178 = math.rsqrt %177 : vector<8x1xf32>
    %179 = vector.broadcast %178 : vector<8x1xf32> to vector<8x128xf32>
    %180 = arith.mulf %170, %179 : vector<8x128xf32>
    %181 = vector.broadcast %158 : vector<1x128xf32> to vector<8x128xf32>
    %182 = arith.mulf %180, %181 : vector<8x128xf32>
    %183 = vector.broadcast %160 : vector<1x128xf32> to vector<8x128xf32>
    %184 = arith.addf %182, %183 : vector<8x128xf32>
    %c1_94 = arith.constant 1 : index
    %c0_95 = arith.constant 0 : index
    %c0_96 = arith.constant 0 : index
    %185 = vector.load %arg10[%c1_94, %c0_95, %c0_96] : memref<2x128x128xf32, #tpu.memory_space<vmem>>, vector<1x128x128xf32>
    %186 = vector.shape_cast %185 : vector<1x128x128xf32> to vector<128x128xf32>
    %cst_97 = arith.constant dense<0.000000e+00> : vector<8x128xf32>
    %187 = tpu.matmul %184, %186, %cst_97 {dimension_numbers = #tpu.dot_dimension_numbers<[1], [0], [0], [1], [0, 0, 1, 1], [], []>} : vector<8x128xf32>, vector<128x128xf32>, vector<8x128xf32> -> vector<8x128xf32>
    %c1_98 = arith.constant 1 : index
    %c0_99 = arith.constant 0 : index
    %c0_100 = arith.constant 0 : index
    %188 = vector.load %arg11[%c1_98, %c0_99, %c0_100] : memref<2x1x128xf32, #tpu.memory_space<vmem>>, vector<1x1x128xf32>
    %189 = vector.shape_cast %188 : vector<1x1x128xf32> to vector<1x128xf32>
    %190 = vector.broadcast %189 : vector<1x128xf32> to vector<8x128xf32>
    %191 = arith.addf %187, %190 : vector<8x128xf32>
    %192 = arith.mulf %191, %191 : vector<8x128xf32>
    %193 = arith.mulf %191, %192 : vector<8x128xf32>
    %cst_101 = arith.constant 4.471500e-02 : f32
    %194 = vector.broadcast %cst_101 : f32 to vector<8x128xf32>
    %195 = arith.mulf %194, %193 : vector<8x128xf32>
    %196 = arith.addf %191, %195 : vector<8x128xf32>
    %cst_102 = arith.constant 0.797884583 : f32
    %197 = vector.broadcast %cst_102 : f32 to vector<8x128xf32>
    %198 = arith.mulf %197, %196 : vector<8x128xf32>
    %199 = math.tanh %198 : vector<8x128xf32>
    %cst_103 = arith.constant 1.000000e+00 : f32
    %200 = vector.broadcast %cst_103 : f32 to vector<8x128xf32>
    %201 = arith.addf %200, %199 : vector<8x128xf32>
    %cst_104 = arith.constant 5.000000e-01 : f32
    %202 = vector.broadcast %cst_104 : f32 to vector<8x128xf32>
    %203 = arith.mulf %202, %201 : vector<8x128xf32>
    %204 = arith.mulf %191, %203 : vector<8x128xf32>
    %c1_105 = arith.constant 1 : index
    %c0_106 = arith.constant 0 : index
    %c0_107 = arith.constant 0 : index
    %205 = vector.load %arg12[%c1_105, %c0_106, %c0_107] : memref<2x128x128xf32, #tpu.memory_space<vmem>>, vector<1x128x128xf32>
    %206 = vector.shape_cast %205 : vector<1x128x128xf32> to vector<128x128xf32>
    %cst_108 = arith.constant dense<0.000000e+00> : vector<8x128xf32>
    %207 = tpu.matmul %204, %206, %cst_108 {dimension_numbers = #tpu.dot_dimension_numbers<[1], [0], [0], [1], [0, 0, 1, 1], [], []>} : vector<8x128xf32>, vector<128x128xf32>, vector<8x128xf32> -> vector<8x128xf32>
    %c1_109 = arith.constant 1 : index
    %c0_110 = arith.constant 0 : index
    %c0_111 = arith.constant 0 : index
    %208 = vector.load %arg13[%c1_109, %c0_110, %c0_111] : memref<2x1x128xf32, #tpu.memory_space<vmem>>, vector<1x1x128xf32>
    %209 = vector.shape_cast %208 : vector<1x1x128xf32> to vector<1x128xf32>
    %210 = vector.broadcast %209 : vector<1x128xf32> to vector<8x128xf32>
    %211 = arith.addf %207, %210 : vector<8x128xf32>
    %212 = arith.addf %184, %211 : vector<8x128xf32>
    %c1_112 = arith.constant 1 : index
    %c0_113 = arith.constant 0 : index
    %c0_114 = arith.constant 0 : index
    %213 = vector.load %arg14[%c1_112, %c0_113, %c0_114] : memref<2x1x128xf32, #tpu.memory_space<vmem>>, vector<1x1x128xf32>
    %214 = vector.shape_cast %213 : vector<1x1x128xf32> to vector<1x128xf32>
    %c1_115 = arith.constant 1 : index
    %c0_116 = arith.constant 0 : index
    %c0_117 = arith.constant 0 : index
    %215 = vector.load %arg15[%c1_115, %c0_116, %c0_117] : memref<2x1x128xf32, #tpu.memory_space<vmem>>, vector<1x1x128xf32>
    %216 = vector.shape_cast %215 : vector<1x1x128xf32> to vector<1x128xf32>
    %217 = vector.broadcast %4 : vector<1x128xf32> to vector<8x128xf32>
    %218 = arith.mulf %212, %217 : vector<8x128xf32>
    %cst_118 = arith.constant dense<0.000000e+00> : vector<8xf32>
    %219 = vector.multi_reduction <add>, %218, %cst_118 [1] : vector<8x128xf32> to vector<8xf32>
    %220 = vector.shape_cast %219 : vector<8xf32> to vector<8x1xf32>
    %cst_119 = arith.constant 3.125000e-02 : f32
    %221 = vector.broadcast %cst_119 : f32 to vector<8x1xf32>
    %222 = arith.mulf %220, %221 : vector<8x1xf32>
    %223 = vector.broadcast %222 : vector<8x1xf32> to vector<8x128xf32>
    %224 = arith.subf %212, %223 : vector<8x128xf32>
    %225 = vector.broadcast %4 : vector<1x128xf32> to vector<8x128xf32>
    %226 = arith.mulf %224, %225 : vector<8x128xf32>
    %227 = arith.mulf %226, %226 : vector<8x128xf32>
    %cst_120 = arith.constant dense<0.000000e+00> : vector<8xf32>
    %228 = vector.multi_reduction <add>, %227, %cst_120 [1] : vector<8x128xf32> to vector<8xf32>
    %229 = vector.shape_cast %228 : vector<8xf32> to vector<8x1xf32>
    %cst_121 = arith.constant 3.125000e-02 : f32
    %230 = vector.broadcast %cst_121 : f32 to vector<8x1xf32>
    %231 = arith.mulf %229, %230 : vector<8x1xf32>
    %cst_122 = arith.constant 9.99999996E-13 : f32
    %232 = vector.broadcast %cst_122 : f32 to vector<8x1xf32>
    %233 = arith.addf %231, %232 : vector<8x1xf32>
    %234 = math.rsqrt %233 : vector<8x1xf32>
    %235 = vector.broadcast %234 : vector<8x1xf32> to vector<8x128xf32>
    %236 = arith.mulf %226, %235 : vector<8x128xf32>
    %237 = vector.broadcast %214 : vector<1x128xf32> to vector<8x128xf32>
    %238 = arith.mulf %236, %237 : vector<8x128xf32>
    %239 = vector.broadcast %216 : vector<1x128xf32> to vector<8x128xf32>
    %240 = arith.addf %238, %239 : vector<8x128xf32>
    %241 = vector.extract_strided_slice %240 {offsets = [0, 0], sizes = [1, 128], strides = [1, 1]} : vector<8x128xf32> to vector<1x128xf32>
    %c0_123 = arith.constant 0 : index
    %c0_124 = arith.constant 0 : index
    %242 = vector.load %arg16[%c0_123, %c0_124] : memref<128x128xf32, #tpu.memory_space<vmem>>, vector<128x128xf32>
    %cst_125 = arith.constant dense<0.000000e+00> : vector<1x128xf32>
    %243 = tpu.matmul %241, %242, %cst_125 {dimension_numbers = #tpu.dot_dimension_numbers<[1], [0], [0], [1], [0, 0, 1, 1], [], []>} : vector<1x128xf32>, vector<128x128xf32>, vector<1x128xf32> -> vector<1x128xf32>
    %c0_126 = arith.constant 0 : index
    %c0_127 = arith.constant 0 : index
    %244 = vector.load %arg17[%c0_126, %c0_127] : memref<1x128xf32, #tpu.memory_space<vmem>>, vector<1x128xf32>
    %245 = arith.addf %243, %244 : vector<1x128xf32>
    %c0_128 = arith.constant 0 : index
    %c0_129 = arith.constant 0 : index
    %246 = vector.load %arg18[%c0_128, %c0_129] : memref<1x128xf32, #tpu.memory_space<vmem>>, vector<1x128xf32>
    %c0_130 = arith.constant 0 : index
    %c0_131 = arith.constant 0 : index
    %247 = vector.load %arg19[%c0_130, %c0_131] : memref<1x128xf32, #tpu.memory_space<vmem>>, vector<1x128xf32>
    %c0_132 = arith.constant 0 : index
    %c0_133 = arith.constant 0 : index
    %248 = vector.load %arg20[%c0_132, %c0_133] : memref<1x128xf32, #tpu.memory_space<vmem>>, vector<1x128xf32>
    %249 = arith.mulf %245, %248 : vector<1x128xf32>
    %cst_134 = arith.constant dense<0.000000e+00> : vector<1xf32>
    %250 = vector.multi_reduction <add>, %249, %cst_134 [1] : vector<1x128xf32> to vector<1xf32>
    %251 = vector.shape_cast %250 : vector<1xf32> to vector<1x1xf32>
    %cst_135 = arith.constant 6.250000e-02 : f32
    %252 = vector.broadcast %cst_135 : f32 to vector<1x1xf32>
    %253 = arith.mulf %251, %252 : vector<1x1xf32>
    %254 = vector.broadcast %253 : vector<1x1xf32> to vector<1x128xf32>
    %255 = arith.subf %245, %254 : vector<1x128xf32>
    %256 = arith.mulf %255, %248 : vector<1x128xf32>
    %257 = arith.mulf %256, %256 : vector<1x128xf32>
    %cst_136 = arith.constant dense<0.000000e+00> : vector<1xf32>
    %258 = vector.multi_reduction <add>, %257, %cst_136 [1] : vector<1x128xf32> to vector<1xf32>
    %259 = vector.shape_cast %258 : vector<1xf32> to vector<1x1xf32>
    %cst_137 = arith.constant 6.250000e-02 : f32
    %260 = vector.broadcast %cst_137 : f32 to vector<1x1xf32>
    %261 = arith.mulf %259, %260 : vector<1x1xf32>
    %cst_138 = arith.constant 9.99999974E-6 : f32
    %262 = vector.broadcast %cst_138 : f32 to vector<1x1xf32>
    %263 = arith.addf %261, %262 : vector<1x1xf32>
    %264 = math.rsqrt %263 : vector<1x1xf32>
    %265 = vector.broadcast %264 : vector<1x1xf32> to vector<1x128xf32>
    %266 = arith.mulf %256, %265 : vector<1x128xf32>
    %267 = arith.mulf %266, %246 : vector<1x128xf32>
    %268 = arith.addf %267, %247 : vector<1x128xf32>
    %c0_139 = arith.constant 0 : index
    %c0_140 = arith.constant 0 : index
    %c0_141 = arith.constant 0 : index
    %269 = vector.load %arg21[%c0_139, %c0_140, %c0_141] : memref<1x1x128xf32, #tpu.memory_space<vmem>>, vector<1x1x128xf32>
    %270 = vector.shape_cast %269 : vector<1x1x128xf32> to vector<1x128xf32>
    %271 = vector.shape_cast %268 : vector<1x128xf32> to vector<1x1x128xf32>
    tpu.vector_store %arg21[%c0_139, %c0_140, %c0_141], %271 {strides = array<i32>} : memref<1x1x128xf32, #tpu.memory_space<vmem>>, vector<1x1x128xf32>,
    return
  }
  func.func @transform_0(%arg0: i32) -> (i32, i32, i32) {
    %c0_i32 = arith.constant 0 : i32
    %c0_i32_0 = arith.constant 0 : i32
    %c0_i32_1 = arith.constant 0 : i32
    return %arg0, %c0_i32, %c0_i32_0 : i32, i32, i32
  }
  func.func @transform_1(%arg0: i32) -> (i32, i32, i32) {
    %c0_i32 = arith.constant 0 : i32
    %c0_i32_0 = arith.constant 0 : i32
    %c0_i32_1 = arith.constant 0 : i32
    return %arg0, %c0_i32, %c0_i32_0 : i32, i32, i32
  }
  func.func @transform_2(%arg0: i32) -> (i32, i32) {
    %c0_i32 = arith.constant 0 : i32
    %c0_i32_0 = arith.constant 0 : i32
    %c0_i32_1 = arith.constant 0 : i32
    return %c0_i32, %c0_i32_0 : i32, i32
  }
  func.func @transform_3(%arg0: i32) -> (i32, i32, i32) {
    %c0_i32 = arith.constant 0 : i32
    %c0_i32_0 = arith.constant 0 : i32
    %c0_i32_1 = arith.constant 0 : i32
    %c0_i32_2 = arith.constant 0 : i32
    return %c0_i32, %c0_i32_0, %c0_i32_1 : i32, i32, i32
  }
  func.func @transform_4(%arg0: i32) -> (i32, i32, i32) {
    %c0_i32 = arith.constant 0 : i32
    %c0_i32_0 = arith.constant 0 : i32
    %c0_i32_1 = arith.constant 0 : i32
    %c0_i32_2 = arith.constant 0 : i32
    return %c0_i32, %c0_i32_0, %c0_i32_1 : i32, i32, i32
  }
  func.func @transform_5(%arg0: i32) -> (i32, i32, i32) {
    %c0_i32 = arith.constant 0 : i32
    %c0_i32_0 = arith.constant 0 : i32
    %c0_i32_1 = arith.constant 0 : i32
    %c0_i32_2 = arith.constant 0 : i32
    return %c0_i32, %c0_i32_0, %c0_i32_1 : i32, i32, i32
  }
  func.func @transform_6(%arg0: i32) -> (i32, i32, i32) {
    %c0_i32 = arith.constant 0 : i32
    %c0_i32_0 = arith.constant 0 : i32
    %c0_i32_1 = arith.constant 0 : i32
    %c0_i32_2 = arith.constant 0 : i32
    return %c0_i32, %c0_i32_0, %c0_i32_1 : i32, i32, i32
  }
  func.func @transform_7(%arg0: i32) -> (i32, i32, i32) {
    %c0_i32 = arith.constant 0 : i32
    %c0_i32_0 = arith.constant 0 : i32
    %c0_i32_1 = arith.constant 0 : i32
    %c0_i32_2 = arith.constant 0 : i32
    return %c0_i32, %c0_i32_0, %c0_i32_1 : i32, i32, i32
  }
  func.func @transform_8(%arg0: i32) -> (i32, i32, i32) {
    %c0_i32 = arith.constant 0 : i32
    %c0_i32_0 = arith.constant 0 : i32
    %c0_i32_1 = arith.constant 0 : i32
    %c0_i32_2 = arith.constant 0 : i32
    return %c0_i32, %c0_i32_0, %c0_i32_1 : i32, i32, i32
  }
  func.func @transform_9(%arg0: i32) -> (i32, i32, i32) {
    %c0_i32 = arith.constant 0 : i32
    %c0_i32_0 = arith.constant 0 : i32
    %c0_i32_1 = arith.constant 0 : i32
    %c0_i32_2 = arith.constant 0 : i32
    return %c0_i32, %c0_i32_0, %c0_i32_1 : i32, i32, i32
  }
  func.func @transform_10(%arg0: i32) -> (i32, i32, i32) {
    %c0_i32 = arith.constant 0 : i32
    %c0_i32_0 = arith.constant 0 : i32
    %c0_i32_1 = arith.constant 0 : i32
    %c0_i32_2 = arith.constant 0 : i32
    return %c0_i32, %c0_i32_0, %c0_i32_1 : i32, i32, i32
  }
  func.func @transform_11(%arg0: i32) -> (i32, i32, i32) {
    %c0_i32 = arith.constant 0 : i32
    %c0_i32_0 = arith.constant 0 : i32
    %c0_i32_1 = arith.constant 0 : i32
    %c0_i32_2 = arith.constant 0 : i32
    return %c0_i32, %c0_i32_0, %c0_i32_1 : i32, i32, i32
  }
  func.func @transform_12(%arg0: i32) -> (i32, i32, i32) {
    %c0_i32 = arith.constant 0 : i32
    %c0_i32_0 = arith.constant 0 : i32
    %c0_i32_1 = arith.constant 0 : i32
    %c0_i32_2 = arith.constant 0 : i32
    return %c0_i32, %c0_i32_0, %c0_i32_1 : i32, i32, i32
  }
  func.func @transform_13(%arg0: i32) -> (i32, i32, i32) {
    %c0_i32 = arith.constant 0 : i32
    %c0_i32_0 = arith.constant 0 : i32
    %c0_i32_1 = arith.constant 0 : i32
    %c0_i32_2 = arith.constant 0 : i32
    return %c0_i32, %c0_i32_0, %c0_i32_1 : i32, i32, i32
  }
  func.func @transform_14(%arg0: i32) -> (i32, i32, i32) {
    %c0_i32 = arith.constant 0 : i32
    %c0_i32_0 = arith.constant 0 : i32
    %c0_i32_1 = arith.constant 0 : i32
    %c0_i32_2 = arith.constant 0 : i32
    return %c0_i32, %c0_i32_0, %c0_i32_1 : i32, i32, i32
  }
  func.func @transform_15(%arg0: i32) -> (i32, i32) {
    %c0_i32 = arith.constant 0 : i32
    %c0_i32_0 = arith.constant 0 : i32
    %c0_i32_1 = arith.constant 0 : i32
    return %c0_i32, %c0_i32_0 : i32, i32
  }
  func.func @transform_16(%arg0: i32) -> (i32, i32) {
    %c0_i32 = arith.constant 0 : i32
    %c0_i32_0 = arith.constant 0 : i32
    %c0_i32_1 = arith.constant 0 : i32
    return %c0_i32, %c0_i32_0 : i32, i32
  }
  func.func @transform_17(%arg0: i32) -> (i32, i32) {
    %c0_i32 = arith.constant 0 : i32
    %c0_i32_0 = arith.constant 0 : i32
    %c0_i32_1 = arith.constant 0 : i32
    return %c0_i32, %c0_i32_0 : i32, i32
  }
  func.func @transform_18(%arg0: i32) -> (i32, i32) {
    %c0_i32 = arith.constant 0 : i32
    %c0_i32_0 = arith.constant 0 : i32
    %c0_i32_1 = arith.constant 0 : i32
    return %c0_i32, %c0_i32_0 : i32, i32
  }
  func.func @transform_19(%arg0: i32) -> (i32, i32) {
    %c0_i32 = arith.constant 0 : i32
    %c0_i32_0 = arith.constant 0 : i32
    %c0_i32_1 = arith.constant 0 : i32
    return %c0_i32, %c0_i32_0 : i32, i32
  }
  func.func @transform_20(%arg0: i32) -> (i32, i32, i32) {
    %c0_i32 = arith.constant 0 : i32
    %c0_i32_0 = arith.constant 0 : i32
    %c0_i32_1 = arith.constant 0 : i32
    return %arg0, %c0_i32, %c0_i32_0 : i32, i32, i32
  }
}

</mosaic_0001>

<bundles_post_ra>
// kernel: forward.2
= control target key start
LH: loop header
LB: loop body
LE: loop exit
PB: predicated region body
PF: predicated region fallthrough
CT: control target
= control target key end

     0   :  { %s2842_s0 = inlined_call_operand.vmem [shape: f32[16,16], index: 0, kind: input, shape index: {}]   ;;  %s2843_s1 = inlined_call_operand.vmem [shape: f32[16,16], index: 1, kind: input, shape index: {}]   ;;  %s2844_s2 = inlined_call_operand.vmem [shape: f32[2,16], index: 2, kind: input, shape index: {}]   ;;  %s2845_s3 = inlined_call_operand.vmem [shape: f32[16,128], index: 3, kind: input, shape index: {}]   ;;  %s2846_s4 = inlined_call_operand.vmem [shape: f32[3,128,128], index: 4, kind: input, shape index: {}]   ;;  %s2847_s5 = inlined_call_operand.vmem [shape: f32[3,1,128], index: 5, kind: input, shape index: {}]   ;;  %s2848_s6 = inlined_call_operand.vmem [shape: f32[3,1,128], index: 6, kind: input, shape index: {}]   ;;  %s2849_s7 = inlined_call_operand.vmem [shape: f32[3,1,128], index: 7, kind: input, shape index: {}]   ;;  %s2850_s8 = inlined_call_operand.vmem [shape: f32[128,128], index: 8, kind: input, shape index: {}]   ;;  %s2851_s9 = inlined_call_operand.vmem [shape: f32[1,128], index: 9, kind: input, shape index: {}]   ;;  %s2852_s10 = inlined_call_operand.vmem [shape: f32[1,128], index: 10, kind: input, shape index: {}]   ;;  %s2853_s11 = inlined_call_operand.vmem [shape: f32[1,128], index: 11, kind: input, shape index: {}]   ;;  %s2854_s12 = inlined_call_operand.vmem [shape: f32[1,128], index: 12, kind: input, shape index: {}]   ;;  %s2855_s13 = inlined_call_operand.vmem [shape: f32[1,128], index: 13, kind: input, shape index: {}]   ;;  %s2856_s14 = inlined_call_operand.vmem [shape: f32[128,128], index: 14, kind: input, shape index: {}]   ;;  %s2857_s15 = inlined_call_operand.vmem [shape: f32[1,128], index: 15, kind: input, shape index: {}]   ;;  %s2858_s16 = inlined_call_operand.vmem [shape: f32[128,128], index: 16, kind: input, shape index: {}]   ;;  %s2859_s17 = inlined_call_operand.vmem [shape: f32[1,128], index: 17, kind: input, shape index: {}]   ;;  %s2860_s18 = inlined_call_operand.vmem [shape: f32[128,128], index: 18, kind: input, shape index: {}]   ;;  %s2861_s19 = inlined_call_operand.vmem [shape: f32[1,128], index: 19, kind: input, shape index: {}]   ;;  %s2862_s20 = inlined_call_operand.hbm [shape: f32[2,128], index: 20, kind: output, shape index: {}]  }
   0x1   :  { %2867 = sst [smem:[#allocation5_spill]] %s2842_s0 }
   0x2   :  { %2868 = sst [smem:[#allocation6_spill]] %s2843_s1 }
   0x3   :  { %2869 = sst [smem:[#allocation7_spill]] %s2844_s2 }
   0x4   :  { %2870 = sst [smem:[#allocation8_spill]] %s2845_s3 }
   0x5   :  { %2871 = sst [smem:[#allocation9_spill]] %s2846_s4 }
   0x6   :  { %s2872_s23 = sld [smem:[#allocation9_spill]]  ;;  %s2873_s1 = sld [smem:[#allocation8_spill]] }
   0xc   :  { %v72_v0 = vld [vmem:[%s2872_s23] sm:$0xff]  ;;  %v73_v1 = vld [vmem:[%s2872_s23 + $0x8] sm:$0xff]  ;;  %v74_v2 = vld [vmem:[%s2872_s23 + $0x10] sm:$0xff] }
   0xd   :  { %v1956_v3 = vpack.c.bf16 %v73_v1, %v72_v0  ;;  %v75_v4 = vld [vmem:[%s2872_s23 + $0x18] sm:$0xff]  ;;  %v76_v6 = vld [vmem:[%s2872_s23 + $0x20] sm:$0xff]  ;;  %v77_v7 = vld [vmem:[%s2872_s23 + $0x28] sm:$0xff] }
   0xe   :  { %v1960_v5 = vpack.c.bf16 %v75_v4, %v74_v2  ;;  %v1964_v8 = vpack.c.bf16 %v77_v7, %v76_v6  ;;  %v2352_v9 = vld [vmem:[%s2873_s1] sm:$0xff]  ;;  %v78_v10 = vld [vmem:[%s2872_s23 + $0x30] sm:$0xff]  ;;  %v79_v11 = vld [vmem:[%s2872_s23 + $0x38] sm:$0xff] }
   0xf   :  { %1957 = vmatprep.subr.bf16.mxu0 %v1956_v3  ;;  %1701 = vmatprep.mubr.f32.mxu0 %v2352_v9 }
  0x10   :  { %1959 = vmatpush3.bf16.msra.mxu0 %v1956_v3 }
  0x11   :  { %1961 = vmatprep.subr.bf16.mxu0 %v1960_v5 }
  0x12   :  { %25 = vsyncpa [#allocation3], 0  ;;  %v1968_v12 = vpack.c.bf16 %v79_v11, %v78_v10  ;;  %v80_v13 = vld [vmem:[%s2872_s23 + $0x40] sm:$0xff]  ;;  %v81_v14 = vld [vmem:[%s2872_s23 + $0x48] sm:$0xff]  ;;  %s2874_s0 = sld [smem:[#allocation5_spill]]  ;;  %vm170_vm0 = vcmask 130048  }
  0x13   :  { %v1972_v15 = vpack.c.bf16 %v81_v14, %v80_v13  ;;  %v82_v16 = vld [vmem:[%s2872_s23 + $0x50] sm:$0xff]  ;;  %v83_v17 = vld [vmem:[%s2872_s23 + $0x58] sm:$0xff]  ;;  %v84_v19 = vld [vmem:[%s2872_s23 + $0x60] sm:$0xff]  ;;  %vm2223_vm1 = vmmov 0  }
  0x14   :  { %1963 = vmatpush3.bf16.msra.mxu0 %v1960_v5  ;;  %v1976_v18 = vpack.c.bf16 %v83_v17, %v82_v16  ;;  %v85_v20 = vld [vmem:[%s2872_s23 + $0x68] sm:$0xff]  ;;  %v86_v22 = vld [vmem:[%s2872_s23 + $0x70] sm:$0xff]  ;;  %v87_v23 = vld [vmem:[%s2872_s23 + $0x78] sm:$0xff] }
  0x15   :  { %1965 = vmatprep.subr.bf16.mxu0 %v1964_v8  ;;  %v1980_v21 = vpack.c.bf16 %v85_v20, %v84_v19  ;;  %v1984_v24 = vpack.c.bf16 %v87_v23, %v86_v22  ;;  %v2388_v25 = vld [vmem:[%s2873_s1 + $0x8] sm:$0xff]  ;;  %v1466_v31 = vld [vmem:[%s2872_s23 + $0x80] sm:$0xff]  ;;  %v1468_v34 = vld [vmem:[%s2872_s23 + $0x90] sm:$0xff]  ;;  %s2875_s1 = sld [smem:[#allocation6_spill]] }
  0x16   :  { %v1467_v32 = vld [vmem:[%s2872_s23 + $0x88] sm:$0xff]  ;;  %v1469_v35 = vld [vmem:[%s2872_s23 + $0x98] sm:$0xff]  ;;  %v1470_v37 = vld [vmem:[%s2872_s23 + $0xa0] sm:$0xff] }
  0x17   :  { %v1992_v33 = vpack.c.bf16 %v1467_v32, %v1466_v31  ;;  %v1996_v36 = vpack.c.bf16 %v1469_v35, %v1468_v34  ;;  %v1471_v38 = vld [vmem:[%s2872_s23 + $0xa8] sm:$0xff]  ;;  %v1472_v40 = vld [vmem:[%s2872_s23 + $0xb0] sm:$0xff]  ;;  %v1473_v41 = vld [vmem:[%s2872_s23 + $0xb8] sm:$0xff] }
  0x18   :  { %1967 = vmatpush3.bf16.msra.mxu0 %v1964_v8  ;;  %v2394_v26 = vld [vmem:[%s2874_s0] sm:$0xff]  ;;  %v2401_v30 = vld [vmem:[%s2874_s0 + $0x8] sm:$0xff]  ;;  %v2000_v39 = vpack.c.bf16 %v1471_v38, %v1470_v37  ;;  %v2004_v42 = vpack.c.bf16 %v1473_v41, %v1472_v40  ;;  %v1476_v46 = vld [vmem:[%s2872_s23 + $0xd0] sm:$0xff] }
  0x19   :  { %1969 = vmatprep.subr.bf16.mxu0 %v1968_v12  ;;  %1993 = vmatprep.subr.bf16.mxu1 %v1992_v33  ;;  %v1474_v43 = vld [vmem:[%s2872_s23 + $0xc0] sm:$0xff]  ;;  %v1475_v44 = vld [vmem:[%s2872_s23 + $0xc8] sm:$0xff]  ;;  %v1477_v47 = vld [vmem:[%s2872_s23 + $0xd8] sm:$0xff] }
  0x1a   :  { %1995 = vmatpush3.bf16.msra.mxu1 %v1992_v33  ;;  %v2008_v45 = vpack.c.bf16 %v1475_v44, %v1474_v43  ;;  %v2012_v48 = vpack.c.bf16 %v1477_v47, %v1476_v46  ;;  %v1478_v49 = vld [vmem:[%s2872_s23 + $0xe0] sm:$0xff]  ;;  %v1479_v50 = vld [vmem:[%s2872_s23 + $0xe8] sm:$0xff]  ;;  %v1480_v51 = vld [vmem:[%s2872_s23 + $0xf0] sm:$0xff] }
  0x1b   :  { %1997 = vmatprep.subr.bf16.mxu1 %v1996_v36  ;;  %v2016_v52 = vpack.c.bf16 %v1479_v50, %v1478_v49  ;;  %v1481_v53 = vld [vmem:[%s2872_s23 + $0xf8] sm:$0xff]  ;;  %v1461_v55 = vld [vmem:[%s2847_s5] ss:$0 sm:$0xff]  ;;  %v1492_v38 = vld [vmem:[%s2872_s23 + $0x110] sm:$0xff] }
  0x1c   :  { %1971 = vmatpush3.bf16.msra.mxu0 %v1968_v12  ;;  %v2020_v54 = vpack.c.bf16 %v1481_v53, %v1480_v51  ;;  %v1464_v19 = vld [vmem:[%s2848_s6] ss:$0 sm:$0xff]  ;;  %v1496_v44 = vld [vmem:[%s2872_s23 + $0x130] sm:$0xff]  ;;  %v1501_v51 = vld [vmem:[%s2872_s23 + $0x158] sm:$0xff] }
  0x1d   :  { %1973 = vmatprep.subr.bf16.mxu0 %v1972_v15  ;;  %v1465_v22 = vld [vmem:[%s2849_s7] ss:$0 sm:$0xff]  ;;  %v1500_v50 = vld [vmem:[%s2872_s23 + $0x150] sm:$0xff] }
  0x1e   :  { %1999 = vmatpush3.bf16.msra.mxu1 %v1996_v36  ;;  %v1494_v41 = vld [vmem:[%s2872_s23 + $0x120] sm:$0xff] }
  0x1f   :  { %2001 = vmatprep.subr.bf16.mxu1 %v2000_v39  ;;  %v1498_v47 = vld [vmem:[%s2872_s23 + $0x140] sm:$0xff] }
  0x20   :  { %1975 = vmatpush3.bf16.msra.mxu0 %v1972_v15  ;;  %v1502_v53 = vld [vmem:[%s2872_s23 + $0x160] sm:$0xff] }
  0x21   :  { %1977 = vmatprep.subr.bf16.mxu0 %v1976_v18 }
  0x22   :  { %2003 = vmatpush3.bf16.msra.mxu1 %v2000_v39  ;;  %v1493_v39 = vld [vmem:[%s2872_s23 + $0x118] sm:$0xff] }
  0x23   :  { %2005 = vmatprep.subr.bf16.mxu1 %v2004_v42  ;;  %v2032_v40 = vpack.c.bf16 %v1493_v39, %v1492_v38 }
  0x24   :  { %1979 = vmatpush3.bf16.msra.mxu0 %v1976_v18 }
  0x25   :  { %1981 = vmatprep.subr.bf16.mxu0 %v1980_v21 }
  0x26   :  { %2007 = vmatpush3.bf16.msra.mxu1 %v2004_v42  ;;  %v1495_v42 = vld [vmem:[%s2872_s23 + $0x128] sm:$0xff] }
  0x27   :  { %2009 = vmatprep.subr.bf16.mxu1 %v2008_v45  ;;  %v2036_v43 = vpack.c.bf16 %v1495_v42, %v1494_v41  ;;  %v748_v42 = vld [vmem:[%s2850_s8 + $0x18] sm:$0xff] }
  0x28   :  { %1983 = vmatpush3.bf16.msra.mxu0 %v1980_v21 }
  0x29   :  { %1985 = vmatprep.subr.bf16.mxu0 %v1984_v24 }
  0x2a   :  { %2011 = vmatpush3.bf16.msra.mxu1 %v2008_v45  ;;  %v1497_v45 = vld [vmem:[%s2872_s23 + $0x138] sm:$0xff] }
  0x2b   :  { %2013 = vmatprep.subr.bf16.mxu1 %v2012_v48  ;;  %v2040_v46 = vpack.c.bf16 %v1497_v45, %v1496_v44  ;;  %v750_v44 = vld [vmem:[%s2850_s8 + $0x28] sm:$0xff] }
  0x2c   :  { %1987 = vmatpush3.bf16.msra.mxu0 %v1984_v24 }
  0x2e   :  { %2015 = vmatpush3.bf16.msra.mxu1 %v2012_v48  ;;  %v1499_v48 = vld [vmem:[%s2872_s23 + $0x148] sm:$0xff] }
  0x2f   :  { %1702 = vmatmul.mubr.f32.vlgmr.msra.gmra.mrb[0].mxu0 %v2388_v25  ;;  %2017 = vmatprep.subr.bf16.mxu1 %v2016_v52  ;;  %v2044_v49 = vpack.c.bf16 %v1499_v48, %v1498_v47  ;;  %v752_v47 = vld [vmem:[%s2850_s8 + $0x38] sm:$0xff] }
  0x30   :  { %1708 = vmatprep.mubr.msk.f32.mxu0 %vm170_vm0, %v2394_v26 }
  0x32   :  { %2019 = vmatpush3.bf16.msra.mxu1 %v2016_v52  ;;  %v2048_v52 = vpack.c.bf16 %v1501_v51, %v1500_v50  ;;  %v754_v50 = vld [vmem:[%s2850_s8 + $0x48] sm:$0xff] }
  0x33   :  { %2021 = vmatprep.subr.bf16.mxu1 %v2020_v54 }
  0x36   :  { %2023 = vmatpush3.bf16.msra.mxu1 %v2020_v54  ;;  %v1503_v54 = vld [vmem:[%s2872_s23 + $0x168] sm:$0xff] }
 0x102   :  { %v1703_v27 = vpop.f32.mrb[0].mxu0 }
 0x103   :  { %v154_v28 = vpop.f32.mrb[1].mxu0 }
 0x104   :  { %v1988_v29 = vpack.c.bf16 %v1703_v27, %v154_v28 }
 0x106   :  { %1989 = vmatprep.subr.bf16.mxu0 %v1988_v29 }
 0x107   :  { %1991 = vmatpush3.bf16.msra.mxu0 %v1988_v29 }
 0x10a   :  { %1709 = vmatmul.mubr.msk.f32.vlgmr.msra.gmra.mrb[2].mxu0 %vm170_vm0, %v2401_v30 }
 0x10b   :  { %1750 = vmatprep.mubr.msk.f32.mxu0 %vm170_vm0, %v2394_v26 }
 0x1dd   :  { %v1710_v56 = vpop.f32.mrb[2].mxu0 }
 0x1de   :  { %v249_v57 = vadd.f32 %v1710_v56, %v1461_v55  ;;  %v243_v58 = vpop.f32.mrb[3].mxu0  ;;  %v1504_v56 = vld [vmem:[%s2872_s23 + $0x170] sm:$0xff] }
 0x1df   :  { %v244_v59 = vadd.f32 %v1461_v55, %v243_v58  ;;  %v2052_v55 = vpack.c.bf16 %v1503_v54, %v1502_v53  ;;  %v756_v53 = vld [vmem:[%s2850_s8 + $0x58] sm:$0xff] }
 0x1e1   :  { %v254_v60 = vadd.f32 %v249_v57, %v244_v59 }
 0x1e3   :  { %v255_v61 = vrot.slane %v254_v60, 4 }
 0x1e5   :  { %v256_v62 = vadd.f32 %v255_v61, %v254_v60 }
 0x1e7   :  { %v257_v63 = vrot.slane %v256_v62, 2 }
 0x1e9   :  { %v258_v0 = vadd.f32 %v257_v63, %v256_v62 }
 0x1eb   :  { %v259_v1 = vrot.slane %v258_v0, 1 }
 0x1ed   :  { %v260_v2 = vadd.f32 %v259_v1, %v258_v0 }
 0x1ef   :  { %v262_v3 = vmul.f32 0.0625, %v260_v2 }
 0x1f1   :  { %v263_v4 = vsub.f32 %v244_v59, %v262_v3  ;;  %v264_v5 = vsub.f32 %v249_v57, %v262_v3  ;;  %v1505_v57 = vld [vmem:[%s2872_s23 + $0x178] sm:$0xff]  ;;  %v1483_v59 = vld [vmem:[%s2847_s5 + $0x1] ss:$0 sm:$0xff] }
 0x1f2   :  { %v2056_v58 = vpack.c.bf16 %v1505_v57, %v1504_v56  ;;  %v758_v56 = vld [vmem:[%s2850_s8 + $0x68] sm:$0xff] }
 0x1f3   :  { %v265_v6 = vmul.f32 %v263_v4, %v263_v4  ;;  %v266_v7 = vmul.f32 %v264_v5, %v264_v5 }
 0x1f5   :  { %v267_v8 = vadd.f32 %v266_v7, %v265_v6 }
 0x1f7   :  { %v268_v10 = vrot.slane %v267_v8, 4 }
 0x1f9   :  { %v269_v11 = vadd.f32 %v268_v10, %v267_v8 }
 0x1fb   :  { %v270_v12 = vrot.slane %v269_v11, 2 }
 0x1fd   :  { %v271_v13 = vadd.f32 %v270_v12, %v269_v11 }
 0x1ff   :  { %v272_v14 = vrot.slane %v271_v13, 1 }
 0x201   :  { %v273_v15 = vadd.f32 %v272_v14, %v271_v13 }
 0x203   :  { %v274_v16 = vmul.f32 0.0625, %v273_v15 }
 0x205   :  { %v275_v17 = vadd.f32 1e-05, %v274_v16 }
 0x207   :  { %2182 = vrsqrt.f32 %v275_v17 }
 0x211   :  { %v2183_v18 = vpop.eup %2182 }
 0x212   :  { %v277_v20 = vmul.f32 %v2183_v18, %v263_v4  ;;  %v278_v21 = vmul.f32 %v2183_v18, %v264_v5 }
 0x214   :  { %v285_v23 = vmul.f32 %v1464_v19, %v277_v20  ;;  %v286_v24 = vmul.f32 %v1464_v19, %v278_v21 }
 0x216   :  { %v293_v27 = vadd.f32 %v1465_v22, %v285_v23  ;;  %v294_v28 = vadd.f32 %v1465_v22, %v286_v24  ;;  %v1488_v23 = vld [vmem:[%s2848_s6 + $0x1] ss:$0 sm:$0xff] }
 0x218   :  { %v295_v29 = vmax.f32 %v293_v27, 0.0  ;;  %v296_v31 = vmax.f32 %v294_v28, 0.0  ;;  %v1489_v28 = vld [vmem:[%s2849_s7 + $0x1] ss:$0 sm:$0xff] }
 0x21a   :  { %v2465_v32 = vadd.f32 %v295_v29, %v2352_v9  ;;  %v2468_v33 = vadd.f32 %v296_v31, %v2388_v25  ;;  %v1490_v9 = vld [vmem:[%s2872_s23 + $0x100] sm:$0xff]  ;;  %v1491_v25 = vld [vmem:[%s2872_s23 + $0x108] sm:$0xff] }
 0x21b   :  { %v2028_v37 = vpack.c.bf16 %v1491_v25, %v1490_v9 }
 0x21c   :  { %1743 = vmatprep.mubr.f32.mxu1 %v2465_v32 }
 0x21d   :  { %1744 = vmatmul.mubr.f32.vlgmr.msra.gmra.mrb[0].mxu1 %v2468_v33 }
 0x2f0   :  { %v1745_v34 = vpop.f32.mrb[0].mxu1 }
 0x2f1   :  { %v382_v35 = vpop.f32.mrb[1].mxu1 }
 0x2f2   :  { %v2024_v36 = vpack.c.bf16 %v1745_v34, %v382_v35 }
 0x2f4   :  { %2025 = vmatprep.subr.bf16.mxu0 %v2024_v36 }
 0x2f5   :  { %2027 = vmatpush3.bf16.msra.mxu0 %v2024_v36 }
 0x2f6   :  { %2029 = vmatprep.subr.bf16.mxu0 %v2028_v37 }
 0x2f8   :  { %1751 = vmatmul.mubr.msk.f32.vlgmr.msra.gmra.mrb[4].mxu0 %vm170_vm0, %v2401_v30 }
 0x2f9   :  { %2031 = vmatpush3.bf16.msra.mxu0 %v2028_v37 }
 0x2fa   :  { %2033 = vmatprep.subr.bf16.mxu0 %v2032_v40 }
 0x2fd   :  { %2035 = vmatpush3.bf16.msra.mxu0 %v2032_v40 }
 0x2fe   :  { %2037 = vmatprep.subr.bf16.mxu0 %v2036_v43 }
 0x301   :  { %2039 = vmatpush3.bf16.msra.mxu0 %v2036_v43  ;;  %v749_v43 = vld [vmem:[%s2850_s8 + $0x20] sm:$0xff] }
 0x302   :  { %2041 = vmatprep.subr.bf16.mxu0 %v2040_v46  ;;  %v2072_v45 = vpack.c.bf16 %v750_v44, %v749_v43  ;;  %v849_v44 = vld [vmem:[%s2851_s9] sm:$0x1] }
 0x305   :  { %2043 = vmatpush3.bf16.msra.mxu0 %v2040_v46  ;;  %v751_v46 = vld [vmem:[%s2850_s8 + $0x30] sm:$0xff] }
 0x306   :  { %2045 = vmatprep.subr.bf16.mxu0 %v2044_v49  ;;  %v2076_v48 = vpack.c.bf16 %v752_v47, %v751_v46 }
 0x309   :  { %2047 = vmatpush3.bf16.msra.mxu0 %v2044_v49  ;;  %v753_v49 = vld [vmem:[%s2850_s8 + $0x40] sm:$0xff] }
 0x30a   :  { %2049 = vmatprep.subr.bf16.mxu0 %v2048_v52  ;;  %v2080_v51 = vpack.c.bf16 %v754_v50, %v753_v49 }
 0x30d   :  { %2051 = vmatpush3.bf16.msra.mxu0 %v2048_v52  ;;  %v755_v52 = vld [vmem:[%s2850_s8 + $0x50] sm:$0xff] }
 0x30e   :  { %2053 = vmatprep.subr.bf16.mxu0 %v2052_v55  ;;  %v2084_v54 = vpack.c.bf16 %v756_v53, %v755_v52  ;;  %v68_v52 = vld [vmem:[%s2875_s1] sm:$0xff] }
 0x30f   :  { %vm932_vm2 = vcmp.gt.f32.partialorder %v68_v52, 0.0 }
 0x311   :  { %2055 = vmatpush3.bf16.msra.mxu0 %v2052_v55  ;;  %v757_v55 = vld [vmem:[%s2850_s8 + $0x60] sm:$0xff] }
 0x312   :  { %2057 = vmatprep.subr.bf16.mxu0 %v2056_v58  ;;  %v2088_v57 = vpack.c.bf16 %v758_v56, %v757_v55  ;;  %v69_v56 = vld [vmem:[%s2875_s1 + $0x8] sm:$0xff] }
 0x313   :  { %vm933_vm5 = vcmp.gt.f32.partialorder %v69_v56, 0.0 }
 0x315   :  { %2059 = vmatpush3.bf16.msra.mxu0 %v2056_v58  ;;  %v759_v58 = vld [vmem:[%s2850_s8 + $0x70] sm:$0xff] }
 0x3cb   :  { %v1752_v60 = vpop.f32.mrb[4].mxu0 }
 0x3cc   :  { %v471_v61 = vadd.f32 %v1752_v60, %v1483_v59  ;;  %v465_v62 = vpop.f32.mrb[5].mxu0 }
 0x3cd   :  { %v466_v63 = vadd.f32 %v1483_v59, %v465_v62  ;;  %v760_v59 = vld [vmem:[%s2850_s8 + $0x78] sm:$0xff] }
 0x3ce   :  { %v2092_v60 = vpack.c.bf16 %v760_v59, %v759_v58 }
 0x3cf   :  { %v478_v0 = vadd.f32 %v471_v61, %v466_v63 }
 0x3d1   :  { %v479_v1 = vrot.slane %v478_v0, 4 }
 0x3d3   :  { %v480_v2 = vadd.f32 %v479_v1, %v478_v0 }
 0x3d5   :  { %v481_v3 = vrot.slane %v480_v2, 2 }
 0x3d7   :  { %v482_v4 = vadd.f32 %v481_v3, %v480_v2 }
 0x3d9   :  { %v483_v5 = vrot.slane %v482_v4, 1 }
 0x3db   :  { %v484_v6 = vadd.f32 %v483_v5, %v482_v4 }
 0x3dd   :  { %v485_v7 = vmul.f32 0.0625, %v484_v6 }
 0x3df   :  { %v486_v8 = vsub.f32 %v466_v63, %v485_v7  ;;  %v487_v10 = vsub.f32 %v471_v61, %v485_v7  ;;  %v1507_v61 = vld [vmem:[%s2847_s5 + $0x2] ss:$0 sm:$0xff] }
 0x3e1   :  { %v488_v11 = vmul.f32 %v486_v8, %v486_v8  ;;  %v489_v12 = vmul.f32 %v487_v10, %v487_v10 }
 0x3e3   :  { %v490_v13 = vadd.f32 %v489_v12, %v488_v11 }
 0x3e5   :  { %v491_v14 = vrot.slane %v490_v13, 4 }
 0x3e7   :  { %v492_v15 = vadd.f32 %v491_v14, %v490_v13 }
 0x3e9   :  { %v493_v16 = vrot.slane %v492_v15, 2 }
 0x3eb   :  { %v494_v17 = vadd.f32 %v493_v16, %v492_v15 }
 0x3ed   :  { %v495_v18 = vrot.slane %v494_v17, 1 }
 0x3ef   :  { %v496_v19 = vadd.f32 %v495_v18, %v494_v17 }
 0x3f1   :  { %v497_v20 = vmul.f32 0.0625, %v496_v19 }
 0x3f3   :  { %v498_v21 = vadd.f32 1e-05, %v497_v20 }
 0x3f5   :  { %2184 = vrsqrt.f32 %v498_v21 }
 0x3ff   :  { %v2185_v22 = vpop.eup %2184 }
 0x400   :  { %v500_v24 = vmul.f32 %v2185_v22, %v486_v8  ;;  %v501_v27 = vmul.f32 %v2185_v22, %v487_v10 }
 0x402   :  { %v508_v29 = vmul.f32 %v1488_v23, %v500_v24  ;;  %v509_v31 = vmul.f32 %v1488_v23, %v501_v27  ;;  %v1512_v27 = vld [vmem:[%s2848_s6 + $0x2] ss:$0 sm:$0xff]  ;;  %s2225_s6 = smov [#allocation2]  }
 0x404   :  { %v516_v34 = vadd.f32 %v1489_v28, %v508_v29  ;;  %v517_v35 = vadd.f32 %v1489_v28, %v509_v31  ;;  %v1513_v31 = vld [vmem:[%s2849_s7 + $0x2] ss:$0 sm:$0xff] }
 0x406   :  { %v518_v36 = vmax.f32 %v516_v34, 0.0  ;;  %v519_v9 = vmax.f32 %v517_v35, 0.0 }
 0x408   :  { %v2532_v25 = vadd.f32 %v518_v36, %v2465_v32  ;;  %v2535_v37 = vadd.f32 %v519_v9, %v2468_v33  ;;  %v745_v32 = vld [vmem:[%s2850_s8] sm:$0xff]  ;;  %v746_v33 = vld [vmem:[%s2850_s8 + $0x8] sm:$0xff] }
 0x409   :  { %v2064_v41 = vpack.c.bf16 %v746_v33, %v745_v32  ;;  %v2222_v33 = vmov 0.0|0.0  }
 0x40a   :  { %1785 = vmatprep.mubr.f32.mxu0 %v2532_v25 }
 0x40b   :  { %1786 = vmatmul.mubr.f32.vlgmr.msra.gmra.mrb[6].mxu0 %v2535_v37  ;;  %2065 = vmatprep.subr.bf16.mxu1 %v2064_v41 }
 0x40c   :  { %1792 = vmatprep.mubr.msk.f32.mxu0 %vm170_vm0, %v2394_v26  ;;  %2067 = vmatpush3.bf16.msra.mxu1 %v2064_v41  ;;  %v747_v26 = vld [vmem:[%s2850_s8 + $0x10] sm:$0xff]  ;;  %v2224_v41 = vmov 0.0  }
 0x4de   :  { %v1787_v38 = vpop.f32.mrb[6].mxu0 }
 0x4df   :  { %v605_v39 = vpop.f32.mrb[7].mxu0 }
 0x4e0   :  { %v2060_v40 = vpack.c.bf16 %v1787_v38, %v605_v39 }
 0x4e2   :  { %2061 = vmatprep.subr.bf16.mxu0 %v2060_v40 }
 0x4e3   :  { %2063 = vmatpush3.bf16.msra.mxu0 %v2060_v40 }
 0x4e4   :  { %2096 = vmatprep.subr.bf16.mxu0 %v2222_v33 }
 0x4e6   :  { %1793 = vmatmul.mubr.msk.f32.vlgmr.msra.gmra.mrb[8].mxu0 %vm170_vm0, %v2401_v30  ;;  %v2068_v30 = vpack.c.bf16 %v748_v42, %v747_v26 }
 0x4e7   :  { %1834 = vmatprep.mubr.msk.f32.mxu0 %vm2223_vm1, %v2224_v41 }
 0x4e8   :  { %2069 = vmatprep.subr.bf16.mxu1 %v2068_v30 }
 0x4e9   :  { %2071 = vmatpush3.bf16.msra.mxu1 %v2068_v30 }
 0x4ea   :  { %2073 = vmatprep.subr.bf16.mxu1 %v2072_v45 }
 0x4ed   :  { %2075 = vmatpush3.bf16.msra.mxu1 %v2072_v45  ;;  %v920_v45 = vlaneseq }
 0x4ee   :  { %2077 = vmatprep.subr.bf16.mxu1 %v2076_v48 }
 0x4ef   :  { %v921_v46 = vshrl.u32 %v920_v45, 7  ;;  %v1515_v45 = vld [vmem:[%s2853_s11] ss:$0 sm:$0xff]  ;;  %s1453_s11 = sshll.u32 %s2225_s6, 4  ;;  %s1454_s11 = int_to_ptr.vmem [resolvable:$true] %s1453_s11 }
 0x4f0   :  { %p2203_p1 = scmp.lt.s32.totalorder %s1454_s11, %s1454_s11 }
 0x4f1   :  { %2079 = vmatpush3.bf16.msra.mxu1 %v2076_v48  ;;  %v922_v48 = vsub.s32 0, %v921_v46 }
 0x4f2   :  { %2081 = vmatprep.subr.bf16.mxu1 %v2080_v51 }
 0x4f5   :  { %2083 = vmatpush3.bf16.msra.mxu1 %v2080_v51 }
 0x4f6   :  { %2085 = vmatprep.subr.bf16.mxu1 %v2084_v54 }
 0x4f9   :  { %2087 = vmatpush3.bf16.msra.mxu1 %v2084_v54 }
 0x4fa   :  { %2089 = vmatprep.subr.bf16.mxu1 %v2088_v57 }
 0x4fd   :  { %2091 = vmatpush3.bf16.msra.mxu1 %v2088_v57 }
 0x4fe   :  { %2093 = vmatprep.subr.bf16.mxu1 %v2092_v60 }
 0x501   :  { %2095 = vmatpush3.bf16.msra.mxu1 %v2092_v60 }
 0x502   :  { %2106 = vmatprep.subr.bf16.mxu1 %v2222_v33 }
 0x5b9   :  { %v1794_v62 = vpop.f32.mrb[8].mxu0 }
 0x5ba   :  { %v694_v63 = vadd.f32 %v1794_v62, %v1507_v61  ;;  %v688_v0 = vpop.f32.mrb[9].mxu0 }
 0x5bb   :  { %v689_v1 = vadd.f32 %v1507_v61, %v688_v0 }
 0x5bd   :  { %v701_v2 = vadd.f32 %v694_v63, %v689_v1 }
 0x5bf   :  { %v702_v3 = vrot.slane %v701_v2, 4 }
 0x5c1   :  { %v703_v4 = vadd.f32 %v702_v3, %v701_v2 }
 0x5c3   :  { %v704_v5 = vrot.slane %v703_v4, 2 }
 0x5c5   :  { %v705_v6 = vadd.f32 %v704_v5, %v703_v4 }
 0x5c7   :  { %v706_v7 = vrot.slane %v705_v6, 1 }
 0x5c9   :  { %v707_v8 = vadd.f32 %v706_v7, %v705_v6 }
 0x5cb   :  { %v708_v10 = vmul.f32 0.0625, %v707_v8 }
 0x5cd   :  { %v709_v11 = vsub.f32 %v689_v1, %v708_v10  ;;  %v710_v12 = vsub.f32 %v694_v63, %v708_v10 }
 0x5cf   :  { %v711_v13 = vmul.f32 %v709_v11, %v709_v11  ;;  %v712_v14 = vmul.f32 %v710_v12, %v710_v12 }
 0x5d1   :  { %v713_v15 = vadd.f32 %v712_v14, %v711_v13 }
 0x5d3   :  { %v714_v16 = vrot.slane %v713_v15, 4 }
 0x5d5   :  { %v715_v17 = vadd.f32 %v714_v16, %v713_v15 }
 0x5d7   :  { %v716_v18 = vrot.slane %v715_v17, 2 }
 0x5d9   :  { %v717_v19 = vadd.f32 %v716_v18, %v715_v17  ;;  %v1166_v18 = vld [vmem:[%s2856_s14] sm:$0xff] }
 0x5db   :  { %v718_v20 = vrot.slane %v717_v19, 1 }
 0x5dd   :  { %v719_v21 = vadd.f32 %v718_v20, %v717_v19  ;;  %v1167_v19 = vld [vmem:[%s2856_s14 + $0x8] sm:$0xff]  ;;  %v1168_v20 = vld [vmem:[%s2856_s14 + $0x10] sm:$0xff] }
 0x5df   :  { %v720_v22 = vmul.f32 0.0625, %v719_v21  ;;  %v2107_v21 = vpack.c.bf16 %v1167_v19, %v1166_v18 }
 0x5e1   :  { %v721_v23 = vadd.f32 1e-05, %v720_v22  ;;  %v1169_v22 = vld [vmem:[%s2856_s14 + $0x18] sm:$0xff] }
 0x5e3   :  { %2186 = vrsqrt.f32 %v721_v23  ;;  %v2110_v23 = vpack.c.bf16 %v1169_v22, %v1168_v20 }
 0x5ed   :  { %v2187_v24 = vpop.eup %2186 }
 0x5ee   :  { %v723_v28 = vmul.f32 %v2187_v24, %v709_v11  ;;  %v724_v29 = vmul.f32 %v2187_v24, %v710_v12  ;;  %v1170_v24 = vld [vmem:[%s2856_s14 + $0x20] sm:$0xff] }
 0x5f0   :  { %v731_v34 = vmul.f32 %v1512_v27, %v723_v28  ;;  %v732_v35 = vmul.f32 %v1512_v27, %v724_v29  ;;  %v1171_v27 = vld [vmem:[%s2856_s14 + $0x28] sm:$0xff]  ;;  %v1172_v29 = vld [vmem:[%s2856_s14 + $0x30] sm:$0xff] }
 0x5f1   :  { %v2113_v28 = vpack.c.bf16 %v1171_v27, %v1170_v24  ;;  %v1263_v27 = vld [vmem:[%s2858_s16 + $0x18] sm:$0xff] }
 0x5f2   :  { %v739_v36 = vadd.f32 %v1513_v31, %v731_v34  ;;  %v740_v9 = vadd.f32 %v1513_v31, %v732_v35  ;;  %v1173_v31 = vld [vmem:[%s2856_s14 + $0x38] sm:$0xff]  ;;  %v1174_v35 = vld [vmem:[%s2856_s14 + $0x40] sm:$0xff] }
 0x5f3   :  { %v2116_v34 = vpack.c.bf16 %v1173_v31, %v1172_v29  ;;  %v1264_v29 = vld [vmem:[%s2858_s16 + $0x20] sm:$0xff]  ;;  %v1265_v31 = vld [vmem:[%s2858_s16 + $0x28] sm:$0xff] }
 0x5f4   :  { %v741_v38 = vmax.f32 %v739_v36, 0.0  ;;  %v742_v39 = vmax.f32 %v740_v9, 0.0  ;;  %v1175_v36 = vld [vmem:[%s2856_s14 + $0x48] sm:$0xff] }
 0x5f5   :  { %v2119_v9 = vpack.c.bf16 %v1175_v36, %v1174_v35  ;;  %v1266_v35 = vld [vmem:[%s2858_s16 + $0x30] sm:$0xff]  ;;  %v1267_v36 = vld [vmem:[%s2858_s16 + $0x38] sm:$0xff] }
 0x5f6   :  { %v2601_v40 = vadd.f32 %v741_v38, %v2532_v25  ;;  %v2604_v32 = vadd.f32 %v742_v39, %v2535_v37  ;;  %v1514_v25 = vld [vmem:[%s2852_s10] ss:$0 sm:$0xff]  ;;  %v1176_v38 = vld [vmem:[%s2856_s14 + $0x50] sm:$0xff]  ;;  %v1177_v39 = vld [vmem:[%s2856_s14 + $0x58] sm:$0xff]  ;;  %s2876_s10 = sld [smem:[#allocation7_spill]] }
 0x5f8   :  { %1827 = vmatprep.mubr.f32.mxu1 %v2601_v40 }
 0x5f9   :  { %1828 = vmatmul.mubr.f32.vlgmr.msra.gmra.mrb[2].mxu1 %v2604_v32 }
 0x5fa   :  { %1883 = vmatprep.mubr.msk.f32.mxu1 %vm2223_vm1, %v2224_v41  ;;  %2108 = vmatpush3.bf16.msra.mxu1 %v2107_v21 }
 0x5fb   :  { %2109 = vmatprep.subr.bf16.mxu1 %v2222_v33 }
 0x5fc   :  { %v1092_v22 = vld [vmem:[%s2876_s10] sm:$0x3] }
 0x5fe   :  { %2111 = vmatpush3.bf16.msra.mxu1 %v2110_v23  ;;  %v1260_v23 = vld [vmem:[%s2858_s16] sm:$0xff] }
 0x5ff   :  { %2112 = vmatprep.subr.bf16.mxu1 %v2222_v33 }
 0x602   :  { %2114 = vmatpush3.bf16.msra.mxu1 %v2113_v28 }
 0x603   :  { %2115 = vmatprep.subr.bf16.mxu1 %v2222_v33 }
 0x606   :  { %2117 = vmatpush3.bf16.msra.mxu1 %v2116_v34  ;;  %v2137_v34 = vpack.c.bf16 %v1265_v31, %v1264_v29 }
 0x607   :  { %2118 = vmatprep.subr.bf16.mxu1 %v2222_v33 }
 0x60a   :  { %2120 = vmatpush3.bf16.msra.mxu1 %v2119_v9  ;;  %v2140_v9 = vpack.c.bf16 %v1267_v36, %v1266_v35 }
 0x60b   :  { %2121 = vmatprep.subr.bf16.mxu1 %v2222_v33 }
 0x6cc   :  { %v1829_v37 = vpop.f32.mrb[2].mxu1 }
 0x6cd   :  { %v827_v26 = vpop.f32.mrb[3].mxu1  ;;  %v844_v43 = vmul.f32 %v1829_v37, %v1514_v25 }
 0x6ce   :  { %v2097_v42 = vpack.c.bf16 %v1829_v37, %v827_v26  ;;  %v843_v30 = vmul.f32 %v1514_v25, %v827_v26  ;;  %v2122_v25 = vpack.c.bf16 %v1177_v39, %v1176_v38  ;;  %v1178_v37 = vld [vmem:[%s2856_s14 + $0x60] sm:$0xff]  ;;  %v1179_v26 = vld [vmem:[%s2856_s14 + $0x68] sm:$0xff] }
 0x6cf   :  { %v1268_v38 = vld [vmem:[%s2858_s16 + $0x40] sm:$0xff]  ;;  %v1269_v39 = vld [vmem:[%s2858_s16 + $0x48] sm:$0xff] }
 0x6d0   :  { %2098 = vmatpush3.bf16.xpose.msra.mxu0 %v2097_v42  ;;  %845 = vadd.xlane.f32.xlu0 %v843_v30  ;;  %v1180_v30 = vld [vmem:[%s2856_s14 + $0x70] sm:$0xff] }
 0x6d1   :  { %2100 = vmatprep.subr.bf16.mxu0 %v2097_v42  ;;  %2123 = vmatpush3.bf16.msra.mxu1 %v2122_v25  ;;  %v2143_v25 = vpack.c.bf16 %v1269_v39, %v1268_v38 }
 0x6d2   :  { %2124 = vmatprep.subr.bf16.mxu1 %v2222_v33 }
 0x6d4   :  { %847 = vadd.xlane.f32.xlu0 %v844_v43  ;;  %v1181_v43 = vld [vmem:[%s2856_s14 + $0x78] sm:$0xff] }
 0x6d7   :  { %1835 = vmatmul.mubr.f32.vlgmr.msra.gmra.mrb[10].mxu0 %v849_v44  ;;  %v2128_v44 = vpack.c.bf16 %v1181_v43, %v1180_v30  ;;  %v1272_v30 = vld [vmem:[%s2858_s16 + $0x60] sm:$0xff]  ;;  %v1273_v43 = vld [vmem:[%s2858_s16 + $0x68] sm:$0xff] }
 0x6d8   :  { %2102 = vmatpush3.bf16.msra.mxu0 %v2097_v42  ;;  %v2125_v42 = vpack.c.bf16 %v1179_v26, %v1178_v37  ;;  %v1270_v37 = vld [vmem:[%s2858_s16 + $0x50] sm:$0xff]  ;;  %v1271_v26 = vld [vmem:[%s2858_s16 + $0x58] sm:$0xff] }
 0x6d9   :  { %2103 = vmatprep.subr.bf16.mxu0 %v2222_v33 }
 0x6da   :  { %2126 = vmatpush3.bf16.msra.mxu1 %v2125_v42  ;;  %v2146_v42 = vpack.c.bf16 %v1271_v26, %v1270_v37 }
 0x6db   :  { %2127 = vmatprep.subr.bf16.mxu1 %v2222_v33 }
 0x6de   :  { %2129 = vmatpush3.bf16.msra.mxu1 %v2128_v44  ;;  %v2149_v44 = vpack.c.bf16 %v1273_v43, %v1272_v30 }
 0x6df   :  { %2154 = vmatprep.subr.bf16.mxu1 %v2222_v33 }
 0x75d   :  { %v846_v47 = vpop.xlane.xlu0 %845 }
 0x761   :  { %v848_v53 = vpop.xlane.xlu0 %847 }
 0x7aa   :  { %v916_v49 = vpop.f32.mrb[10].mxu0 }
 0x7ab   :  { %v923_v50 = vrot.slane %v916_v49, %v922_v48  ;;  %v1836_v51 = vpop.f32.mrb[11].mxu0 }
 0x7ad   :  { %v924_v54 = vadd.f32 %v923_v50, %v846_v47  ;;  %v925_v55 = vadd.f32 %v923_v50, %v848_v53 }
 0x7af   :  { %vm926_vm3 = vcmp.gt.f32.partialorder %v924_v54, 0.0  ;;  %v928_v57 = vmul.f32 0.2, %v924_v54  ;;  %vm927_vm4 = vcmp.gt.f32.partialorder %v925_v55, 0.0  ;;  %v929_v58 = vmul.f32 0.2, %v925_v55 }
 0x7b1   :  { %v930_v59 = vsel %vm926_vm3, %v924_v54, %v928_v57  ;;  %v931_v60 = vsel %vm927_vm4, %v925_v55, %v929_v58 }
 0x7b2   :  { %v934_v61 = vsel %vm932_vm2, %v930_v59, -1e+30  ;;  %v935_v63 = vsel %vm933_vm5, %v931_v60, -1e+30 }
 0x7b3   :  { %v936_v62 = vsel %vm170_vm0, %v934_v61, -inf  ;;  %v939_v0 = vsel %vm170_vm0, %v935_v63, -inf }
 0x7b4   :  { %937 = vmax.xlane.f32.xlu1 %v936_v62 }
 0x7b8   :  { %940 = vmax.xlane.f32.xlu1 %v939_v0 }
 0x841   :  { %v938_v1 = vpop.xlane.xlu1 %937 }
 0x842   :  { %v942_v2 = vsub.f32 %v934_v61, %v938_v1 }
 0x844   :  { %v944_v3 = vmul.f32 1.442695, %v942_v2 }
 0x845   :  { %v941_v4 = vpop.xlane.xlu1 %940 }
 0x846   :  { %2188 = vpow2.f32 %v944_v3  ;;  %v943_v5 = vsub.f32 %v935_v63, %v941_v4 }
 0x848   :  { %v946_v6 = vmul.f32 1.442695, %v943_v5 }
 0x84a   :  { %2190 = vpow2.f32 %v946_v6 }
 0x850   :  { %v2189_v7 = vpop.eup %2188 }
 0x851   :  { %v948_v8 = vsel %vm170_vm0, %v2189_v7, 0.0 }
 0x852   :  { %949 = vadd.xlane.f32.xlu0 %v948_v8  ;;  %v1518_v8 = vld [vmem:[%s2854_s12] ss:$0 sm:$0xff] }
 0x854   :  { %v2191_v10 = vpop.eup %2190 }
 0x855   :  { %v951_v11 = vsel %vm170_vm0, %v2191_v10, 0.0 }
 0x856   :  { %952 = vadd.xlane.f32.xlu1 %v951_v11 }
 0x8df   :  { %v950_v12 = vpop.xlane.xlu0 %949 }
 0x8e0   :  { %2192 = vrcp.f32 %v950_v12  ;;  %v1519_v12 = vld [vmem:[%s2855_s13] ss:$0 sm:$0xff] }
 0x8e3   :  { %v953_v13 = vpop.xlane.xlu1 %952 }
 0x8e4   :  { %2194 = vrcp.f32 %v953_v13 }
 0x8ea   :  { %v2193_v14 = vpop.eup %2192 }
 0x8eb   :  { %v956_v15 = vmul.f32 %v2193_v14, %v2189_v7 }
 0x8ed   :  { %1841 = vmatprep.mubr.msk.f32.mxu0 %vm170_vm0, %v956_v15 }
 0x8ee   :  { %v2195_v16 = vpop.eup %2194 }
 0x8ef   :  { %v957_v17 = vmul.f32 %v2195_v16, %v2191_v10 }
 0x8f1   :  { %1842 = vmatmul.mubr.msk.f32.vlgmr.msra.gmra.mrb[12].mxu0 %vm170_vm0, %v957_v17 }
 0x8f2   :  { %1848 = vmatprep.mubr.msk.f32.mxu0 %vm2223_vm1, %v2224_v41 }
 0x9c4   :  { %v1843_v46 = vpop.f32.mrb[12].mxu0 }
 0x9c5   :  { %v1043_v47 = vadd.f32 %v1843_v46, %v1515_v45  ;;  %v1037_v48 = vpop.f32.mrb[13].mxu0 }
 0x9c6   :  { %v1038_v49 = vadd.f32 %v1515_v45, %v1037_v48  ;;  %v1275_v48 = vld [vmem:[%s2858_s16 + $0x78] sm:$0xff] }
 0x9c8   :  { %v1048_v50 = vadd.f32 %v1043_v47, %v1038_v49 }
 0x9ca   :  { %v1049_v51 = vrot.slane %v1048_v50, 4 }
 0x9cc   :  { %v1050_v52 = vadd.f32 %v1049_v51, %v1048_v50  ;;  %v1353_v50 = vld [vmem:[%s2860_s18] sm:$0xff]  ;;  %v1354_v51 = vld [vmem:[%s2860_s18 + $0x8] sm:$0xff] }
 0x9ce   :  { %v1051_v53 = vrot.slane %v1050_v52, 2 }
 0x9d0   :  { %v1052_v54 = vadd.f32 %v1051_v53, %v1050_v52  ;;  %v2155_v52 = vpack.c.bf16 %v1354_v51, %v1353_v50  ;;  %v1356_v53 = vld [vmem:[%s2860_s18 + $0x18] sm:$0xff] }
 0x9d2   :  { %v1053_v55 = vrot.slane %v1052_v54, 1 }
 0x9d4   :  { %v1054_v56 = vadd.f32 %v1053_v55, %v1052_v54  ;;  %v1357_v55 = vld [vmem:[%s2860_s18 + $0x20] sm:$0xff] }
 0x9d6   :  { %v1055_v57 = vmul.f32 0.0625, %v1054_v56  ;;  %v1358_v56 = vld [vmem:[%s2860_s18 + $0x28] sm:$0xff] }
 0x9d8   :  { %v1056_v58 = vsub.f32 %v1038_v49, %v1055_v57  ;;  %v1057_v59 = vsub.f32 %v1043_v47, %v1055_v57  ;;  %v1274_v47 = vld [vmem:[%s2858_s16 + $0x70] sm:$0xff]  ;;  %v2161_v57 = vpack.c.bf16 %v1358_v56, %v1357_v55 }
 0x9d9   :  { %v2152_v49 = vpack.c.bf16 %v1275_v48, %v1274_v47 }
 0x9da   :  { %v1058_v60 = vmul.f32 %v1056_v58, %v1056_v58  ;;  %v1059_v61 = vmul.f32 %v1057_v59, %v1057_v59 }
 0x9dc   :  { %v1060_v62 = vadd.f32 %v1059_v61, %v1058_v60  ;;  %v1361_v61 = vld [vmem:[%s2860_s18 + $0x40] sm:$0xff] }
 0x9de   :  { %v1061_v63 = vrot.slane %v1060_v62, 4 }
 0x9e0   :  { %v1062_v0 = vadd.f32 %v1061_v63, %v1060_v62  ;;  %v1362_v62 = vld [vmem:[%s2860_s18 + $0x48] sm:$0xff] }
 0x9e1   :  { %v2167_v63 = vpack.c.bf16 %v1362_v62, %v1361_v61 }
 0x9e2   :  { %v1063_v1 = vrot.slane %v1062_v0, 2 }
 0x9e4   :  { %v1064_v2 = vadd.f32 %v1063_v1, %v1062_v0  ;;  %v1363_v0 = vld [vmem:[%s2860_s18 + $0x50] sm:$0xff]  ;;  %v1364_v1 = vld [vmem:[%s2860_s18 + $0x58] sm:$0xff] }
 0x9e6   :  { %v1065_v3 = vrot.slane %v1064_v2, 1 }
 0x9e8   :  { %v1066_v4 = vadd.f32 %v1065_v3, %v1064_v2  ;;  %v2170_v2 = vpack.c.bf16 %v1364_v1, %v1363_v0  ;;  %v1365_v3 = vld [vmem:[%s2860_s18 + $0x60] sm:$0xff] }
 0x9ea   :  { %v1067_v5 = vmul.f32 0.0625, %v1066_v4  ;;  %v1366_v4 = vld [vmem:[%s2860_s18 + $0x68] sm:$0xff] }
 0x9ec   :  { %v1068_v6 = vadd.f32 1e-05, %v1067_v5  ;;  %v2173_v5 = vpack.c.bf16 %v1366_v4, %v1365_v3 }
 0x9ee   :  { %2196 = vrsqrt.f32 %v1068_v6  ;;  %v1521_v6 = vld [vmem:[%s2857_s15] ss:$0 sm:$0xff] }
 0x9f8   :  { %v2197_v7 = vpop.eup %2196 }
 0x9f9   :  { %v1070_v10 = vmul.f32 %v2197_v7, %v1056_v58  ;;  %v1071_v11 = vmul.f32 %v2197_v7, %v1057_v59  ;;  %v1359_v58 = vld [vmem:[%s2860_s18 + $0x30] sm:$0xff]  ;;  %v1360_v59 = vld [vmem:[%s2860_s18 + $0x38] sm:$0xff] }
 0x9fa   :  { %v2164_v60 = vpack.c.bf16 %v1360_v59, %v1359_v58 }
 0x9fb   :  { %v1078_v13 = vmul.f32 %v1518_v8, %v1070_v10  ;;  %v1079_v14 = vmul.f32 %v1518_v8, %v1071_v11 }
 0x9fd   :  { %v1086_v15 = vadd.f32 %v1519_v12, %v1078_v13  ;;  %v1087_v16 = vadd.f32 %v1519_v12, %v1079_v14  ;;  %v1367_v12 = vld [vmem:[%s2860_s18 + $0x70] sm:$0xff]  ;;  %v1368_v13 = vld [vmem:[%s2860_s18 + $0x78] sm:$0xff] }
 0x9fe   :  { %v2176_v14 = vpack.c.bf16 %v1368_v13, %v1367_v12 }
 0x9ff   :  { %v1088_v17 = vmax.f32 %v1086_v15, 0.0  ;;  %v1089_v18 = vmax.f32 %v1087_v16, 0.0 }
 0xa01   :  { %v1090_v19 = vadd.f32 %v1088_v17, %v2601_v40  ;;  %v1091_v20 = vadd.f32 %v1089_v18, %v2604_v32  ;;  %v1261_v40 = vld [vmem:[%s2858_s16 + $0x8] sm:$0xff]  ;;  %v1262_v32 = vld [vmem:[%s2858_s16 + $0x10] sm:$0xff]  ;;  %v1523_v18 = vld [vmem:[%s2861_s19] ss:$0 sm:$0xff] }
 0xa02   :  { %v2131_v24 = vpack.c.bf16 %v1261_v40, %v1260_v23  ;;  %v2134_v28 = vpack.c.bf16 %v1263_v27, %v1262_v32 }
 0xa03   :  { %v2104_v21 = vpack.c.bf16 %v1091_v20, %v1090_v19 }
 0xa05   :  { %2105 = vmatpush3.bf16.msra.mxu0 %v2104_v21 }
 0xa06   :  { %2130 = vmatprep.subr.bf16.mxu0 %v2222_v33 }
 0xa08   :  { %1849 = vmatmul.mubr.msk.f32.vlgmr.msra.gmra.mrb[14].mxu0 %vm170_vm0, %v1092_v22 }
 0xa09   :  { %1918 = vmatprep.mubr.msk.f32.mxu0 %vm2223_vm1, %v2224_v41  ;;  %2132 = vmatpush3.bf16.msra.mxu0 %v2131_v24 }
 0xa0a   :  { %2133 = vmatprep.subr.bf16.mxu0 %v2222_v33 }
 0xa0d   :  { %2135 = vmatpush3.bf16.msra.mxu0 %v2134_v28 }
 0xa0e   :  { %2136 = vmatprep.subr.bf16.mxu0 %v2222_v33 }
 0xa11   :  { %2138 = vmatpush3.bf16.msra.mxu0 %v2137_v34 }
 0xa12   :  { %2139 = vmatprep.subr.bf16.mxu0 %v2222_v33 }
 0xa15   :  { %2141 = vmatpush3.bf16.msra.mxu0 %v2140_v9 }
 0xa16   :  { %2142 = vmatprep.subr.bf16.mxu0 %v2222_v33 }
 0xa19   :  { %2144 = vmatpush3.bf16.msra.mxu0 %v2143_v25 }
 0xa1a   :  { %2145 = vmatprep.subr.bf16.mxu0 %v2222_v33 }
 0xa1d   :  { %2147 = vmatpush3.bf16.msra.mxu0 %v2146_v42 }
 0xa1e   :  { %2148 = vmatprep.subr.bf16.mxu0 %v2222_v33 }
 0xa21   :  { %2150 = vmatpush3.bf16.msra.mxu0 %v2149_v44 }
 0xa22   :  { %2151 = vmatprep.subr.bf16.mxu0 %v2222_v33 }
 0xa25   :  { %2153 = vmatpush3.bf16.msra.mxu0 %v2152_v49 }
 0xadb   :  { %v1162_v45 = vpop.f32.mrb[14].mxu0 }
 0xadc   :  { %v1850_v46 = vpop.f32.mrb[15].mxu0  ;;  %1884 = vmatmul.mubr.f32.vlgmr.msra.gmra.mrb[4].mxu1 %v1162_v45 }
 0xadd   :  { %1953 = vmatprep.mubr.msk.f32.mxu1 %vm2223_vm1, %v2224_v41  ;;  %v1355_v41 = vld [vmem:[%s2860_s18 + $0x10] sm:$0xff]  ;;  %2156 = vmatpush3.bf16.msra.mxu1 %v2155_v52  ;;  %s2198_s18 = scalar_lea.vmem %s1454_s11, 32 }
 0xade   :  { %v2158_v54 = vpack.c.bf16 %v1356_v53, %v1355_v41  ;;  %2157 = vmatprep.subr.bf16.mxu1 %v2222_v33  ;;  %p2199_p0 = scmp.ne.s32.totalorder %s1454_s11, %s2198_s18  ;;  %p2204_p2 = scmp.lt.s32.totalorder %s2198_s18, %s2198_s18 }
 0xae0   :  { %p2205_p3 = por %p2204_p2, %p2203_p1 }
 0xae1   :  { %2159 = vmatpush3.bf16.msra.mxu1 %v2158_v54 }
 0xae2   :  { %2160 = vmatprep.subr.bf16.mxu1 %v2222_v33  ;;  %p2206_p4 = pnand %p2205_p3, %p2199_p0 }
 0xae5   :  { %2162 = vmatpush3.bf16.msra.mxu1 %v2161_v57 }
 0xae6   :  { %2163 = vmatprep.subr.bf16.mxu1 %v2222_v33 }
 0xae9   :  { %2165 = vmatpush3.bf16.msra.mxu1 %v2164_v60 }
 0xaea   :  { %2166 = vmatprep.subr.bf16.mxu1 %v2222_v33 }
 0xaed   :  { %2168 = vmatpush3.bf16.msra.mxu1 %v2167_v63 }
 0xaee   :  { %2169 = vmatprep.subr.bf16.mxu1 %v2222_v33 }
 0xaf1   :  { %2171 = vmatpush3.bf16.msra.mxu1 %v2170_v2 }
 0xaf2   :  { %2172 = vmatprep.subr.bf16.mxu1 %v2222_v33 }
 0xaf5   :  { %2174 = vmatpush3.bf16.msra.mxu1 %v2173_v5 }
 0xaf6   :  { %2175 = vmatprep.subr.bf16.mxu1 %v2222_v33  ;;  %v1522_v33 = vld [vmem:[%s2859_s17] ss:$0 sm:$0xff] }
 0xaf9   :  { %2177 = vmatpush3.bf16.msra.mxu1 %v2176_v14 }
 0xbaf   :  { %v1255_v7 = vpop.f32.mrb[4].mxu1 }
 0xbb0   :  { %v1256_v8 = vadd.f32 %v1521_v6, %v1255_v7  ;;  %v1885_v10 = vpop.f32.mrb[5].mxu1 }
 0xbb2   :  { %v1259_v11 = vmax.f32 %v1256_v8, 0.0 }
 0xbb4   :  { %1919 = vmatmul.mubr.f32.vlgmr.msra.gmra.mrb[16].mxu0 %v1259_v11 }
 0xc87   :  { %v1349_v15 = vpop.f32.mrb[16].mxu0 }
 0xc88   :  { %v1350_v16 = vadd.f32 %v1522_v33, %v1349_v15  ;;  %v1920_v17 = vpop.f32.mrb[17].mxu0 }
 0xc8a   :  { %1954 = vmatmul.mubr.f32.vlgmr.msra.gmra.mrb[6].mxu1 %v1350_v16 }
 0xd5d   :  { %v1442_v19 = vpop.f32.mrb[6].mxu1 }
 0xd5e   :  { %v1443_v20 = vadd.f32 %v1523_v18, %v1442_v19  ;;  %v1955_v21 = vpop.f32.mrb[7].mxu1 }
 0xd60   :  { %1446 = vst [vmem:[#allocation2] sm:$0x3] %v1443_v20 }
 0xd61   :  { %2209 = shalt.err (!%p2206_p4)
}
 0xd62   :  { %s2210_s7 = scalar_lea.hbm %s2862_s20, 32 }
 0xd63   :  { %p2211_p5 = scmp.ne.s32.totalorder %s2862_s20, %s2210_s7  ;;  %p2214_p6 = scmp.lt.u32.totalorder %s2210_s7, %s2862_s20 }
 0xd65   :  { %p2216_p7 = pnand %p2214_p6, %p2211_p5 }
 0xd67   :  { %2219 = shalt.err (!%p2216_p7)
}
 0xd68   :  { %1456 = dma.vmem_to_hbm [thread:$0]  %s1454_s11, 32, %s2862_s20, [#allocation3]  }
 0xd69   :  { %2220 = dma.done.wait [#allocation3], 32  }
 0xd6a   :  { %2221 = vsyncadd [#allocation3], 4294967264 }
 0xd6b   :  { %1460 = vsyncpa [#allocation3], 1 }

// kernel: forward.3
= control target key start
LH: loop header
LB: loop body
LE: loop exit
PB: predicated region body
PF: predicated region fallthrough
CT: control target
= control target key end

     0   :  { %s4118_s0 = inlined_call_operand.vmem [shape: f32[2,8,128], index: 0, kind: input, shape index: {}]   ;;  %s4119_s1 = inlined_call_operand.vmem [shape: f32[2,1,8], index: 1, kind: input, shape index: {}]   ;;  %s4120_s2 = inlined_call_operand.vmem [shape: f32[1,128], index: 2, kind: input, shape index: {}]   ;;  %s4121_s3 = inlined_call_operand.hbm [shape: f32[2,128,384], index: 3, kind: input, shape index: {}]   ;;  %s4122_s4 = inlined_call_operand.vmem [shape: f32[2,1,384], index: 4, kind: input, shape index: {}]   ;;  %s4123_s5 = inlined_call_operand.vmem [shape: f32[2,128,128], index: 5, kind: input, shape index: {}]   ;;  %s4124_s6 = inlined_call_operand.vmem [shape: f32[2,1,128], index: 6, kind: input, shape index: {}]   ;;  %s4125_s7 = inlined_call_operand.vmem [shape: f32[2,1,128], index: 7, kind: input, shape index: {}]   ;;  %s4126_s8 = inlined_call_operand.vmem [shape: f32[2,1,128], index: 8, kind: input, shape index: {}]   ;;  %s4127_s9 = inlined_call_operand.hbm [shape: f32[2,128,128], index: 9, kind: input, shape index: {}]   ;;  %s4128_s10 = inlined_call_operand.vmem [shape: f32[2,1,128], index: 10, kind: input, shape index: {}]   ;;  %s4129_s11 = inlined_call_operand.hbm [shape: f32[2,128,128], index: 11, kind: input, shape index: {}]   ;;  %s4130_s12 = inlined_call_operand.vmem [shape: f32[2,1,128], index: 12, kind: input, shape index: {}]   ;;  %s4131_s13 = inlined_call_operand.vmem [shape: f32[2,1,128], index: 13, kind: input, shape index: {}]   ;;  %s4132_s14 = inlined_call_operand.vmem [shape: f32[2,1,128], index: 14, kind: input, shape index: {}]   ;;  %s4133_s15 = inlined_call_operand.vmem [shape: f32[128,128], index: 15, kind: input, shape index: {}]   ;;  %s4134_s16 = inlined_call_operand.vmem [shape: f32[1,128], index: 16, kind: input, shape index: {}]   ;;  %s4135_s17 = inlined_call_operand.vmem [shape: f32[1,128], index: 17, kind: input, shape index: {}]   ;;  %s4136_s18 = inlined_call_operand.vmem [shape: f32[1,128], index: 18, kind: input, shape index: {}]   ;;  %s4137_s19 = inlined_call_operand.vmem [shape: f32[1,128], index: 19, kind: input, shape index: {}]   ;;  %s4138_s20 = inlined_call_operand.hbm [shape: f32[2,1,128], index: 20, kind: output, shape index: {}]  }
   0x1   :  { %4156 = sst [smem:[#allocation20_spill]] %s4118_s0 }
   0x2   :  { %4157 = sst [smem:[#allocation21_spill]] %s4119_s1 }
   0x3   :  { %4158 = sst [smem:[#allocation22_spill]] %s4120_s2 }
   0x4   :  { %4159 = sst [smem:[#allocation23_spill]] %s4121_s3 }
   0x5   :  { %4160 = sst [smem:[#allocation24_spill]] %s4122_s4 }
   0x6   :  { %4161 = sst [smem:[#allocation25_spill]] %s4127_s9 }
   0x7   :  { %4162 = sst [smem:[#allocation26_spill]] %s4135_s17 }
   0x8   :  { %4163 = sst [smem:[#allocation27_spill]] %s4136_s18 }
   0x9   :  { %4164 = sst [smem:[#allocation28_spill]] %s4138_s20 }
   0xa   :  { %25 = vsyncpa [#allocation3], 0 }
   0xb   :  { %26 = vsyncpa [#allocation6], 0 }
   0xc   :  { %27 = vsyncpa [#allocation4], 0 }
   0xd   :  { %29 = vsyncpa [#allocation4 + $0x1], 0  ;;  %s3550_s1 = smov 0   ;;  %s3552_s22 = smov 0  }
   0xe   :  { %s3554_s23 = smov 0   ;;  %s3556_s24 = smov 0  }
   0xf LB: > { %4165 = sst [smem:[#allocation12_spill]] %s3420_s1  ;;  %s3571_s2 = sadd.s32 4294967295, %s3432_s24   ;;  %s3432_s24 = sphi %s3556_s24, %s4201_s24   ;;  %s3428_s23 = sphi %s3554_s23, %s4204_s23   ;;  %s3424_s22 = sphi %s3552_s22, %s4203_s22   ;;  %s3420_s1 = sphi %s3550_s1, %s4202_s1  }
  0x10   : > { %4166 = sst [smem:[#allocation13_spill]] %s3424_s22  ;;  %s2347_s25 = sadd.s32 4294967294, %s3432_s24  }
  0x11   : > { %4167 = sst [smem:[#allocation14_spill]] %s3428_s23  ;;  %s3575_s3 = sadd.s32 1, %s3432_s24  }
  0x12   : > { %4168 = sst [smem:[#allocation15_spill]] %s3432_s24  ;;  %s472_s26 = sadd.s32 1, %s3428_s23 }
  0x13   : > { %4169 = sst [smem:[#allocation16_spill]] %s3575_s3  ;;  %s469_s27 = ssub.s32 %s3432_s24, %s3575_s3 }
  0x14   : > { %p482_p0 = scmp.ne.s32.totalorder %s3428_s23, %s3424_s22  ;;  %p470_p1 = scmp.eq.s32.totalorder %s469_s27, 0 }
  0x15   : > { %p483_p2 = scmp.eq.s32.totalorder %s3571_s2, 1  ;;  %p488_p3 = scmp.ne.s32.totalorder %s3424_s22, %s3420_s1 }
  0x16   : > { %p489_p4 = scmp.eq.s32.totalorder %s2347_s25, 1  ;;  %p2348_p7 = scmp.ge.s32.totalorder %s3432_s24, 1 }
  0x17   : > { %s3586_s28 = scalar_select %p470_p1, %s3428_s23, %s472_s26  }
  0x18   : > { %p3588_p5 = por %p483_p2, %p482_p0  ;;  %p3592_p6 = por %p489_p4, %p488_p3 }
  0x19   : > { %4170 = sst [smem:[#allocation17_spill]] %s3586_s28  ;;  %p496_p8 = scmp.lt.s32.totalorder %s3432_s24, 3 }
  0x1a   : > { %s4171_s4 = scalar_select %p3588_p5, 1, 0 }
  0x1b   : > { %s4173_s29 = scalar_select %p3592_p6, 1, 0 }
  0x1c   : > { %4172 = sst [smem:[#allocation18_spill]] %s4171_s4  ;;  %p4147_p9 = scmp.eq.s32.totalorder %s3571_s2, 0 }
  0x1d   : > { %4174 = sst [smem:[#allocation19_spill]] %s4173_s29  ;;  %p3599_p10 = pnand %p2348_p7, %p496_p8 }
  0x1e   : > { %s3434_s0 = smov [#allocation5]   ;;  %s3435_s26 = smov [#allocation2]  }
  0x1f   : > { %s4175_s30 = scalar_select %p3599_p10, 1, 0 }
  0x20   : > { %s539_s21 = sshll.u32 %s3434_s0, 4  ;;  %p3193_p11 = pneg %p3599_p10  ;;  %s540_s21 = int_to_ptr.vmem [resolvable:$true] %s539_s21 }
  0x21   : > { %s511_s27 = sshll.u32 %s3435_s26, 4  ;;  %s4177_s9 = sld [smem:[#allocation25_spill]]  ;;  %s3611_s27 = int_to_ptr.vmem [resolvable:$true] %s511_s27 }
  0x22   : > { %p3607_p12 = pnand %p4147_p9, %p3193_p11 }
  0x24   : > { %p3621_p0 = pneg %p3607_p12 }
  0x27   : > { %s3278_s3 = scalar_lea.hbm %s4177_s9, 4096 }
  0x28   : > { %p3279_p13 = scmp.ne.s32.totalorder %s4177_s9, %s3278_s3  ;;  %p3285_p3 = scmp.lt.u32.totalorder %s3278_s3, %s4177_s9 }
  0x2a   : > { %p3281_p1 = pnand %p3621_p0, %p3279_p13 }
  0x2c   : > { %p3282_p2 = pneg %p3281_p1 }
  0x2e   : > { %p3287_p4 = pnand %p3285_p3, %p3282_p2 }
  0x30   : > { %3290 = shalt.err (!%p3287_p4)
}
  0x31   : > { %s3291_s23 = scalar_lea.vmem %s540_s21, 4096  ;;  %p3299_p9 = scmp.lt.s32.totalorder %s540_s21, %s540_s21 }
  0x32   : > { %p3292_p7 = scmp.ne.s32.totalorder %s540_s21, %s3291_s23  ;;  %p3300_p6 = scmp.lt.s32.totalorder %s3291_s23, %s3291_s23 }
  0x34   : > { %p3294_p8 = pnand %p3292_p7, %p3621_p0  ;;  %p3301_p5 = por %p3300_p6, %p3299_p9 }
  0x36   : > { %p3295_p11 = pneg %p3294_p8 }
  0x38   : > { %p3302_p10 = pnand %p3301_p5, %p3295_p11 }
  0x3a   : > { %3305 = shalt.err (!%p3302_p10)
}
  0x3b   : > { %s4154_s1 = smov 128   ;;  %s4155_s28 = smov 8  }
  0x3c   : > { %3199 = dma.hbm_to_vmem [thread:$0]  (!%p3607_p12), %s4177_s9, 4096, %s540_s21, [#allocation6], %s4154_s1, %s4154_s1, %s4155_s28  }
  0x3d   : > { %s4179_s20 = sld [smem:[#allocation23_spill]] }
  0x43   : > { %s3306_s18 = scalar_lea.hbm %s4179_s20, 12288 }
  0x44   : > { %p3307_p5 = scmp.ne.s32.totalorder %s4179_s20, %s3306_s18  ;;  %p3313_p10 = scmp.lt.u32.totalorder %s3306_s18, %s4179_s20 }
  0x46   : > { %p3309_p6 = pnand %p3307_p5, %p3621_p0 }
  0x48   : > { %p3310_p9 = pneg %p3309_p6 }
  0x4a   : > { %p3315_p13 = pnand %p3313_p10, %p3310_p9 }
  0x4c   : > { %3318 = shalt.err (!%p3315_p13)
}
  0x4d   : > { %s3319_s21 = scalar_lea.vmem %s3611_s27, 12288  ;;  %p3327_p4 = scmp.lt.s32.totalorder %s3611_s27, %s3611_s27 }
  0x4e   : > { %p3320_p1 = scmp.ne.s32.totalorder %s3611_s27, %s3319_s21  ;;  %p3328_p7 = scmp.lt.s32.totalorder %s3319_s21, %s3319_s21 }
  0x50   : > { %p3322_p2 = pnand %p3320_p1, %p3621_p0  ;;  %p3329_p8 = por %p3328_p7, %p3327_p4 }
  0x52   : > { %p3323_p3 = pneg %p3322_p2 }
  0x54   : > { %p3330_p11 = pnand %p3329_p8, %p3323_p3 }
  0x56   : > { %3333 = shalt.err (!%p3330_p11)
}
  0x57   : > { %s3438_s17 = smov 384   ;;  %s3439_s18 = smov 24  }
  0x58   : > { %3196 = dma.hbm_to_vmem [thread:$0]  (!%p3607_p12), %s4179_s20, 12288, %s3611_s27, [#allocation3], %s3438_s17, %s3438_s17, %s3439_s18  }
  0x59   : > { %s3440_s24 = smov [#allocation7]   ;;  %s3334_s23 = scalar_lea.hbm %s4129_s11, 4096 }
  0x5a   : > { %s555_s3 = sshll.u32 %s3440_s24, 4  ;;  %p3335_p5 = scmp.ne.s32.totalorder %s4129_s11, %s3334_s23  ;;  %s556_s3 = int_to_ptr.vmem [resolvable:$true] %s555_s3 }
  0x5b   : > { %p3341_p10 = scmp.lt.u32.totalorder %s3334_s23, %s4129_s11 }
  0x5c   : > { %p3337_p6 = pnand %p3335_p5, %p3621_p0 }
  0x5e   : > { %p3338_p9 = pneg %p3337_p6 }
  0x60   : > { %p3343_p13 = pnand %p3341_p10, %p3338_p9 }
  0x62   : > { %3346 = shalt.err (!%p3343_p13)
}
  0x63   : > { %s3347_s27 = scalar_lea.vmem %s556_s3, 4096  ;;  %p3355_p4 = scmp.lt.s32.totalorder %s556_s3, %s556_s3 }
  0x64   : > { %p3348_p1 = scmp.ne.s32.totalorder %s556_s3, %s3347_s27  ;;  %p3356_p7 = scmp.lt.s32.totalorder %s3347_s27, %s3347_s27 }
  0x66   : > { %p3350_p2 = pnand %p3348_p1, %p3621_p0  ;;  %p3357_p8 = por %p3356_p7, %p3355_p4 }
  0x68   : > { %p3351_p3 = pneg %p3350_p2 }
  0x6a   : > { %p3358_p11 = pnand %p3357_p8, %p3351_p3 }
  0x6c   : > { %3361 = shalt.err (!%p3358_p11)
}
  0x6d   : > { %s4180_s1 = smov 8   ;;  %s4181_s17 = smov 128  }
  0x6e   : > { %3202 = dma.hbm_to_vmem [thread:$0]  (!%p3607_p12), %s4129_s11, 4096, %s556_s3, [#allocation6], %s4181_s17, %s4181_s17, %s4180_s1  }
  0x6f   : > { %p4182_p5 = scmp.ne.s32.totalorder %s4175_s30, 0 }
  0x70   : > { %p4183_p0 = scmp.eq.s32.totalorder (!%p4182_p5), %s3571_s2, 0 }
  0x71   : > { %608 = sbr.rel (%p4182_p5) target bundleno = 5230 (0x146e), region = 100 }
  0x78   : > { %3407 = dma.done.wait (%p4183_p0), [#allocation3], 12288   ;;  %p4184_p6 = pmov %p4183_p0 }
  0x79   : > { %p4185_p9 = pmov %p4183_p0 }
  0x7a   : > { %3409 = vsyncadd (%p4184_p6), [#allocation3], 4294955008 }
  0x7b   : > { %3411 = dma.done.wait (%p4185_p9), [#allocation6], 8192   ;;  %p4186_p10 = pmov %p4183_p0 }
  0x7c   : > { %v3441_v0 = vmov 0.0   ;;  %v3442_v1 = vmov 0.0|0.0   ;;  %v686_v2 = vld [vmem:[#allocation2 + $0x8] sm:$0xff]  ;;  %v689_v3 = vld [vmem:[#allocation2 + $0x20] sm:$0xff]  ;;  %v688_v6 = vld [vmem:[#allocation2 + $0x18] sm:$0xff]  ;;  %p675_p12 = scmp.lt.s32.totalorder %s3571_s2, 1 }
  0x7d   : > { %3413 = vsyncadd (%p4186_p10), [#allocation6], 4294959104  ;;  %814 = vmatprep.mubr.f32.mxu0 %v3441_v0  ;;  %2931 = vmatprep.subr.bf16.mxu1 %v3442_v1  ;;  %v685_v4 = vld [vmem:[#allocation2] sm:$0xff]  ;;  %v2899_v5 = vpack.c.bf16 %v689_v3, %v686_v2  ;;  %v692_v7 = vld [vmem:[#allocation2 + $0x38] sm:$0xff]  ;;  %s4187_s22 = sld [smem:[#allocation20_spill]]  ;;  %vm3443_vm0 = vmmov 0  }
  0x7e   : > { %v695_v8 = vld [vmem:[#allocation2 + $0x50] sm:$0xff]  ;;  %v2901_v9 = vpack.c.bf16 %v688_v6, %v685_v4  ;;  %v694_v12 = vld [vmem:[#allocation2 + $0x48] sm:$0xff]  ;;  %v701_v14 = vld [vmem:[#allocation2 + $0x80] sm:$0xff]  ;;  %s3702_s30 = scalar_select %p675_p12, %s3571_s2, 1  ;;  %2596 = vmatprep.mubr.msk.f32.mxu1 %vm3443_vm0, %v3441_v0  ;;  %vm969_vm1 = vcmask 64512   ;;  %vm2221_vm2 = vcmask 1040384  }
  0x7f   : > { %v2903_v10 = vpack.c.bf16 %v695_v8, %v692_v7  ;;  %v691_v11 = vld [vmem:[#allocation2 + $0x30] sm:$0xff]  ;;  %v698_v13 = vld [vmem:[#allocation2 + $0x68] sm:$0xff]  ;;  %2900 = vmatprep.subr.bf16.mxu0 %v2899_v5  ;;  %v697_v17 = vld [vmem:[#allocation2 + $0x60] sm:$0xff]  ;;  %s4188_s29 = sld [smem:[#allocation24_spill]]  ;;  %s4189_s21 = sld [smem:[#allocation21_spill]] }
  0x80   : > { %2902 = vmatpush1.bf16.msra.mxu0 %v2901_v9  ;;  %v2905_v15 = vpack.c.bf16 %v694_v12, %v691_v11  ;;  %v2907_v16 = vpack.c.bf16 %v701_v14, %v698_v13  ;;  %v700_v18 = vld [vmem:[#allocation2 + $0x78] sm:$0xff]  ;;  %v707_v20 = vld [vmem:[#allocation2 + $0xb0] sm:$0xff]  ;;  %v706_v24 = vld [vmem:[#allocation2 + $0xa8] sm:$0xff]  ;;  %s2357_s25 = sshll.u32 %s3702_s30, 3  ;;  %v735_v13 = vlaneseq  ;;  %s4192_s18 = sld [smem:[#allocation18_spill]] }
  0x81   : > { %2904 = vmatprep.subr.bf16.mxu0 %v2903_v10  ;;  %v704_v19 = vld [vmem:[#allocation2 + $0x98] sm:$0xff]  ;;  %v2909_v21 = vpack.c.bf16 %v700_v18, %v697_v17  ;;  %v703_v23 = vld [vmem:[#allocation2 + $0x90] sm:$0xff]  ;;  %v710_v25 = vld [vmem:[#allocation2 + $0xc8] sm:$0xff]  ;;  %s4193_s24 = sld [smem:[#allocation26_spill]]  ;;  %s4194_s23 = sld [smem:[#allocation27_spill]] }
  0x82   : > { %v2911_v22 = vpack.c.bf16 %v707_v20, %v704_v19  ;;  %v713_v26 = vld [vmem:[#allocation2 + $0xe0] sm:$0xff]  ;;  %v687_v27 = vld [vmem:[#allocation2 + $0x10] sm:$0xff]  ;;  %v690_v28 = vld [vmem:[#allocation2 + $0x28] sm:$0xff]  ;;  %v2913_v30 = vpack.c.bf16 %v706_v24, %v703_v23  ;;  %v3725_v14 = vshrl.u32 %v735_v13, 7  ;;  %s4195_s28 = sld [smem:[#allocation28_spill]] }
  0x83   : > { %v693_v29 = vld [vmem:[#allocation2 + $0x40] sm:$0xff]  ;;  %v2932_v31 = vpack.c.bf16 %v690_v28, %v687_v27  ;;  %v696_v32 = vld [vmem:[#allocation2 + $0x58] sm:$0xff]  ;;  %v2915_v33 = vpack.c.bf16 %v713_v26, %v710_v25  ;;  %v719_v37 = vld [vmem:[#allocation2 + $0x110] sm:$0xff]  ;;  %s678_s4 = scalar_lea.vmem %s4187_s22, %s2357_s25  ;;  %s4191_s25 = sld [smem:[#allocation13_spill]] }
  0x84   : > { %2906 = vmatpush1.bf16.msra.mxu0 %v2905_v15  ;;  %v709_v34 = vld [vmem:[#allocation2 + $0xc0] sm:$0xff]  ;;  %v712_v35 = vld [vmem:[#allocation2 + $0xd8] sm:$0xff]  ;;  %v2935_v38 = vpack.c.bf16 %v696_v32, %v693_v29  ;;  %v699_v39 = vld [vmem:[#allocation2 + $0x70] sm:$0xff]  ;;  %v741_v15 = vsub.s32 1, %v3725_v14  ;;  %v737_v17 = vsub.s32 0, %v3725_v14  ;;  %v745_v24 = vsub.s32 2, %v3725_v14 }
  0x85   : > { %2908 = vmatprep.subr.bf16.mxu0 %v2907_v16  ;;  %v716_v36 = vld [vmem:[#allocation2 + $0xf8] sm:$0xff]  ;;  %2933 = vmatpush3.bf16.msra.mxu1 %v2932_v31  ;;  %v702_v40 = vld [vmem:[#allocation2 + $0x88] sm:$0xff]  ;;  %v2917_v41 = vpack.c.bf16 %v712_v35, %v709_v34  ;;  %v715_v43 = vld [vmem:[#allocation2 + $0xf0] sm:$0xff]  ;;  %s681_s27 = scalar_lea.vmem %s4189_s21, %s3702_s30  ;;  %s4190_s30 = sld [smem:[#allocation22_spill]] }
  0x86   : > { %2934 = vmatprep.subr.bf16.mxu1 %v3442_v1  ;;  %v2919_v42 = vpack.c.bf16 %v719_v37, %v716_v36  ;;  %v718_v44 = vld [vmem:[#allocation2 + $0x108] sm:$0xff]  ;;  %v725_v46 = vld [vmem:[#allocation2 + $0x140] sm:$0xff]  ;;  %v2938_v47 = vpack.c.bf16 %v702_v40, %v699_v39  ;;  %v708_v49 = vld [vmem:[#allocation2 + $0xb8] sm:$0xff]  ;;  %s2400_s21 = sshll.u32 %s3571_s2, 4  ;;  %p4196_p1 = scmp.ne.s32.totalorder %s4192_s18, 0 }
  0x87   : > { %v722_v45 = vld [vmem:[#allocation2 + $0x128] sm:$0xff]  ;;  %v705_v48 = vld [vmem:[#allocation2 + $0xa0] sm:$0xff]  ;;  %v2921_v50 = vpack.c.bf16 %v718_v44, %v715_v43  ;;  %v724_v53 = vld [vmem:[#allocation2 + $0x138] sm:$0xff]  ;;  %s3444_s2 = smov [#allocation8]  }
  0x88   : > { %2910 = vmatpush1.bf16.msra.mxu0 %v2909_v21  ;;  %v2923_v51 = vpack.c.bf16 %v725_v46, %v722_v45  ;;  %v721_v52 = vld [vmem:[#allocation2 + $0x120] sm:$0xff]  ;;  %v728_v54 = vld [vmem:[#allocation2 + $0x158] sm:$0xff]  ;;  %v731_v55 = vld [vmem:[#allocation2 + $0x170] sm:$0xff]  ;;  %v2941_v56 = vpack.c.bf16 %v708_v49, %v705_v48 }
  0x89   : > { %2912 = vmatprep.subr.bf16.mxu0 %v2911_v22  ;;  %2936 = vmatpush3.bf16.msra.mxu1 %v2935_v38  ;;  %v711_v57 = vld [vmem:[#allocation2 + $0xd0] sm:$0xff]  ;;  %v714_v58 = vld [vmem:[#allocation2 + $0xe8] sm:$0xff]  ;;  %v2925_v59 = vpack.c.bf16 %v724_v53, %v721_v52  ;;  %v2927_v60 = vpack.c.bf16 %v731_v55, %v728_v54  ;;  %v717_v2 = vld [vmem:[#allocation2 + $0x100] sm:$0xff]  ;;  %s673_s0 = sand.u32 1, %s4191_s25  }
  0x8a   : > { %2937 = vmatprep.subr.bf16.mxu1 %v3442_v1  ;;  %v727_v61 = vld [vmem:[#allocation2 + $0x150] sm:$0xff]  ;;  %v730_v62 = vld [vmem:[#allocation2 + $0x168] sm:$0xff]  ;;  %v2944_v63 = vpack.c.bf16 %v714_v58, %v711_v57  ;;  %v720_v3 = vld [vmem:[#allocation2 + $0x118] sm:$0xff]  ;;  %s2240_s25 = scalar_lea.sflag [#allocation4], %s673_s0 }
  0x8b   : > { %v2929_v4 = vpack.c.bf16 %v730_v62, %v727_v61  ;;  %v2947_v5 = vpack.c.bf16 %v720_v3, %v717_v2  ;;  %v723_v6 = vld [vmem:[#allocation2 + $0x130] sm:$0xff]  ;;  %v726_v7 = vld [vmem:[#allocation2 + $0x148] sm:$0xff]  ;;  %v3711_v8 = vld [vmem:[%s678_s4] sm:$0xff]  ;;  %s3366_s4 = sshll.u32 %s3444_s2, 4  ;;  %s3367_s4 = int_to_ptr.vmem [resolvable:$false] %s3366_s4 }
  0x8c   : > { %2914 = vmatpush1.bf16.msra.mxu0 %v2913_v30  ;;  %v2950_v9 = vpack.c.bf16 %v726_v7, %v723_v6  ;;  %v729_v10 = vld [vmem:[#allocation2 + $0x160] sm:$0xff]  ;;  %v732_v11 = vld [vmem:[#allocation2 + $0x178] sm:$0xff]  ;;  %v1060_v49 = vld [vmem:[%s4123_s5 + $0x30] sm:$0xff] }
  0x8d   : > { %2916 = vmatprep.subr.bf16.mxu0 %v2915_v33  ;;  %2939 = vmatpush3.bf16.msra.mxu1 %v2938_v47  ;;  %v2953_v12 = vpack.c.bf16 %v732_v11, %v729_v10  ;;  %v733_v16 = vld [vmem:[%s4188_s29] sm:$0x7]  ;;  %v1057_v44 = vld [vmem:[%s4123_s5 + $0x18] sm:$0xff]  ;;  %v1059_v47 = vld [vmem:[%s4123_s5 + $0x28] sm:$0xff] }
  0x8e   : > { %2940 = vmatprep.subr.bf16.mxu1 %v3442_v1  ;;  %v742_v18 = vrot.slane %v733_v16, %v741_v15  ;;  %v738_v20 = vrot.slane %v733_v16, %v737_v17  ;;  %v746_v25 = vrot.slane %v733_v16, %v745_v24  ;;  %v3747_v30 = vld [vmem:[%s681_s27] ss:$0 sm:$0xff]  ;;  %v1063_v53 = vld [vmem:[%s4123_s5 + $0x48] sm:$0xff]  ;;  %v1064_v55 = vld [vmem:[%s4123_s5 + $0x50] sm:$0xff]  ;;  %s674_s27 = scalar_lea.vmem [#allocation8], %s673_s0 }
  0x8f   : > { %v1054_v40 = vld [vmem:[%s4123_s5] sm:$0xff]  ;;  %v1068_v61 = vld [vmem:[%s4123_s5 + $0x70] sm:$0xff]  ;;  %v1069_v62 = vld [vmem:[%s4123_s5 + $0x78] sm:$0xff]  ;;  %s2252_s1 = sshll.u32 %s674_s27, 4  ;;  %s4078_s1 = int_to_ptr.vmem [resolvable:$true] %s2252_s1 }
  0x90   : > { %2918 = vmatpush1.bf16.msra.mxu0 %v2917_v41  ;;  %v1055_v41 = vld [vmem:[%s4123_s5 + $0x8] sm:$0xff]  ;;  %v1058_v46 = vld [vmem:[%s4123_s5 + $0x20] sm:$0xff]  ;;  %s3362_s22 = scalar_lea.vmem %s4078_s1, 16  ;;  %p3369_p4 = scmp.lt.s32.totalorder %s4078_s1, %s3367_s4 }
  0x91   : > { %2920 = vmatprep.subr.bf16.mxu0 %v2919_v42  ;;  %2942 = vmatpush3.bf16.msra.mxu1 %v2941_v56  ;;  %v1056_v42 = vld [vmem:[%s4123_s5 + $0x10] sm:$0xff]  ;;  %v2956_v43 = vpack.c.bf16 %v1055_v41, %v1054_v40  ;;  %v2962_v48 = vpack.c.bf16 %v1059_v47, %v1058_v46  ;;  %v1062_v52 = vld [vmem:[%s4123_s5 + $0x40] sm:$0xff]  ;;  %v1065_v56 = vld [vmem:[%s4123_s5 + $0x58] sm:$0xff]  ;;  %p3363_p13 = scmp.ne.s32.totalorder %s4078_s1, %s3362_s22 }
  0x92   : > { %2943 = vmatprep.subr.bf16.mxu1 %v3442_v1  ;;  %v2959_v45 = vpack.c.bf16 %v1057_v44, %v1056_v42  ;;  %v2968_v54 = vpack.c.bf16 %v1063_v53, %v1062_v52  ;;  %v2971_v57 = vpack.c.bf16 %v1065_v56, %v1064_v55  ;;  %v1066_v58 = vld [vmem:[%s4123_s5 + $0x60] sm:$0xff]  ;;  %v1194_v40 = vld [vmem:[#allocation5 + $0x58] sm:$0xff] }
  0x93   : > { %v2360_v7 = vld [vmem:[%s4124_s6] ss:$0 sm:$0xff]  ;;  %v1198_v46 = vld [vmem:[#allocation5 + $0x78] sm:$0xff]  ;;  %p3364_p2 = pnand %p3363_p13, %p4196_p1 }
  0x94   : > { %2922 = vmatpush1.bf16.msra.mxu0 %v2921_v50  ;;  %v1061_v50 = vld [vmem:[%s4123_s5 + $0x38] sm:$0xff]  ;;  %v1195_v42 = vld [vmem:[#allocation5 + $0x60] sm:$0xff] }
  0x95   : > { %2924 = vmatprep.subr.bf16.mxu0 %v2923_v51  ;;  %2945 = vmatpush3.bf16.msra.mxu1 %v2944_v63  ;;  %v2965_v51 = vpack.c.bf16 %v1061_v50, %v1060_v49  ;;  %v2977_v63 = vpack.c.bf16 %v1069_v62, %v1068_v61  ;;  %v1286_v49 = vld [vmem:[#allocation7 + $0x8] sm:$0xff]  ;;  %v2362_v55 = vld [vmem:[%s4125_s7] ss:$0 sm:$0xff]  ;;  %v1288_v61 = vld [vmem:[#allocation7 + $0x18] sm:$0xff]  ;;  %p3365_p3 = pneg %p3364_p2 }
  0x96   : > { %2946 = vmatprep.subr.bf16.mxu1 %v3442_v1 }
  0x98   : > { %2926 = vmatpush1.bf16.msra.mxu0 %v2925_v59  ;;  %v1067_v59 = vld [vmem:[%s4123_s5 + $0x68] sm:$0xff] }
  0x99   : > { %2928 = vmatprep.subr.bf16.mxu0 %v2927_v60  ;;  %2948 = vmatpush3.bf16.msra.mxu1 %v2947_v5  ;;  %v2974_v60 = vpack.c.bf16 %v1067_v59, %v1066_v58 }
  0x9a   : > { %2949 = vmatprep.subr.bf16.mxu1 %v3442_v1 }
  0x9c   : > { %2930 = vmatpush1.bf16.msra.mxu0 %v2929_v4 }
  0x9d   : > { %2955 = vmatprep.subr.bf16.mxu0 %v3442_v1  ;;  %2951 = vmatpush3.bf16.msra.mxu1 %v2950_v9 }
  0x9e   : > { %2952 = vmatprep.subr.bf16.mxu1 %v3442_v1 }
  0x9f   : > { %815 = vmatmul.mubr.f32.vlgmr.msra.gmra.mrb[0].mxu0 %v3711_v8 }
  0xa0   : > { %2641 = vmatprep.mubr.msk.f32.mxu0 %vm3443_vm0, %v3441_v0  ;;  %2957 = vmatpush3.bf16.msra.mxu0 %v2956_v43  ;;  %v1196_v43 = vld [vmem:[#allocation5 + $0x68] sm:$0xff] }
  0xa1   : > { %2954 = vmatpush3.bf16.msra.mxu1 %v2953_v12  ;;  %2958 = vmatprep.subr.bf16.mxu0 %v3442_v1  ;;  %v3819_v12 = vld [vmem:[%s4190_s30] ss:$0 sm:$0xff]  ;;  %v2998_v44 = vpack.c.bf16 %v1196_v43, %v1195_v42  ;;  %s4076_s30 = scalar_lea.hbm %s4195_s28, %s2400_s21 }
  0xa2   : > { %2599 = vmatprep.subr.mxu1 %v3441_v0 }
  0xa4   : > { %2597 = vmatmul.mubr.f32.vlgmr.msra.gmra.mrb[0].mxu1 %v3711_v8  ;;  %2960 = vmatpush3.bf16.msra.mxu0 %v2959_v45  ;;  %v1197_v45 = vld [vmem:[#allocation5 + $0x70] sm:$0xff] }
  0xa5   : > { %2601 = vmatprep.mubr.msk.f32.mxu1 %vm3443_vm0, %v3441_v0  ;;  %2961 = vmatprep.subr.bf16.mxu0 %v3442_v1  ;;  %v3001_v47 = vpack.c.bf16 %v1198_v46, %v1197_v45  ;;  %v1413_v45 = vld [vmem:[#allocation2 + $0x1a0] sm:$0xff] }
  0xa6   : > { %v1409_v46 = vld [vmem:[#allocation2 + $0x180] sm:$0xff] }
  0xa8   : > { %2963 = vmatpush3.bf16.msra.mxu0 %v2962_v48  ;;  %v1285_v48 = vld [vmem:[#allocation7] sm:$0xff] }
  0xa9   : > { %2964 = vmatprep.subr.bf16.mxu0 %v3442_v1  ;;  %v3004_v50 = vpack.c.bf16 %v1286_v49, %v1285_v48  ;;  %v1412_v48 = vld [vmem:[#allocation2 + $0x198] sm:$0xff]  ;;  %v1411_v49 = vld [vmem:[#allocation2 + $0x190] sm:$0xff] }
  0xac   : > { %2966 = vmatpush3.bf16.msra.mxu0 %v2965_v51 }
  0xad   : > { %2967 = vmatprep.subr.bf16.mxu0 %v3442_v1 }
  0xb0   : > { %2969 = vmatpush3.bf16.msra.mxu0 %v2968_v54 }
  0xb1   : > { %2970 = vmatprep.subr.bf16.mxu0 %v3442_v1 }
  0xb4   : > { %2972 = vmatpush3.bf16.msra.mxu0 %v2971_v57  ;;  %v2363_v57 = vld [vmem:[%s4126_s8] ss:$0 sm:$0xff] }
  0xb5   : > { %2973 = vmatprep.subr.bf16.mxu0 %v3442_v1 }
  0xb8   : > { %2975 = vmatpush3.bf16.msra.mxu0 %v2974_v60  ;;  %v1287_v60 = vld [vmem:[#allocation7 + $0x10] sm:$0xff] }
  0xb9   : > { %2976 = vmatprep.subr.bf16.mxu0 %v3442_v1  ;;  %v3007_v62 = vpack.c.bf16 %v1288_v61, %v1287_v60 }
  0xbc   : > { %2978 = vmatpush3.bf16.msra.mxu0 %v2977_v63  ;;  %v1289_v63 = vld [vmem:[#allocation7 + $0x20] sm:$0xff] }
  0xbd   : > { %3003 = vmatprep.subr.bf16.mxu0 %v3442_v1 }
 0x172   : > { %v816_v19 = vpop.f32.mrb[0].mxu0 }
 0x173   : > { %v818_v21 = vpop.f32.mrb[1].mxu0  ;;  %v817_v23 = vadd.f32 %v816_v19, %v738_v20  ;;  %v1184_v19 = vld [vmem:[#allocation5 + $0x8] sm:$0xff]  ;;  %v1185_v20 = vld [vmem:[#allocation5 + $0x10] sm:$0xff] }
 0x174   : > { %v819_v22 = vadd.f32 %v818_v21, %v742_v18  ;;  %v1183_v18 = vld [vmem:[#allocation5] sm:$0xff] }
 0x175   : > { %v2980_v21 = vpack.c.bf16 %v1184_v19, %v1183_v18  ;;  %v1297_v18 = vld [vmem:[#allocation7 + $0x60] sm:$0xff]  ;;  %v1298_v19 = vld [vmem:[#allocation7 + $0x68] sm:$0xff] }
 0x176   : > { %2600 = vmatpush3.xpose.msra.mxu1 %v819_v22  ;;  %v1186_v22 = vld [vmem:[#allocation5 + $0x18] sm:$0xff] }
 0x177   : > { %2604 = vmatprep.subr.mxu1 %v3441_v0  ;;  %v887_v26 = vpop.f32.mrb[0].mxu1 }
 0x178   : > { %v888_v27 = vadd.f32 %v887_v26, %v746_v25  ;;  %v2598_v28 = vpop.f32.mrb[1].mxu1  ;;  %v1187_v25 = vld [vmem:[#allocation5 + $0x20] sm:$0xff]  ;;  %v1188_v26 = vld [vmem:[#allocation5 + $0x28] sm:$0xff] }
 0x179   : > { %2602 = vmatmul.mubr.f32.vlgmr.msra.gmra.mrb[2].mxu1 %v817_v23  ;;  %v2983_v23 = vpack.c.bf16 %v1186_v22, %v1185_v20  ;;  %v3022_v20 = vpack.c.bf16 %v1298_v19, %v1297_v18  ;;  %v1300_v22 = vld [vmem:[#allocation7 + $0x78] sm:$0xff] }
 0x17a   : > { %2606 = vmatprep.mubr.msk.f32.mxu1 %vm3443_vm0, %v3441_v0  ;;  %2605 = vmatpush3.msra.mxu1 %v888_v27  ;;  %v2986_v27 = vpack.c.bf16 %v1188_v26, %v1187_v25  ;;  %v2364_v25 = vld [vmem:[%s4128_s10] ss:$0 sm:$0xff]  ;;  %v1428_v19 = vld [vmem:[#allocation2 + $0x218] sm:$0xff] }
 0x17b   : > { %2979 = vmatprep.subr.bf16.mxu1 %v3442_v1 }
 0x24c   : > { %v957_v29 = vpop.f32.mrb[2].mxu1 }
 0x24d   : > { %v961_v31 = vmul.f32 0.17677669, %v957_v29  ;;  %v2603_v32 = vpop.f32.mrb[3].mxu1 }
 0x24f   : > { %v968_v33 = vadd.f32 %v3747_v30, %v961_v31 }
 0x251   : > { %v970_v34 = vsel %vm969_vm1, %v968_v33, -inf }
 0x252   : > { %971 = vmax.xlane.f32.xlu0 %v970_v34  ;;  %v1190_v34 = vld [vmem:[#allocation5 + $0x38] sm:$0xff] }
 0x2df   : > { %v972_v35 = vpop.xlane.xlu0 %971 }
 0x2e0   : > { %v973_v36 = vsub.f32 %v968_v33, %v972_v35  ;;  %v1189_v33 = vld [vmem:[#allocation5 + $0x30] sm:$0xff] }
 0x2e1   : > { %v2989_v35 = vpack.c.bf16 %v1190_v34, %v1189_v33 }
 0x2e2   : > { %v974_v37 = vmul.f32 1.442695, %v973_v36  ;;  %v1191_v36 = vld [vmem:[#allocation5 + $0x40] sm:$0xff] }
 0x2e4   : > { %3256 = vpow2.f32 %v974_v37  ;;  %v1192_v37 = vld [vmem:[#allocation5 + $0x48] sm:$0xff] }
 0x2ee   : > { %v3257_v38 = vpop.eup %3256 }
 0x2ef   : > { %v976_v39 = vsel %vm969_vm1, %v3257_v38, 0.0 }
 0x2f0   : > { %977 = vadd.xlane.f32.xlu0 %v976_v39  ;;  %v1193_v39 = vld [vmem:[#allocation5 + $0x50] sm:$0xff] }
 0x2f1   : > { %v2995_v41 = vpack.c.bf16 %v1194_v40, %v1193_v39 }
 0x37d   : > { %v978_v2 = vpop.xlane.xlu0 %977 }
 0x37e   : > { %3258 = vrcp.f32 %v978_v2  ;;  %v1290_v2 = vld [vmem:[#allocation7 + $0x28] sm:$0xff] }
 0x388   : > { %v3259_v3 = vpop.eup %3258 }
 0x389   : > { %v980_v4 = vmul.f32 %v3259_v3, %v3257_v38  ;;  %v2992_v38 = vpack.c.bf16 %v1192_v37, %v1191_v36  ;;  %v3010_v3 = vpack.c.bf16 %v1290_v2, %v1289_v63  ;;  %v1425_v63 = vld [vmem:[#allocation2 + $0x200] sm:$0xff] }
 0x38a   : > { %v1421_v2 = vld [vmem:[#allocation2 + $0x1e0] sm:$0xff] }
 0x38b   : > { %2607 = vmatmul.mubr.msk.f32.vlgmr.msra.gmra.mrb[4].mxu1 %vm969_vm1, %v980_v4  ;;  %v1291_v4 = vld [vmem:[#allocation7 + $0x30] sm:$0xff] }
 0x38c   : > { %2676 = vmatprep.mubr.msk.f32.mxu1 %vm3443_vm0, %v3441_v0  ;;  %2981 = vmatpush3.bf16.msra.mxu1 %v2980_v21  ;;  %v1299_v21 = vld [vmem:[#allocation7 + $0x70] sm:$0xff] }
 0x38d   : > { %2982 = vmatprep.subr.bf16.mxu1 %v3442_v1 }
 0x390   : > { %2984 = vmatpush3.bf16.msra.mxu1 %v2983_v23  ;;  %v3025_v23 = vpack.c.bf16 %v1300_v22, %v1299_v21  ;;  %v1427_v22 = vld [vmem:[#allocation2 + $0x210] sm:$0xff] }
 0x391   : > { %2985 = vmatprep.subr.bf16.mxu1 %v3442_v1 }
 0x394   : > { %2987 = vmatpush3.bf16.msra.mxu1 %v2986_v27 }
 0x395   : > { %2988 = vmatprep.subr.bf16.mxu1 %v3442_v1 }
 0x398   : > { %2990 = vmatpush3.bf16.msra.mxu1 %v2989_v35 }
 0x399   : > { %2991 = vmatprep.subr.bf16.mxu1 %v3442_v1 }
 0x39c   : > { %2993 = vmatpush3.bf16.msra.mxu1 %v2992_v38  ;;  %v2365_v38 = vld [vmem:[%s4130_s12] ss:$0 sm:$0xff] }
 0x39d   : > { %2994 = vmatprep.subr.bf16.mxu1 %v3442_v1 }
 0x3a0   : > { %2996 = vmatpush3.bf16.msra.mxu1 %v2995_v41 }
 0x3a1   : > { %2997 = vmatprep.subr.bf16.mxu1 %v3442_v1 }
 0x3a4   : > { %2999 = vmatpush3.bf16.msra.mxu1 %v2998_v44  ;;  %v1410_v44 = vld [vmem:[#allocation2 + $0x188] sm:$0xff] }
 0x3a5   : > { %3000 = vmatprep.subr.bf16.mxu1 %v3442_v1 }
 0x3a8   : > { %3002 = vmatpush3.bf16.msra.mxu1 %v3001_v47  ;;  %v3027_v47 = vpack.c.bf16 %v1413_v45, %v1410_v44  ;;  %v1444_v45 = vld [vmem:[#allocation2 + $0x298] sm:$0xff] }
 0x3aa   : > { %3028 = vmatprep.subr.bf16.mxu1 %v3027_v47  ;;  %v1449_v47 = vld [vmem:[#allocation2 + $0x2c0] sm:$0xff] }
 0x45e   : > { %v1050_v5 = vpop.f32.mrb[4].mxu1 }
 0x45f   : > { %v2608_v6 = vpop.f32.mrb[5].mxu1  ;;  %2642 = vmatmul.mubr.f32.vlgmr.msra.gmra.mrb[2].mxu0 %v1050_v5  ;;  %v1292_v5 = vld [vmem:[#allocation7 + $0x38] sm:$0xff] }
 0x460   : > { %2711 = vmatprep.mubr.msk.f32.mxu0 %vm3443_vm0, %v3441_v0  ;;  %3005 = vmatpush3.bf16.msra.mxu0 %v3004_v50  ;;  %v3013_v6 = vpack.c.bf16 %v1292_v5, %v1291_v4  ;;  %v1414_v50 = vld [vmem:[#allocation2 + $0x1a8] sm:$0xff]  ;;  %v1424_v4 = vld [vmem:[#allocation2 + $0x1f8] sm:$0xff]  ;;  %v1423_v5 = vld [vmem:[#allocation2 + $0x1f0] sm:$0xff] }
 0x461   : > { %3006 = vmatprep.subr.bf16.mxu0 %v3442_v1 }
 0x464   : > { %3008 = vmatpush3.bf16.msra.mxu0 %v3007_v62  ;;  %v1422_v62 = vld [vmem:[#allocation2 + $0x1e8] sm:$0xff] }
 0x465   : > { %3009 = vmatprep.subr.bf16.mxu0 %v3442_v1 }
 0x468   : > { %3011 = vmatpush3.bf16.msra.mxu0 %v3010_v3  ;;  %v3035_v3 = vpack.c.bf16 %v1425_v63, %v1422_v62  ;;  %v1456_v62 = vld [vmem:[#allocation2 + $0x2f8] sm:$0xff] }
 0x469   : > { %3012 = vmatprep.subr.bf16.mxu0 %v3442_v1 }
 0x46c   : > { %3014 = vmatpush3.bf16.msra.mxu0 %v3013_v6  ;;  %v1426_v6 = vld [vmem:[#allocation2 + $0x208] sm:$0xff] }
 0x46d   : > { %3015 = vmatprep.subr.bf16.mxu0 %v3442_v1 }
 0x532   : > { %v1143_v9 = vpop.f32.mrb[2].mxu0 }
 0x533   : > { %v1144_v10 = vadd.f32 %v2360_v7, %v1143_v9  ;;  %v2643_v11 = vpop.f32.mrb[3].mxu0  ;;  %v1293_v7 = vld [vmem:[#allocation7 + $0x40] sm:$0xff]  ;;  %v1294_v9 = vld [vmem:[#allocation7 + $0x48] sm:$0xff] }
 0x534   : > { %v1295_v11 = vld [vmem:[#allocation7 + $0x50] sm:$0xff] }
 0x535   : > { %v1147_v13 = vadd.f32 %v1144_v10, %v3711_v8  ;;  %v3016_v10 = vpack.c.bf16 %v1294_v9, %v1293_v7  ;;  %v3037_v7 = vpack.c.bf16 %v1424_v4, %v1421_v2  ;;  %v3066_v9 = vpack.c.bf16 %v1426_v6, %v1423_v5 }
 0x537   : > { %v1156_v16 = vmul.f32 %v3819_v12, %v1147_v13  ;;  %3017 = vmatpush3.bf16.msra.mxu0 %v3016_v10 }
 0x538   : > { %3018 = vmatprep.subr.bf16.mxu0 %v3442_v1 }
 0x539   : > { %1157 = vadd.xlane.f32.xlu1 %v1156_v16 }
 0x5c6   : > { %v1158_v8 = vpop.xlane.xlu1 %1157 }
 0x5c7   : > { %v1159_v28 = vmul.f32 0.03125, %v1158_v8 }
 0x5c9   : > { %v1160_v29 = vsub.f32 %v1147_v13, %v1159_v28  ;;  %v1296_v13 = vld [vmem:[#allocation7 + $0x58] sm:$0xff] }
 0x5ca   : > { %v3019_v16 = vpack.c.bf16 %v1296_v13, %v1295_v11 }
 0x5cb   : > { %v1161_v31 = vmul.f32 %v3819_v12, %v1160_v29 }
 0x5cc   : > { %3020 = vmatpush3.bf16.msra.mxu0 %v3019_v16 }
 0x5cd   : > { %v1162_v32 = vmul.f32 %v1161_v31, %v1161_v31  ;;  %3021 = vmatprep.subr.bf16.mxu0 %v3442_v1 }
 0x5cf   : > { %1163 = vadd.xlane.f32.xlu1 %v1162_v32 }
 0x5d0   : > { %3023 = vmatpush3.bf16.msra.mxu0 %v3022_v20  ;;  %v1431_v20 = vld [vmem:[#allocation2 + $0x230] sm:$0xff] }
 0x5d1   : > { %3024 = vmatprep.subr.bf16.mxu0 %v3442_v1  ;;  %v3039_v21 = vpack.c.bf16 %v1431_v20, %v1428_v19 }
 0x5d4   : > { %3026 = vmatpush3.bf16.msra.mxu0 %v3025_v23  ;;  %v1430_v23 = vld [vmem:[#allocation2 + $0x228] sm:$0xff] }
 0x5d5   : > { %3059 = vmatprep.subr.bf16.mxu0 %v3442_v1 }
 0x65c   : > { %v1164_v51 = vpop.xlane.xlu1 %1163 }
 0x65d   : > { %v1165_v52 = vmul.f32 0.03125, %v1164_v51  ;;  %v3029_v51 = vpack.c.bf16 %v1412_v48, %v1409_v46  ;;  %v1446_v46 = vld [vmem:[#allocation2 + $0x2a8] sm:$0xff] }
 0x65f   : > { %v1166_v53 = vadd.f32 1e-12, %v1165_v52  ;;  %v3060_v52 = vpack.c.bf16 %v1414_v50, %v1411_v49  ;;  %v3051_v49 = vpack.c.bf16 %v1449_v47, %v1446_v46  ;;  %v1445_v50 = vld [vmem:[#allocation2 + $0x2a0] sm:$0xff]  ;;  %v2376_v46 = vld [vmem:[%s4123_s5 + $0xb0] sm:$0xff]  ;;  %v2377_v47 = vld [vmem:[%s4123_s5 + $0xb8] sm:$0xff] }
 0x661   : > { %3260 = vrsqrt.f32 %v1166_v53  ;;  %v1416_v53 = vld [vmem:[#allocation2 + $0x1b8] sm:$0xff] }
 0x66b   : > { %v3261_v54 = vpop.eup %3260 }
 0x66c   : > { %v1168_v56 = vmul.f32 %v3261_v54, %v1161_v31  ;;  %v1419_v54 = vld [vmem:[#allocation2 + $0x1d0] sm:$0xff] }
 0x66e   : > { %v1175_v58 = vmul.f32 %v2362_v55, %v1168_v56  ;;  %v1415_v55 = vld [vmem:[#allocation2 + $0x1b0] sm:$0xff]  ;;  %v3031_v56 = vpack.c.bf16 %v1419_v54, %v1416_v53  ;;  %v1450_v53 = vld [vmem:[#allocation2 + $0x2c8] sm:$0xff]  ;;  %v1452_v54 = vld [vmem:[#allocation2 + $0x2d8] sm:$0xff] }
 0x670   : > { %v1182_v59 = vadd.f32 %v2363_v57, %v1175_v58  ;;  %v1418_v57 = vld [vmem:[#allocation2 + $0x1c8] sm:$0xff]  ;;  %v1417_v58 = vld [vmem:[#allocation2 + $0x1c0] sm:$0xff] }
 0x671   : > { %v3033_v60 = vpack.c.bf16 %v1418_v57, %v1415_v55  ;;  %v1455_v55 = vld [vmem:[#allocation2 + $0x2f0] sm:$0xff] }
 0x672   : > { %2677 = vmatmul.mubr.f32.vlgmr.msra.gmra.mrb[6].mxu1 %v1182_v59 }
 0x673   : > { %1539 = vmatprep.mubr.f32.mxu1 %v3441_v0  ;;  %3030 = vmatpush1.bf16.msra.mxu1 %v3029_v51  ;;  %v1448_v51 = vld [vmem:[#allocation2 + $0x2b8] sm:$0xff] }
 0x674   : > { %3032 = vmatprep.subr.bf16.mxu1 %v3031_v56  ;;  %v3053_v56 = vpack.c.bf16 %v1448_v51, %v1445_v50  ;;  %v2379_v50 = vld [vmem:[%s4123_s5 + $0xc8] sm:$0xff] }
 0x677   : > { %3034 = vmatpush1.bf16.msra.mxu1 %v3033_v60  ;;  %v1454_v60 = vld [vmem:[#allocation2 + $0x2e8] sm:$0xff] }
 0x678   : > { %3036 = vmatprep.subr.bf16.mxu1 %v3035_v3 }
 0x67b   : > { %3038 = vmatpush1.bf16.msra.mxu1 %v3037_v7  ;;  %v2366_v7 = vld [vmem:[%s4131_s13] ss:$0 sm:$0xff] }
 0x67c   : > { %3040 = vmatprep.subr.bf16.mxu1 %v3039_v21 }
 0x745   : > { %v1272_v26 = vpop.f32.mrb[6].mxu1 }
 0x746   : > { %v1273_v27 = vadd.f32 %v2364_v25, %v1272_v26  ;;  %v2678_v8 = vpop.f32.mrb[7].mxu1  ;;  %v1429_v25 = vld [vmem:[#allocation2 + $0x220] sm:$0xff]  ;;  %v3041_v26 = vpack.c.bf16 %v1430_v23, %v1427_v22 }
 0x748   : > { %v1276_v28 = vmul.f32 %v1273_v27, %v1273_v27  ;;  %3042 = vmatpush1.bf16.msra.mxu1 %v3041_v26 }
 0x74a   : > { %v1277_v29 = vmul.f32 %v1276_v28, %v1273_v27  ;;  %v1434_v28 = vld [vmem:[#allocation2 + $0x248] sm:$0xff] }
 0x74c   : > { %v1278_v31 = vmul.f32 0.044715, %v1277_v29  ;;  %v1437_v29 = vld [vmem:[#allocation2 + $0x260] sm:$0xff] }
 0x74e   : > { %v1279_v32 = vadd.f32 %v1278_v31, %v1273_v27  ;;  %v3043_v31 = vpack.c.bf16 %v1437_v29, %v1434_v28 }
 0x750   : > { %v1280_v33 = vmul.f32 0.7978846, %v1279_v32  ;;  %v1433_v32 = vld [vmem:[#allocation2 + $0x240] sm:$0xff]  ;;  %3044 = vmatprep.subr.bf16.mxu1 %v3043_v31 }
 0x752   : > { %3262 = vtanh.f32 %v1280_v33  ;;  %v1436_v33 = vld [vmem:[#allocation2 + $0x258] sm:$0xff] }
 0x75c   : > { %v3263_v34 = vpop.eup %3262 }
 0x75d   : > { %v1282_v35 = vadd.f32 1.0, %v3263_v34  ;;  %v1435_v34 = vld [vmem:[#allocation2 + $0x250] sm:$0xff] }
 0x75f   : > { %v1283_v36 = vmul.f32 0.5, %v1282_v35  ;;  %v3045_v35 = vpack.c.bf16 %v1436_v33, %v1433_v32 }
 0x761   : > { %v1284_v37 = vmul.f32 %v1283_v36, %v1273_v27  ;;  %v1432_v27 = vld [vmem:[#allocation2 + $0x238] sm:$0xff]  ;;  %v1438_v36 = vld [vmem:[#allocation2 + $0x268] sm:$0xff]  ;;  %3046 = vmatpush1.bf16.msra.mxu1 %v3045_v35 }
 0x762   : > { %v3069_v8 = vpack.c.bf16 %v1432_v27, %v1429_v25 }
 0x763   : > { %2712 = vmatmul.mubr.f32.vlgmr.msra.gmra.mrb[4].mxu0 %v1284_v37  ;;  %v1440_v37 = vld [vmem:[#allocation2 + $0x278] sm:$0xff] }
 0x764   : > { %2746 = vmatprep.mubr.msk.f32.mxu0 %vm3443_vm0, %v3441_v0  ;;  %3061 = vmatpush3.bf16.msra.mxu0 %v3060_v52  ;;  %v1447_v52 = vld [vmem:[#allocation2 + $0x2b0] sm:$0xff] }
 0x765   : > { %3062 = vmatprep.subr.bf16.mxu0 %v3442_v1  ;;  %v3078_v57 = vpack.c.bf16 %v1450_v53, %v1447_v52  ;;  %v2380_v52 = vld [vmem:[%s4123_s5 + $0xd0] sm:$0xff]  ;;  %v2381_v53 = vld [vmem:[%s4123_s5 + $0xd8] sm:$0xff] }
 0x836   : > { %v1374_v39 = vpop.f32.mrb[4].mxu0 }
 0x837   : > { %v1375_v40 = vadd.f32 %v2365_v38, %v1374_v39  ;;  %v2713_v41 = vpop.f32.mrb[5].mxu0  ;;  %v1443_v38 = vld [vmem:[#allocation2 + $0x290] sm:$0xff]  ;;  %v3072_v39 = vpack.c.bf16 %v1438_v36, %v1435_v34  ;;  %v2370_v36 = vld [vmem:[%s4123_s5 + $0x80] sm:$0xff] }
 0x838   : > { %v1439_v41 = vld [vmem:[#allocation2 + $0x270] sm:$0xff] }
 0x839   : > { %v1378_v42 = vadd.f32 %v1375_v40, %v1182_v59  ;;  %v1420_v59 = vld [vmem:[#allocation2 + $0x1d8] sm:$0xff]  ;;  %v3047_v40 = vpack.c.bf16 %v1443_v38, %v1440_v37 }
 0x83a   : > { %v3063_v61 = vpack.c.bf16 %v1420_v59, %v1417_v58  ;;  %v3055_v58 = vpack.c.bf16 %v1455_v55, %v1452_v54  ;;  %v1451_v59 = vld [vmem:[#allocation2 + $0x2d0] sm:$0xff]  ;;  %v3099_v54 = vpack.c.bf16 %v2381_v53, %v2380_v52  ;;  %v2382_v55 = vld [vmem:[%s4123_s5 + $0xe0] sm:$0xff]  ;;  %v2009_v53 = vld [vmem:[#allocation7 + $0xa8] sm:$0xff] }
 0x83b   : > { %v1381_v43 = vmul.f32 %v3819_v12, %v1378_v42  ;;  %3048 = vmatprep.subr.bf16.mxu1 %v3047_v40  ;;  %v3057_v63 = vpack.c.bf16 %v1454_v60, %v1451_v59  ;;  %v2372_v40 = vld [vmem:[%s4123_s5 + $0x90] sm:$0xff]  ;;  %v2385_v59 = vld [vmem:[%s4123_s5 + $0xf8] sm:$0xff]  ;;  %v2008_v52 = vld [vmem:[#allocation7 + $0xa0] sm:$0xff] }
 0x83c   : > { %3064 = vmatpush3.bf16.msra.mxu0 %v3063_v61  ;;  %v1453_v61 = vld [vmem:[#allocation2 + $0x2e0] sm:$0xff] }
 0x83d   : > { %1382 = vadd.xlane.f32.xlu0 %v1381_v43  ;;  %3065 = vmatprep.subr.bf16.mxu0 %v3442_v1  ;;  %v1441_v43 = vld [vmem:[#allocation2 + $0x280] sm:$0xff]  ;;  %v3081_v2 = vpack.c.bf16 %v1456_v62, %v1453_v61 }
 0x83e   : > { %v3075_v48 = vpack.c.bf16 %v1444_v45, %v1441_v43  ;;  %v2374_v43 = vld [vmem:[%s4123_s5 + $0xa0] sm:$0xff] }
 0x840   : > { %3067 = vmatpush3.bf16.msra.mxu0 %v3066_v9 }
 0x841   : > { %3068 = vmatprep.subr.bf16.mxu0 %v3442_v1 }
 0x844   : > { %3070 = vmatpush3.bf16.msra.mxu0 %v3069_v8 }
 0x845   : > { %3071 = vmatprep.subr.bf16.mxu0 %v3442_v1 }
 0x848   : > { %3073 = vmatpush3.bf16.msra.mxu0 %v3072_v39 }
 0x849   : > { %3074 = vmatprep.subr.bf16.mxu0 %v3442_v1 }
 0x84c   : > { %3076 = vmatpush3.bf16.msra.mxu0 %v3075_v48  ;;  %v3093_v48 = vpack.c.bf16 %v2377_v47, %v2376_v46  ;;  %v2391_v46 = vld [vmem:[%s4126_s8 + $0x1] ss:$0 sm:$0xff] }
 0x84d   : > { %3077 = vmatprep.subr.bf16.mxu0 %v3442_v1 }
 0x850   : > { %3079 = vmatpush3.bf16.msra.mxu0 %v3078_v57 }
 0x851   : > { %3080 = vmatprep.subr.bf16.mxu0 %v3442_v1 }
 0x854   : > { %3082 = vmatpush3.bf16.msra.mxu0 %v3081_v2 }
 0x855   : > { %3107 = vmatprep.subr.bf16.mxu0 %v3442_v1 }
 0x8ca   : > { %v1383_v10 = vpop.xlane.xlu0 %1382 }
 0x8cb   : > { %v1384_v11 = vmul.f32 0.03125, %v1383_v10  ;;  %v2367_v10 = vld [vmem:[%s4132_s14] ss:$0 sm:$0xff] }
 0x8cd   : > { %v1385_v13 = vsub.f32 %v1378_v42, %v1384_v11  ;;  %v1442_v42 = vld [vmem:[#allocation2 + $0x288] sm:$0xff] }
 0x8ce   : > { %v3049_v44 = vpack.c.bf16 %v1442_v42, %v1439_v41  ;;  %v2373_v41 = vld [vmem:[%s4123_s5 + $0x98] sm:$0xff] }
 0x8cf   : > { %v3859_v16 = vmul.f32 %v3819_v12, %v1385_v13  ;;  %v3087_v42 = vpack.c.bf16 %v2373_v41, %v2372_v40 }
 0x8d0   : > { %3050 = vmatpush1.bf16.msra.mxu1 %v3049_v44  ;;  %v2375_v44 = vld [vmem:[%s4123_s5 + $0xa8] sm:$0xff] }
 0x8d1   : > { %v1387_v18 = vmul.f32 %v3859_v16, %v3859_v16  ;;  %3052 = vmatprep.subr.bf16.mxu1 %v3051_v49  ;;  %v3090_v45 = vpack.c.bf16 %v2375_v44, %v2374_v43  ;;  %v2378_v49 = vld [vmem:[%s4123_s5 + $0xc0] sm:$0xff] }
 0x8d2   : > { %v3096_v51 = vpack.c.bf16 %v2379_v50, %v2378_v49  ;;  %v2390_v44 = vld [vmem:[%s4125_s7 + $0x1] ss:$0 sm:$0xff]  ;;  %v2006_v49 = vld [vmem:[#allocation7 + $0x90] sm:$0xff]  ;;  %v2007_v50 = vld [vmem:[#allocation7 + $0x98] sm:$0xff] }
 0x8d3   : > { %1388 = vadd.xlane.f32.xlu1 %v1387_v18 }
 0x8d4   : > { %3054 = vmatpush1.bf16.msra.mxu1 %v3053_v56  ;;  %v2383_v56 = vld [vmem:[%s4123_s5 + $0xe8] sm:$0xff] }
 0x8d5   : > { %3056 = vmatprep.subr.bf16.mxu1 %v3055_v58  ;;  %v3102_v57 = vpack.c.bf16 %v2383_v56, %v2382_v55  ;;  %v2384_v58 = vld [vmem:[%s4123_s5 + $0xf0] sm:$0xff]  ;;  %v2011_v56 = vld [vmem:[#allocation7 + $0xb8] sm:$0xff] }
 0x8d6   : > { %v3105_v60 = vpack.c.bf16 %v2385_v59, %v2384_v58  ;;  %v2010_v55 = vld [vmem:[#allocation7 + $0xb0] sm:$0xff]  ;;  %v2012_v58 = vld [vmem:[#allocation7 + $0xc0] sm:$0xff] }
 0x8d8   : > { %3058 = vmatpush1.bf16.msra.mxu1 %v3057_v63  ;;  %v2387_v63 = vld [vmem:[%s4124_s6 + $0x1] ss:$0 sm:$0xff] }
 0x8d9   : > { %2749 = vmatprep.subr.mxu1 %v3441_v0 }
 0x960   : > { %v1389_v3 = vpop.xlane.xlu1 %1388 }
 0x961   : > { %v1390_v4 = vmul.f32 0.03125, %v1389_v3 }
 0x963   : > { %v1391_v5 = vadd.f32 1e-12, %v1390_v4 }
 0x965   : > { %3264 = vrsqrt.f32 %v1391_v5 }
 0x96f   : > { %v3265_v6 = vpop.eup %3264 }
 0x970   : > { %v1393_v9 = vmul.f32 %v3265_v6, %v3859_v16  ;;  %v2368_v16 = vld [vmem:[%s4188_s29 + $0x3] sm:$0x7] }
 0x971   : > { %v1467_v18 = vrot.slane %v2368_v16, %v741_v15  ;;  %v1463_v21 = vrot.slane %v2368_v16, %v737_v17  ;;  %v1471_v25 = vrot.slane %v2368_v16, %v745_v24  ;;  %v1903_v16 = vld [vmem:[#allocation5 + $0x98] sm:$0xff] }
 0x972   : > { %v1400_v11 = vmul.f32 %v2366_v7, %v1393_v9  ;;  %v1900_v7 = vld [vmem:[#allocation5 + $0x80] sm:$0xff]  ;;  %v1901_v9 = vld [vmem:[#allocation5 + $0x88] sm:$0xff] }
 0x974   : > { %v3876_v13 = vadd.f32 %v2367_v10, %v1400_v11  ;;  %v1902_v10 = vld [vmem:[#allocation5 + $0x90] sm:$0xff]  ;;  %v3108_v11 = vpack.c.bf16 %v1901_v9, %v1900_v7  ;;  %v2393_v7 = vld [vmem:[%s4128_s10 + $0x1] ss:$0 sm:$0xff] }
 0x976   : > { %1540 = vmatmul.mubr.f32.vlgmr.msra.gmra.mrb[8].mxu1 %v3876_v13  ;;  %2747 = vmatmul.mubr.f32.vlgmr.msra.gmra.mrb[6].mxu0 %v3876_v13 }
 0x977   : > { %2751 = vmatprep.mubr.msk.f32.mxu1 %vm3443_vm0, %v3441_v0  ;;  %2826 = vmatprep.mubr.msk.f32.mxu0 %vm3443_vm0, %v3441_v0 }
 0x978   : > { %3109 = vmatpush3.bf16.msra.mxu0 %v3108_v11 }
 0x979   : > { %3110 = vmatprep.subr.bf16.mxu0 %v3442_v1 }
 0xa49   : > { %v1541_v19 = vpop.f32.mrb[8].mxu1  ;;  %v1612_v20 = vpop.f32.mrb[6].mxu0 }
 0xa4a   : > { %v1543_v22 = vpop.f32.mrb[9].mxu1  ;;  %v2748_v23 = vpop.f32.mrb[7].mxu0  ;;  %v1542_v27 = vadd.f32 %v1541_v19, %v1463_v21  ;;  %v1613_v8 = vadd.f32 %v1612_v20, %v1471_v25  ;;  %v1904_v19 = vld [vmem:[#allocation5 + $0xa0] sm:$0xff]  ;;  %v1905_v20 = vld [vmem:[#allocation5 + $0xa8] sm:$0xff] }
 0xa4b   : > { %v1544_v26 = vadd.f32 %v1543_v22, %v1467_v18  ;;  %v3111_v18 = vpack.c.bf16 %v1903_v16, %v1902_v10  ;;  %v3114_v21 = vpack.c.bf16 %v1905_v20, %v1904_v19 }
 0xa4d   : > { %2750 = vmatpush3.xpose.msra.mxu1 %v1544_v26  ;;  %3112 = vmatpush3.bf16.msra.mxu0 %v3111_v18 }
 0xa4e   : > { %2754 = vmatprep.subr.mxu1 %v3441_v0  ;;  %3113 = vmatprep.subr.bf16.mxu0 %v3442_v1 }
 0xa50   : > { %2752 = vmatmul.mubr.f32.vlgmr.msra.gmra.mrb[10].mxu1 %v1542_v27  ;;  %v1906_v27 = vld [vmem:[#allocation5 + $0xb0] sm:$0xff] }
 0xa51   : > { %2755 = vmatpush3.msra.mxu1 %v1613_v8  ;;  %2756 = vmatprep.mubr.msk.f32.mxu1 %vm3443_vm0, %v3441_v0  ;;  %v1907_v8 = vld [vmem:[#allocation5 + $0xb8] sm:$0xff] }
 0xa52   : > { %3083 = vmatprep.subr.bf16.mxu1 %v3442_v1  ;;  %3115 = vmatpush3.bf16.msra.mxu0 %v3114_v21 }
 0xa53   : > { %3116 = vmatprep.subr.bf16.mxu0 %v3442_v1 }
 0xb23   : > { %v1682_v15 = vpop.f32.mrb[10].mxu1 }
 0xb24   : > { %v1686_v17 = vmul.f32 0.17677669, %v1682_v15  ;;  %v2753_v28 = vpop.f32.mrb[11].mxu1  ;;  %v3117_v15 = vpack.c.bf16 %v1907_v8, %v1906_v27 }
 0xb25   : > { %v1909_v28 = vld [vmem:[#allocation5 + $0xc8] sm:$0xff] }
 0xb26   : > { %v1687_v29 = vadd.f32 %v3747_v30, %v1686_v17  ;;  %v2371_v30 = vld [vmem:[%s4123_s5 + $0x88] sm:$0xff]  ;;  %3118 = vmatpush3.bf16.msra.mxu0 %v3117_v15  ;;  %v1908_v17 = vld [vmem:[#allocation5 + $0xc0] sm:$0xff] }
 0xb27   : > { %v3084_v38 = vpack.c.bf16 %v2371_v30, %v2370_v36  ;;  %3119 = vmatprep.subr.bf16.mxu0 %v3442_v1  ;;  %v1915_v36 = vld [vmem:[#allocation5 + $0xf8] sm:$0xff] }
 0xb28   : > { %v1688_v14 = vsel %vm969_vm1, %v1687_v29, -inf }
 0xb29   : > { %1689 = vmax.xlane.f32.xlu0 %v1688_v14  ;;  %v1910_v14 = vld [vmem:[#allocation5 + $0xd0] sm:$0xff] }
 0xbb6   : > { %v1690_v24 = vpop.xlane.xlu0 %1689 }
 0xbb7   : > { %v1691_v31 = vsub.f32 %v1687_v29, %v1690_v24  ;;  %v3120_v29 = vpack.c.bf16 %v1909_v28, %v1908_v17  ;;  %v1911_v24 = vld [vmem:[#allocation5 + $0xd8] sm:$0xff] }
 0xbb9   : > { %v1692_v32 = vmul.f32 1.442695, %v1691_v31  ;;  %3121 = vmatpush3.bf16.msra.mxu0 %v3120_v29  ;;  %v3123_v31 = vpack.c.bf16 %v1911_v24, %v1910_v14  ;;  %v2130_v29 = vld [vmem:[%s4133_s15] sm:$0xff]  ;;  %v2131_v14 = vld [vmem:[%s4133_s15 + $0x8] sm:$0xff]  ;;  %v2132_v24 = vld [vmem:[%s4133_s15 + $0x10] sm:$0xff] }
 0xbba   : > { %3122 = vmatprep.subr.bf16.mxu0 %v3442_v1 }
 0xbbb   : > { %3266 = vpow2.f32 %v1692_v32  ;;  %v1912_v32 = vld [vmem:[#allocation5 + $0xe0] sm:$0xff] }
 0xbbd   : > { %3124 = vmatpush3.bf16.msra.mxu0 %v3123_v31  ;;  %v3156_v31 = vpack.c.bf16 %v2131_v14, %v2130_v29 }
 0xbbe   : > { %3125 = vmatprep.subr.bf16.mxu0 %v3442_v1 }
 0xbc5   : > { %v3267_v33 = vpop.eup %3266 }
 0xbc6   : > { %v1694_v34 = vsel %vm969_vm1, %v3267_v33, 0.0 }
 0xbc7   : > { %1695 = vadd.xlane.f32.xlu1 %v1694_v34 }
 0xc54   : > { %v1696_v35 = vpop.xlane.xlu1 %1695 }
 0xc55   : > { %3268 = vrcp.f32 %v1696_v35  ;;  %v1914_v35 = vld [vmem:[#allocation5 + $0xf0] sm:$0xff] }
 0xc56   : > { %v3129_v30 = vpack.c.bf16 %v1915_v36, %v1914_v35  ;;  %v2135_v35 = vld [vmem:[%s4133_s15 + $0x28] sm:$0xff] }
 0xc5f   : > { %v3269_v37 = vpop.eup %3268 }
 0xc60   : > { %v1698_v39 = vmul.f32 %v3269_v37, %v3267_v33  ;;  %v1913_v33 = vld [vmem:[#allocation5 + $0xe8] sm:$0xff]  ;;  %v2004_v37 = vld [vmem:[#allocation7 + $0x80] sm:$0xff] }
 0xc61   : > { %v3126_v34 = vpack.c.bf16 %v1913_v33, %v1912_v32  ;;  %v2133_v32 = vld [vmem:[%s4133_s15 + $0x18] sm:$0xff] }
 0xc62   : > { %2757 = vmatmul.mubr.msk.f32.vlgmr.msra.gmra.mrb[12].mxu1 %vm969_vm1, %v1698_v39  ;;  %v3159_v33 = vpack.c.bf16 %v2133_v32, %v2132_v24 }
 0xc63   : > { %3085 = vmatpush3.bf16.msra.mxu1 %v3084_v38  ;;  %2791 = vmatprep.mubr.msk.f32.mxu1 %vm3443_vm0, %v3441_v0  ;;  %v2005_v38 = vld [vmem:[#allocation7 + $0x88] sm:$0xff] }
 0xc64   : > { %3086 = vmatprep.subr.bf16.mxu1 %v3442_v1  ;;  %3127 = vmatpush3.bf16.msra.mxu0 %v3126_v34  ;;  %v3132_v39 = vpack.c.bf16 %v2005_v38, %v2004_v37  ;;  %v2134_v34 = vld [vmem:[%s4133_s15 + $0x20] sm:$0xff] }
 0xc65   : > { %3128 = vmatprep.subr.bf16.mxu0 %v3442_v1  ;;  %v3162_v36 = vpack.c.bf16 %v2135_v35, %v2134_v34 }
 0xc67   : > { %3088 = vmatpush3.bf16.msra.mxu1 %v3087_v42 }
 0xc68   : > { %3089 = vmatprep.subr.bf16.mxu1 %v3442_v1  ;;  %3130 = vmatpush3.bf16.msra.mxu0 %v3129_v30 }
 0xc69   : > { %3155 = vmatprep.subr.bf16.mxu0 %v3442_v1 }
 0xc6b   : > { %3091 = vmatpush3.bf16.msra.mxu1 %v3090_v45 }
 0xc6c   : > { %3092 = vmatprep.subr.bf16.mxu1 %v3442_v1 }
 0xc6f   : > { %3094 = vmatpush3.bf16.msra.mxu1 %v3093_v48 }
 0xc70   : > { %3095 = vmatprep.subr.bf16.mxu1 %v3442_v1 }
 0xc73   : > { %3097 = vmatpush3.bf16.msra.mxu1 %v3096_v51  ;;  %v3135_v51 = vpack.c.bf16 %v2007_v50, %v2006_v49  ;;  %v2142_v49 = vld [vmem:[%s4133_s15 + $0x60] sm:$0xff]  ;;  %v2143_v50 = vld [vmem:[%s4133_s15 + $0x68] sm:$0xff] }
 0xc74   : > { %3098 = vmatprep.subr.bf16.mxu1 %v3442_v1 }
 0xc77   : > { %3100 = vmatpush3.bf16.msra.mxu1 %v3099_v54  ;;  %v3138_v54 = vpack.c.bf16 %v2009_v53, %v2008_v52  ;;  %v2144_v52 = vld [vmem:[%s4133_s15 + $0x70] sm:$0xff]  ;;  %v2145_v53 = vld [vmem:[%s4133_s15 + $0x78] sm:$0xff] }
 0xc78   : > { %3101 = vmatprep.subr.bf16.mxu1 %v3442_v1 }
 0xc7b   : > { %3103 = vmatpush3.bf16.msra.mxu1 %v3102_v57  ;;  %v3141_v57 = vpack.c.bf16 %v2011_v56, %v2010_v55 }
 0xc7c   : > { %3104 = vmatprep.subr.bf16.mxu1 %v3442_v1 }
 0xc7f   : > { %3106 = vmatpush3.bf16.msra.mxu1 %v3105_v60  ;;  %v2014_v60 = vld [vmem:[#allocation7 + $0xd0] sm:$0xff] }
 0xc80   : > { %3131 = vmatprep.subr.bf16.mxu1 %v3442_v1 }
 0xd35   : > { %v1768_v61 = vpop.f32.mrb[12].mxu1 }
 0xd36   : > { %v2758_v62 = vpop.f32.mrb[13].mxu1  ;;  %2792 = vmatmul.mubr.f32.vlgmr.msra.gmra.mrb[14].mxu1 %v1768_v61  ;;  %v2015_v61 = vld [vmem:[#allocation7 + $0xd8] sm:$0xff] }
 0xd37   : > { %2861 = vmatprep.mubr.msk.f32.mxu1 %vm3443_vm0, %v3441_v0  ;;  %3133 = vmatpush3.bf16.msra.mxu1 %v3132_v39  ;;  %v3147_v62 = vpack.c.bf16 %v2015_v61, %v2014_v60  ;;  %v2399_v60 = vld [vmem:[%s4132_s14 + $0x1] ss:$0 sm:$0xff] }
 0xd38   : > { %3134 = vmatprep.subr.bf16.mxu1 %v3442_v1 }
 0xd3b   : > { %3136 = vmatpush3.bf16.msra.mxu1 %v3135_v51  ;;  %v3174_v51 = vpack.c.bf16 %v2143_v50, %v2142_v49 }
 0xd3c   : > { %3137 = vmatprep.subr.bf16.mxu1 %v3442_v1 }
 0xd3f   : > { %3139 = vmatpush3.bf16.msra.mxu1 %v3138_v54  ;;  %v3177_v54 = vpack.c.bf16 %v2145_v53, %v2144_v52 }
 0xd40   : > { %3140 = vmatprep.subr.bf16.mxu1 %v3442_v1 }
 0xd43   : > { %3142 = vmatpush3.bf16.msra.mxu1 %v3141_v57 }
 0xd44   : > { %3143 = vmatprep.subr.bf16.mxu1 %v3442_v1 }
 0xe09   : > { %v1863_v2 = vpop.f32.mrb[14].mxu1 }
 0xe0a   : > { %v1864_v3 = vadd.f32 %v2387_v63, %v1863_v2  ;;  %v2793_v4 = vpop.f32.mrb[15].mxu1  ;;  %v2016_v63 = vld [vmem:[#allocation7 + $0xe0] sm:$0xff]  ;;  %v2017_v2 = vld [vmem:[#allocation7 + $0xe8] sm:$0xff] }
 0xe0b   : > { %v2018_v4 = vld [vmem:[#allocation7 + $0xf0] sm:$0xff] }
 0xe0c   : > { %v1867_v5 = vadd.f32 %v1864_v3, %v3876_v13  ;;  %v3150_v3 = vpack.c.bf16 %v2017_v2, %v2016_v63  ;;  %v2219_v2 = vld [vmem:[%s4137_s19] sm:$0x1] }
 0xe0e   : > { %v1872_v6 = vmul.f32 %v3819_v12, %v1867_v5 }
 0xe10   : > { %1873 = vadd.xlane.f32.xlu0 %v1872_v6 }
 0xe9d   : > { %v1874_v13 = vpop.xlane.xlu0 %1873 }
 0xe9e   : > { %v1875_v22 = vmul.f32 0.03125, %v1874_v13 }
 0xea0   : > { %v1876_v23 = vsub.f32 %v1867_v5, %v1875_v22  ;;  %v2019_v5 = vld [vmem:[#allocation7 + $0xf8] sm:$0xff] }
 0xea1   : > { %v3153_v6 = vpack.c.bf16 %v2019_v5, %v2018_v4 }
 0xea2   : > { %v1877_v25 = vmul.f32 %v3819_v12, %v1876_v23 }
 0xea4   : > { %v1878_v26 = vmul.f32 %v1877_v25, %v1877_v25 }
 0xea6   : > { %1879 = vadd.xlane.f32.xlu1 %v1878_v26  ;;  %v2395_v26 = vld [vmem:[%s4130_s12 + $0x1] ss:$0 sm:$0xff] }
 0xf33   : > { %v1880_v40 = vpop.xlane.xlu1 %1879 }
 0xf34   : > { %v1881_v41 = vmul.f32 0.03125, %v1880_v40 }
 0xf36   : > { %v1882_v42 = vadd.f32 1e-12, %v1881_v41  ;;  %v2136_v41 = vld [vmem:[%s4133_s15 + $0x30] sm:$0xff] }
 0xf38   : > { %3270 = vrsqrt.f32 %v1882_v42  ;;  %v2137_v42 = vld [vmem:[%s4133_s15 + $0x38] sm:$0xff] }
 0xf42   : > { %v3271_v43 = vpop.eup %3270 }
 0xf43   : > { %v1884_v45 = vmul.f32 %v3271_v43, %v1877_v25  ;;  %v3165_v43 = vpack.c.bf16 %v2137_v42, %v2136_v41 }
 0xf45   : > { %v1891_v47 = vmul.f32 %v2390_v44, %v1884_v45  ;;  %v2138_v44 = vld [vmem:[%s4133_s15 + $0x40] sm:$0xff] }
 0xf47   : > { %v1898_v48 = vadd.f32 %v2391_v46, %v1891_v47  ;;  %v2140_v46 = vld [vmem:[%s4133_s15 + $0x50] sm:$0xff]  ;;  %v2141_v47 = vld [vmem:[%s4133_s15 + $0x58] sm:$0xff] }
 0xf49   : > { %2827 = vmatmul.mubr.f32.vlgmr.msra.gmra.mrb[8].mxu0 %v1898_v48 }
 0xf4a   : > { %2896 = vmatprep.mubr.msk.f32.mxu0 %vm3443_vm0, %v3441_v0  ;;  %v2013_v0 = vld [vmem:[#allocation7 + $0xc8] sm:$0xff]  ;;  %3157 = vmatpush3.bf16.msra.mxu0 %v3156_v31 }
 0xf4b   : > { %v3144_v59 = vpack.c.bf16 %v2013_v0, %v2012_v58  ;;  %3158 = vmatprep.subr.bf16.mxu0 %v3442_v1  ;;  %v2398_v0 = vld [vmem:[%s4131_s13 + $0x1] ss:$0 sm:$0xff] }
 0xf4d   : > { %3145 = vmatpush3.bf16.msra.mxu1 %v3144_v59 }
 0xf4e   : > { %3146 = vmatprep.subr.bf16.mxu1 %v3442_v1  ;;  %3160 = vmatpush3.bf16.msra.mxu0 %v3159_v33 }
 0xf4f   : > { %3161 = vmatprep.subr.bf16.mxu0 %v3442_v1 }
 0xf51   : > { %3148 = vmatpush3.bf16.msra.mxu1 %v3147_v62 }
 0xf52   : > { %3149 = vmatprep.subr.bf16.mxu1 %v3442_v1  ;;  %3163 = vmatpush3.bf16.msra.mxu0 %v3162_v36 }
 0xf53   : > { %3164 = vmatprep.subr.bf16.mxu0 %v3442_v1 }
 0xf55   : > { %3151 = vmatpush3.bf16.msra.mxu1 %v3150_v3 }
 0xf56   : > { %3152 = vmatprep.subr.bf16.mxu1 %v3442_v1  ;;  %3166 = vmatpush3.bf16.msra.mxu0 %v3165_v43 }
 0xf57   : > { %3167 = vmatprep.subr.bf16.mxu0 %v3442_v1 }
 0xf59   : > { %3154 = vmatpush3.bf16.msra.mxu1 %v3153_v6 }
0x101c   : > { %v1990_v9 = vpop.f32.mrb[8].mxu0 }
0x101d   : > { %v1991_v10 = vadd.f32 %v2393_v7, %v1990_v9  ;;  %v2828_v11 = vpop.f32.mrb[9].mxu0 }
0x101f   : > { %v1994_v16 = vmul.f32 %v1991_v10, %v1991_v10 }
0x1021   : > { %v1995_v18 = vmul.f32 %v1994_v16, %v1991_v10 }
0x1023   : > { %v1996_v19 = vmul.f32 0.044715, %v1995_v18 }
0x1025   : > { %v1997_v20 = vadd.f32 %v1996_v19, %v1991_v10 }
0x1027   : > { %v1998_v21 = vmul.f32 0.7978846, %v1997_v20 }
0x1029   : > { %3272 = vtanh.f32 %v1998_v21 }
0x1033   : > { %v3273_v13 = vpop.eup %3272 }
0x1034   : > { %v2000_v22 = vadd.f32 1.0, %v3273_v13 }
0x1036   : > { %v2001_v23 = vmul.f32 0.5, %v2000_v22  ;;  %v2217_v22 = vld [vmem:[%s4193_s24] sm:$0x1]  ;;  %s3368_s24 = scalar_lea.vmem %s3367_s4, 32 }
0x1037   : > { %p3370_p7 = scmp.lt.s32.totalorder %s3368_s24, %s3362_s22 }
0x1038   : > { %v2002_v25 = vmul.f32 %v2001_v23, %v1991_v10 }
0x1039   : > { %p3371_p8 = por %p3370_p7, %p3369_p4 }
0x103a   : > { %2862 = vmatmul.mubr.f32.vlgmr.msra.gmra.mrb[16].mxu1 %v2002_v25  ;;  %v2218_v25 = vld [vmem:[%s4194_s23] sm:$0x1] }
0x103b   : > { %p3372_p11 = pnand %p3371_p8, %p3365_p3 }
0x110d   : > { %v2094_v27 = vpop.f32.mrb[16].mxu1 }
0x110e   : > { %v2095_v8 = vadd.f32 %v2395_v26, %v2094_v27  ;;  %v2863_v15 = vpop.f32.mrb[17].mxu1 }
0x1110   : > { %v2098_v17 = vadd.f32 %v2095_v8, %v1898_v48  ;;  %v3171_v48 = vpack.c.bf16 %v2141_v47, %v2140_v46 }
0x1112   : > { %v2103_v28 = vmul.f32 %v3819_v12, %v2098_v17 }
0x1114   : > { %2104 = vadd.xlane.f32.xlu0 %v2103_v28 }
0x11a1   : > { %v2105_v30 = vpop.xlane.xlu0 %2104 }
0x11a2   : > { %v2106_v37 = vmul.f32 0.03125, %v2105_v30 }
0x11a4   : > { %v2107_v38 = vsub.f32 %v2098_v17, %v2106_v37 }
0x11a6   : > { %v2108_v39 = vmul.f32 %v3819_v12, %v2107_v38  ;;  %v2139_v12 = vld [vmem:[%s4133_s15 + $0x48] sm:$0xff] }
0x11a7   : > { %v3168_v45 = vpack.c.bf16 %v2139_v12, %v2138_v44 }
0x11a8   : > { %v2109_v40 = vmul.f32 %v2108_v39, %v2108_v39 }
0x11a9   : > { %3169 = vmatpush3.bf16.msra.mxu0 %v3168_v45 }
0x11aa   : > { %2110 = vadd.xlane.f32.xlu1 %v2109_v40  ;;  %3170 = vmatprep.subr.bf16.mxu0 %v3442_v1 }
0x11ad   : > { %3172 = vmatpush3.bf16.msra.mxu0 %v3171_v48 }
0x11ae   : > { %3173 = vmatprep.subr.bf16.mxu0 %v3442_v1 }
0x11b1   : > { %3175 = vmatpush3.bf16.msra.mxu0 %v3174_v51 }
0x11b2   : > { %3176 = vmatprep.subr.bf16.mxu0 %v3442_v1  ;;  %v2146_v1 = vld [vmem:[%s4134_s16] sm:$0x1] }
0x11b5   : > { %3178 = vmatpush3.bf16.msra.mxu0 %v3177_v54 }
0x1237   : > { %v2111_v55 = vpop.xlane.xlu1 %2110 }
0x1238   : > { %v2112_v56 = vmul.f32 0.03125, %v2111_v55 }
0x123a   : > { %v2113_v57 = vadd.f32 1e-12, %v2112_v56 }
0x123c   : > { %3274 = vrsqrt.f32 %v2113_v57 }
0x1246   : > { %v3275_v58 = vpop.eup %3274 }
0x1247   : > { %v2115_v59 = vmul.f32 %v3275_v58, %v2108_v39 }
0x1249   : > { %v2122_v61 = vmul.f32 %v2398_v0, %v2115_v59 }
0x124b   : > { %v2129_v62 = vadd.f32 %v2399_v60, %v2122_v61 }
0x124d   : > { %2897 = vmatmul.mubr.f32.vlgmr.msra.gmra.mrb[10].mxu0 %v2129_v62 }
0x1320   : > { %v2213_v63 = vpop.f32.mrb[10].mxu0 }
0x1321   : > { %v2214_v3 = vadd.f32 %v2213_v63, %v2146_v1  ;;  %v2898_v4 = vpop.f32.mrb[11].mxu0 }
0x1323   : > { %v2220_v5 = vmul.f32 %v2219_v2, %v2214_v3 }
0x1325   : > { %v2222_v6 = vsel %vm2221_vm2, %v2220_v5, 0.0 }
0x1326   : > { %2223 = vadd.xlane.f32.xlu0 %v2222_v6 }
0x13b3   : > { %v2224_v7 = vpop.xlane.xlu0 %2223 }
0x13b4   : > { %v2225_v9 = vmul.f32 0.0625, %v2224_v7 }
0x13b6   : > { %v2226_v10 = vsub.f32 %v2214_v3, %v2225_v9 }
0x13b8   : > { %v2227_v11 = vmul.f32 %v2226_v10, %v2219_v2 }
0x13ba   : > { %v2228_v16 = vmul.f32 %v2227_v11, %v2227_v11 }
0x13bc   : > { %v2229_v18 = vsel %vm2221_vm2, %v2228_v16, 0.0 }
0x13bd   : > { %2230 = vadd.xlane.f32.xlu1 %v2229_v18 }
0x144a   : > { %v2231_v19 = vpop.xlane.xlu1 %2230 }
0x144b   : > { %v2232_v20 = vmul.f32 0.0625, %v2231_v19 }
0x144d   : > { %v2233_v21 = vadd.f32 1e-05, %v2232_v20 }
0x144f   : > { %3276 = vrsqrt.f32 %v2233_v21 }
0x1459   : > { %v3277_v13 = vpop.eup %3276 }
0x145a   : > { %v2235_v23 = vmul.f32 %v3277_v13, %v2227_v11 }
0x145c   : > { %v2236_v26 = vmul.f32 %v2235_v23, %v2217_v22 }
0x145e   : > { %v2237_v27 = vadd.f32 %v2236_v26, %v2218_v25 }
0x1460   : > { %2238 = vst [vmem:[%s674_s27] sm:$0x1] %v2237_v27 }
0x1461   : > { %3375 = shalt.err (!%p3372_p11)
}
0x1462   : > { %s3376_s0 = scalar_lea.hbm %s4076_s30, 16  ;;  %s3380_s23 = scalar_lea.hbm %s4195_s28, 32 }
0x1463   : > { %p3377_p5 = scmp.ne.s32.totalorder %s4076_s30, %s3376_s0  ;;  %p3381_p9 = scmp.lt.u32.totalorder %s4076_s30, %s4195_s28 }
0x1464   : > { %p3382_p10 = scmp.lt.u32.totalorder %s3380_s23, %s3376_s0  ;;  %p3384_p13 = scmp.lt.u32.totalorder %s3376_s0, %s4076_s30 }
0x1465   : > { %p3378_p0 = pnand %p3377_p5, %p4196_p1 }
0x1466   : > { %p3383_p12 = por %p3382_p10, %p3381_p9 }
0x1467   : > { %p3379_p6 = pneg %p3378_p0 }
0x1468   : > { %p3385_p2 = por %p3384_p13, %p3383_p12 }
0x146a   : > { %p3386_p3 = pnand %p3385_p2, %p3379_p6 }
0x146c   : > { %3389 = shalt.err (!%p3386_p3)
}
0x146d   : > { %3191 = dma.vmem_to_hbm [thread:$0]  (%p4196_p1), %s4078_s1, 16, %s4076_s30, %s2240_s25  }
0x146e PF: > { %s4197_s17 = sld [smem:[#allocation15_spill]]  ;;  %s4198_s9 = sld [smem:[#allocation12_spill]] }
0x146f   : > { %s4199_s22 = sld [smem:[#allocation19_spill]] }
0x1474   : > { %p3213_p4 = scmp.ge.s32.totalorder %s4197_s17, 2  ;;  %s2264_s2 = sand.u32 1, %s4198_s9  }
0x1475   : > { %p4200_p7 = scmp.ne.s32.totalorder %s4199_s22, 0  ;;  %s2265_s4 = scalar_lea.sflag [#allocation4], %s2264_s2 }
0x1477   : > { %p3204_p8 = pnand %p3213_p4, %p4200_p7 }
0x1479   : > { %3415 = dma.done.wait (!%p3204_p8), %s2265_s4, 16  }
0x147a   : > { %3417 = vsyncadd (!%p3204_p8), %s2265_s4, 4294967280  ;;  %s4201_s24 = sld [smem:[#allocation16_spill]]  ;;  %s4202_s1 = sld [smem:[#allocation13_spill]] }
0x147b   : > { %s4203_s22 = sld [smem:[#allocation14_spill]]  ;;  %s4204_s23 = sld [smem:[#allocation17_spill]] }
0x1480   : > { %p32_p11 = scmp.ge.s32.totalorder %s4201_s24, 4  }
0x1482   :  { %34 = sbr.rel (!%p32_p11) target bundleno = 15 (0xf), region = 163 }
0x1489   :  { %2269 = vsyncpa [#allocation3], 1 }
0x148a   :  { %2271 = vsyncpa [#allocation3 + $0x1], 1 }
0x148b   :  { %2272 = vsyncpa [#allocation6], 1 }
0x148c   :  { %2273 = vsyncpa [#allocation4], 1 }
0x148d   :  { %2275 = vsyncpa [#allocation4 + $0x1], 1 }

</bundles_post_ra>
